<compile_context>
chip_gen: v5e
topology: v5e:2x2
jax: 0.10.0
libtpu: 0.0.40
codegen_flags: <defaults>
</compile_context>

<pallas_src>
import jax
import jax.numpy as jnp
from jax.experimental import pallas as pl
from jax.experimental.pallas import tpu as pltpu


# ----------------------------- Pallas kernel --------------------------------

def _vmem():
    return pl.BlockSpec(memory_space=pltpu.MemorySpace.VMEM)


def _smem():
    return pl.BlockSpec(memory_space=pltpu.MemorySpace.SMEM)


_PARAMS_PER_LAYER = 5  # w1, gamma, beta, w2, b2  (b1 omitted: cancels in training BN)


def _make_ginphi_kernel(n_layers, n_max):
    """Fused kernel: n_layers GIN layers + masked sum over the n_max position axis."""

    def kernel(a_ref, x_ref, mask_ref, eps_ref, *rest):
        n_p = _PARAMS_PER_LAYER * n_layers
        p_refs = rest[:n_p]            # per layer: w1, gamma, beta, w2, b2
        o_ref = rest[n_p]              # [N, out_dims] output
        xbuf_ref = rest[n_p + 1]       # VMEM scratch: activations between layers

        a = a_ref[...].astype(jnp.float32)          # [N, N] edge counts (exact in bf16)
        m = mask_ref[...]                           # [N, n_max] f32 validity mask
        x_full = x_ref[...]                         # [N, n_max * D_in] (lane-dense)
        n = a.shape[0]
        inv_cnt = 1.0 / float(n * n_max)            # BN batch size (incl. padded rows)

        for l in range(n_layers):
            w1 = p_refs[_PARAMS_PER_LAYER * l + 0][...]       # [d_in, d_hid]
            gamma = p_refs[_PARAMS_PER_LAYER * l + 1][...]    # [1, d_hid]
            beta = p_refs[_PARAMS_PER_LAYER * l + 2][...]     # [1, d_hid]
            w2 = p_refs[_PARAMS_PER_LAYER * l + 3][...]       # [d_hid, d_out]
            b2 = p_refs[_PARAMS_PER_LAYER * l + 4][...]       # [1, d_out]
            d_in, d_hid = w1.shape
            d_out = w2.shape[1]
            eps = eps_ref[l]                                  # scalar from SMEM

            # GIN neighbour aggregation over all n_max positions in ONE wide matmul.
            s_full = jnp.dot(a, x_full, preferred_element_type=jnp.float32)
            z_full = (1.0 + eps) * x_full + s_full            # [N, n_max * d_in]

            # Pass 1: fc1 (bias-free; b1 cancels under training-mode BN) + batch stats.
            hs = []
            h_sum = jnp.zeros((1, d_hid), jnp.float32)
            h_sq = jnp.zeros((1, d_hid), jnp.float32)
            for k in range(n_max):
                z_k = z_full[:, k * d_in:(k + 1) * d_in]          # [N, d_in]
                h_k = jnp.dot(z_k, w1, preferred_element_type=jnp.float32)
                hs.append(h_k)
                h_sum = h_sum + jnp.sum(h_k, axis=0, keepdims=True)
                h_sq = h_sq + jnp.sum(h_k * h_k, axis=0, keepdims=True)
            mu = h_sum * inv_cnt
            var = h_sq * inv_cnt - mu * mu                        # biased (training) var
            scale = gamma * jax.lax.rsqrt(var + 1e-5)
            shift = beta - mu * scale

            if l < n_layers - 1:
                # Pass 2: BN affine + ReLU + fc2, repacked lane-dense for next layer.
                for k in range(n_max):
                    r_k = jnp.maximum(hs[k] * scale + shift, 0.0)
                    y_k = jnp.dot(r_k, w2, preferred_element_type=jnp.float32) + b2
                    xbuf_ref[:, k * d_out:(k + 1) * d_out] = y_k
                x_full = xbuf_ref[...]
            else:
                # Last layer: fold the masked position-sum BEFORE fc2:
                #   PE = (sum_k m_k * relu_k) @ W2 + (sum_k m_k) * b2
                # -> a single fc2 matmul instead of n_max, and the epilogue becomes a
                #    cheap [N, d_hid] VPU accumulate.
                r = jnp.zeros((n, d_hid), jnp.float32)
                for k in range(n_max):
                    r = r + m[:, k:k + 1] * jnp.maximum(hs[k] * scale + shift, 0.0)
                cnt = jnp.sum(m, axis=1, keepdims=True)           # [N, 1] valid positions
                pe = jnp.dot(r, w2, preferred_element_type=jnp.float32) + cnt * b2
                o_ref[...] = pe.astype(o_ref.dtype)

    return kernel


def gin_phi_fused(a_bf16, x_flat, mask_f32, eps_all, layer_params):
    n = x_flat.shape[0]
    n_max = mask_f32.shape[1]
    n_layers = len(layer_params)
    hidden = layer_params[0]["w1"].shape[1]
    out_dims = layer_params[-1]["w2"].shape[1]

    flat = []
    for p in layer_params:
        # b1 is intentionally NOT passed: training-mode BatchNorm right after fc1
        # cancels any constant per-channel bias exactly.
        flat += [p["w1"], p["gamma"], p["beta"], p["w2"], p["b2"]]

    # Advisory cost estimate for XLA scheduling.
    flops = 0
    for li, p in enumerate(layer_params):
        d_in, d_hid = p["w1"].shape
        d_out = p["w2"].shape[1]
        flops += 2 * n * n * n_max * d_in                       # aggregation A @ X
        flops += 2 * n * n_max * d_in * d_hid                   # fc1
        if li < n_layers - 1:
            flops += 2 * n * n_max * d_hid * d_out              # fc2 (per position)
        else:
            flops += 2 * n * d_hid * d_out                      # fc2 (after masked sum)
    bytes_accessed = (a_bf16.size * 2 + x_flat.size * 4 + mask_f32.size * 4
                      + eps_all.size * 4 + sum(w.size * 4 for w in flat)
                      + n * out_dims * 4)

    kernel = _make_ginphi_kernel(n_layers, n_max)
    return pl.pallas_call(
        kernel,
        out_shape=jax.ShapeDtypeStruct((n, out_dims), jnp.float32),
        in_specs=[_vmem(), _vmem(), _vmem(), _smem()] + [_vmem()] * len(flat),
        out_specs=_vmem(),
        scratch_shapes=[pltpu.VMEM((n, n_max * hidden), jnp.float32)],
        compiler_params=pltpu.CompilerParams(vmem_limit_bytes=32 * 1024 * 1024),
        cost_estimate=pl.CostEstimate(flops=int(flops), transcendentals=0,
                                      bytes_accessed=int(bytes_accessed)),
    )(a_bf16, x_flat, mask_f32, eps_all, *flat)


# ------------------------------ parameter init ------------------------------

def init_mlp_params(key, d_in, d_hid, d_out):
    k1, k2, k3, k4 = jax.random.split(key, 4)
    return dict(
        w1=jax.random.normal(k1, (d_in, d_hid), jnp.float32) / jnp.sqrt(d_in),
        b1=jax.random.normal(k2, (1, d_hid), jnp.float32) * 0.01,   # no-op under BN
        gamma=jnp.ones((1, d_hid), jnp.float32),    # BatchNorm1d default affine
        beta=jnp.zeros((1, d_hid), jnp.float32),
        w2=jax.random.normal(k3, (d_hid, d_out), jnp.float32) / jnp.sqrt(d_hid),
        b2=jax.random.normal(k4, (1, d_out), jnp.float32) * 0.01,
    )


def init_ginphi_params(key, n_layers, in_dims, hidden_dims, out_dims):
    params = []
    d_in = in_dims
    for i in range(n_layers):
        key, k_eps, k_mlp = jax.random.split(key, 3)
        d_out = hidden_dims if i < n_layers - 1 else out_dims
        p = dict(eps=jax.random.normal(k_eps, (1,), jnp.float32))     # GINLayer.eps
        p.update(init_mlp_params(k_mlp, d_in, hidden_dims, d_out))    # MLPs(2, ...)
        params.append(p)
        d_in = hidden_dims
    return params


# ------------------------------- forward glue --------------------------------

def gin_phi_forward(W_list, edge_index, params):
    n_max = max(int(W.shape[0]) for W in W_list)
    m = int(W_list[0].shape[2])
    w_pad_list, mask_list = [], []
    for W in W_list:
        n_i = int(W.shape[0])
        zeros = jnp.zeros((n_i, n_max - int(W.shape[1]), m), jnp.float32)
        w_pad_list.append(jnp.concatenate([W, zeros], axis=1))
        mask_list.append(jnp.tile((jnp.arange(n_max) < n_i)[None, :], (n_i, 1)))
    W = jnp.concatenate(w_pad_list, axis=0)                   # [N_sum, n_max, M]
    mask = jnp.concatenate(mask_list, axis=0).astype(jnp.float32)
    n_sum = W.shape[0]

    # Dense (multi-)adjacency: A[i, j] = #edges j->i  (aggr='add', flow='source_to_target').
    # Data-dependent scatter stays in JAX glue; the kernel only sees a dense matmul.
    A = jnp.zeros((n_sum, n_sum), jnp.float32)
    A = A.at[edge_index[1], edge_index[0]].add(1.0)
    A = A.astype(jnp.bfloat16)      # small integer counts -> exact in bf16, half footprint

    x_flat = W.reshape(n_sum, n_max * m)                      # lane-dense [N, n_max*M]
    eps_all = jnp.concatenate([p["eps"] for p in params])     # (n_layers,)
    return gin_phi_fused(A, x_flat, mask, eps_all, params)    # [N_sum, out_dims]


# ----------------------------------- main ------------------------------------

if __name__ == "__main__":
    key = jax.random.PRNGKey(0)
    n_layers, in_dims, hidden_dims, out_dims = 3, 4, 32, 16
    n1, n2 = 6, 8                                    # two graphs, n_max = 8, N_sum = 14

    k1, k2, kp = jax.random.split(key, 3)
    W_list = [jax.random.normal(k1, (n1, n1, in_dims), jnp.float32),
              jax.random.normal(k2, (n2, n2, in_dims), jnp.float32)]

    def ring(n, off):
        src = jnp.arange(n) + off
        dst = (jnp.arange(n) + 1) % n + off
        return jnp.concatenate([jnp.stack([src, dst]), jnp.stack([dst, src])], axis=1)

    edge_index = jnp.concatenate([ring(n1, 0), ring(n2, n1)], axis=1).astype(jnp.int32)

    params = init_ginphi_params(kp, n_layers, in_dims, hidden_dims, out_dims)
    pe = gin_phi_forward(W_list, edge_index, params)
    pe = jax.block_until_ready(pe)
    assert pe.shape == (n1 + n2, out_dims) and pe.dtype == jnp.float32
    assert bool(jnp.all(jnp.isfinite(pe)))
    print("KERNEL_OK")
</pallas_src>

<mosaic_0001>
module attributes {stable_mosaic.version = 11 : i64} {
  func.func @kernel(%arg0: memref<14x14xbf16, #tpu.memory_space<vmem>>, %arg1: memref<14x32xf32, #tpu.memory_space<vmem>>, %arg2: memref<14x8xf32, #tpu.memory_space<vmem>>, %arg3: memref<3xf32, #tpu.memory_space<smem>>, %arg4: memref<4x32xf32, #tpu.memory_space<vmem>>, %arg5: memref<1x32xf32, #tpu.memory_space<vmem>>, %arg6: memref<1x32xf32, #tpu.memory_space<vmem>>, %arg7: memref<32x32xf32, #tpu.memory_space<vmem>>, %arg8: memref<1x32xf32, #tpu.memory_space<vmem>>, %arg9: memref<32x32xf32, #tpu.memory_space<vmem>>, %arg10: memref<1x32xf32, #tpu.memory_space<vmem>>, %arg11: memref<1x32xf32, #tpu.memory_space<vmem>>, %arg12: memref<32x32xf32, #tpu.memory_space<vmem>>, %arg13: memref<1x32xf32, #tpu.memory_space<vmem>>, %arg14: memref<32x32xf32, #tpu.memory_space<vmem>>, %arg15: memref<1x32xf32, #tpu.memory_space<vmem>>, %arg16: memref<1x32xf32, #tpu.memory_space<vmem>>, %arg17: memref<32x16xf32, #tpu.memory_space<vmem>>, %arg18: memref<1x16xf32, #tpu.memory_space<vmem>>, %arg19: memref<14x16xf32, #tpu.memory_space<vmem>>, %arg20: memref<14x256xf32, #tpu.memory_space<vmem>>) attributes {dimension_semantics = [], scalar_prefetch = 0 : i64, scratch_operands = 1 : i64, tpu.core_type = #tpu.core_type<tc>} {
    %c0 = arith.constant 0 : index
    %c0_0 = arith.constant 0 : index
    %0 = vector.load %arg0[%c0, %c0_0] : memref<14x14xbf16, #tpu.memory_space<vmem>>, vector<14x14xbf16>
    %1 = arith.extf %0 : vector<14x14xbf16> to vector<14x14xf32>
    %c0_1 = arith.constant 0 : index
    %c0_2 = arith.constant 0 : index
    %2 = vector.load %arg2[%c0_1, %c0_2] : memref<14x8xf32, #tpu.memory_space<vmem>>, vector<14x8xf32>
    %c0_3 = arith.constant 0 : index
    %c0_4 = arith.constant 0 : index
    %3 = vector.load %arg1[%c0_3, %c0_4] : memref<14x32xf32, #tpu.memory_space<vmem>>, vector<14x32xf32>
    %c0_5 = arith.constant 0 : index
    %c0_6 = arith.constant 0 : index
    %4 = vector.load %arg4[%c0_5, %c0_6] : memref<4x32xf32, #tpu.memory_space<vmem>>, vector<4x32xf32>
    %c0_7 = arith.constant 0 : index
    %c0_8 = arith.constant 0 : index
    %5 = vector.load %arg5[%c0_7, %c0_8] : memref<1x32xf32, #tpu.memory_space<vmem>>, vector<1x32xf32>
    %c0_9 = arith.constant 0 : index
    %c0_10 = arith.constant 0 : index
    %6 = vector.load %arg6[%c0_9, %c0_10] : memref<1x32xf32, #tpu.memory_space<vmem>>, vector<1x32xf32>
    %c0_11 = arith.constant 0 : index
    %c0_12 = arith.constant 0 : index
    %7 = vector.load %arg7[%c0_11, %c0_12] : memref<32x32xf32, #tpu.memory_space<vmem>>, vector<32x32xf32>
    %c0_13 = arith.constant 0 : index
    %c0_14 = arith.constant 0 : index
    %8 = vector.load %arg8[%c0_13, %c0_14] : memref<1x32xf32, #tpu.memory_space<vmem>>, vector<1x32xf32>
    %c0_15 = arith.constant 0 : index
    %9 = memref.load %arg3[%c0_15] : memref<3xf32, #tpu.memory_space<smem>>
    %cst = arith.constant dense<0.000000e+00> : vector<14x32xf32>
    %10 = tpu.matmul %1, %3, %cst {dimension_numbers = #tpu.dot_dimension_numbers<[1], [0], [0], [1], [0, 0, 1, 1], [], []>} : vector<14x14xf32>, vector<14x32xf32>, vector<14x32xf32> -> vector<14x32xf32>
    %cst_16 = arith.constant 1.000000e+00 : f32
    %11 = arith.addf %cst_16, %9 : f32
    %12 = vector.broadcast %11 : f32 to vector<14x32xf32>
    %13 = arith.mulf %12, %3 : vector<14x32xf32>
    %14 = arith.addf %13, %10 : vector<14x32xf32>
    %cst_17 = arith.constant 0.000000e+00 : f32
    %15 = vector.broadcast %cst_17 : f32 to vector<1x32xf32>
    %cst_18 = arith.constant 0.000000e+00 : f32
    %16 = vector.broadcast %cst_18 : f32 to vector<1x32xf32>
    %17 = vector.extract_strided_slice %14 {offsets = [0, 0], sizes = [14, 4], strides = [1, 1]} : vector<14x32xf32> to vector<14x4xf32>
    %cst_19 = arith.constant dense<0.000000e+00> : vector<14x32xf32>
    %18 = tpu.matmul %17, %4, %cst_19 {dimension_numbers = #tpu.dot_dimension_numbers<[1], [0], [0], [1], [0, 0, 1, 1], [], []>} : vector<14x4xf32>, vector<4x32xf32>, vector<14x32xf32> -> vector<14x32xf32>
    %cst_20 = arith.constant dense<0.000000e+00> : vector<32xf32>
    %19 = vector.multi_reduction <add>, %18, %cst_20 [0] : vector<14x32xf32> to vector<32xf32>
    %20 = vector.shape_cast %19 : vector<32xf32> to vector<1x32xf32>
    %21 = arith.addf %15, %20 : vector<1x32xf32>
    %22 = arith.mulf %18, %18 : vector<14x32xf32>
    %cst_21 = arith.constant dense<0.000000e+00> : vector<32xf32>
    %23 = vector.multi_reduction <add>, %22, %cst_21 [0] : vector<14x32xf32> to vector<32xf32>
    %24 = vector.shape_cast %23 : vector<32xf32> to vector<1x32xf32>
    %25 = arith.addf %16, %24 : vector<1x32xf32>
    %26 = vector.extract_strided_slice %14 {offsets = [0, 4], sizes = [14, 4], strides = [1, 1]} : vector<14x32xf32> to vector<14x4xf32>
    %cst_22 = arith.constant dense<0.000000e+00> : vector<14x32xf32>
    %27 = tpu.matmul %26, %4, %cst_22 {dimension_numbers = #tpu.dot_dimension_numbers<[1], [0], [0], [1], [0, 0, 1, 1], [], []>} : vector<14x4xf32>, vector<4x32xf32>, vector<14x32xf32> -> vector<14x32xf32>
    %cst_23 = arith.constant dense<0.000000e+00> : vector<32xf32>
    %28 = vector.multi_reduction <add>, %27, %cst_23 [0] : vector<14x32xf32> to vector<32xf32>
    %29 = vector.shape_cast %28 : vector<32xf32> to vector<1x32xf32>
    %30 = arith.addf %21, %29 : vector<1x32xf32>
    %31 = arith.mulf %27, %27 : vector<14x32xf32>
    %cst_24 = arith.constant dense<0.000000e+00> : vector<32xf32>
    %32 = vector.multi_reduction <add>, %31, %cst_24 [0] : vector<14x32xf32> to vector<32xf32>
    %33 = vector.shape_cast %32 : vector<32xf32> to vector<1x32xf32>
    %34 = arith.addf %25, %33 : vector<1x32xf32>
    %35 = vector.extract_strided_slice %14 {offsets = [0, 8], sizes = [14, 4], strides = [1, 1]} : vector<14x32xf32> to vector<14x4xf32>
    %cst_25 = arith.constant dense<0.000000e+00> : vector<14x32xf32>
    %36 = tpu.matmul %35, %4, %cst_25 {dimension_numbers = #tpu.dot_dimension_numbers<[1], [0], [0], [1], [0, 0, 1, 1], [], []>} : vector<14x4xf32>, vector<4x32xf32>, vector<14x32xf32> -> vector<14x32xf32>
    %cst_26 = arith.constant dense<0.000000e+00> : vector<32xf32>
    %37 = vector.multi_reduction <add>, %36, %cst_26 [0] : vector<14x32xf32> to vector<32xf32>
    %38 = vector.shape_cast %37 : vector<32xf32> to vector<1x32xf32>
    %39 = arith.addf %30, %38 : vector<1x32xf32>
    %40 = arith.mulf %36, %36 : vector<14x32xf32>
    %cst_27 = arith.constant dense<0.000000e+00> : vector<32xf32>
    %41 = vector.multi_reduction <add>, %40, %cst_27 [0] : vector<14x32xf32> to vector<32xf32>
    %42 = vector.shape_cast %41 : vector<32xf32> to vector<1x32xf32>
    %43 = arith.addf %34, %42 : vector<1x32xf32>
    %44 = vector.extract_strided_slice %14 {offsets = [0, 12], sizes = [14, 4], strides = [1, 1]} : vector<14x32xf32> to vector<14x4xf32>
    %cst_28 = arith.constant dense<0.000000e+00> : vector<14x32xf32>
    %45 = tpu.matmul %44, %4, %cst_28 {dimension_numbers = #tpu.dot_dimension_numbers<[1], [0], [0], [1], [0, 0, 1, 1], [], []>} : vector<14x4xf32>, vector<4x32xf32>, vector<14x32xf32> -> vector<14x32xf32>
    %cst_29 = arith.constant dense<0.000000e+00> : vector<32xf32>
    %46 = vector.multi_reduction <add>, %45, %cst_29 [0] : vector<14x32xf32> to vector<32xf32>
    %47 = vector.shape_cast %46 : vector<32xf32> to vector<1x32xf32>
    %48 = arith.addf %39, %47 : vector<1x32xf32>
    %49 = arith.mulf %45, %45 : vector<14x32xf32>
    %cst_30 = arith.constant dense<0.000000e+00> : vector<32xf32>
    %50 = vector.multi_reduction <add>, %49, %cst_30 [0] : vector<14x32xf32> to vector<32xf32>
    %51 = vector.shape_cast %50 : vector<32xf32> to vector<1x32xf32>
    %52 = arith.addf %43, %51 : vector<1x32xf32>
    %53 = vector.extract_strided_slice %14 {offsets = [0, 16], sizes = [14, 4], strides = [1, 1]} : vector<14x32xf32> to vector<14x4xf32>
    %cst_31 = arith.constant dense<0.000000e+00> : vector<14x32xf32>
    %54 = tpu.matmul %53, %4, %cst_31 {dimension_numbers = #tpu.dot_dimension_numbers<[1], [0], [0], [1], [0, 0, 1, 1], [], []>} : vector<14x4xf32>, vector<4x32xf32>, vector<14x32xf32> -> vector<14x32xf32>
    %cst_32 = arith.constant dense<0.000000e+00> : vector<32xf32>
    %55 = vector.multi_reduction <add>, %54, %cst_32 [0] : vector<14x32xf32> to vector<32xf32>
    %56 = vector.shape_cast %55 : vector<32xf32> to vector<1x32xf32>
    %57 = arith.addf %48, %56 : vector<1x32xf32>
    %58 = arith.mulf %54, %54 : vector<14x32xf32>
    %cst_33 = arith.constant dense<0.000000e+00> : vector<32xf32>
    %59 = vector.multi_reduction <add>, %58, %cst_33 [0] : vector<14x32xf32> to vector<32xf32>
    %60 = vector.shape_cast %59 : vector<32xf32> to vector<1x32xf32>
    %61 = arith.addf %52, %60 : vector<1x32xf32>
    %62 = vector.extract_strided_slice %14 {offsets = [0, 20], sizes = [14, 4], strides = [1, 1]} : vector<14x32xf32> to vector<14x4xf32>
    %cst_34 = arith.constant dense<0.000000e+00> : vector<14x32xf32>
    %63 = tpu.matmul %62, %4, %cst_34 {dimension_numbers = #tpu.dot_dimension_numbers<[1], [0], [0], [1], [0, 0, 1, 1], [], []>} : vector<14x4xf32>, vector<4x32xf32>, vector<14x32xf32> -> vector<14x32xf32>
    %cst_35 = arith.constant dense<0.000000e+00> : vector<32xf32>
    %64 = vector.multi_reduction <add>, %63, %cst_35 [0] : vector<14x32xf32> to vector<32xf32>
    %65 = vector.shape_cast %64 : vector<32xf32> to vector<1x32xf32>
    %66 = arith.addf %57, %65 : vector<1x32xf32>
    %67 = arith.mulf %63, %63 : vector<14x32xf32>
    %cst_36 = arith.constant dense<0.000000e+00> : vector<32xf32>
    %68 = vector.multi_reduction <add>, %67, %cst_36 [0] : vector<14x32xf32> to vector<32xf32>
    %69 = vector.shape_cast %68 : vector<32xf32> to vector<1x32xf32>
    %70 = arith.addf %61, %69 : vector<1x32xf32>
    %71 = vector.extract_strided_slice %14 {offsets = [0, 24], sizes = [14, 4], strides = [1, 1]} : vector<14x32xf32> to vector<14x4xf32>
    %cst_37 = arith.constant dense<0.000000e+00> : vector<14x32xf32>
    %72 = tpu.matmul %71, %4, %cst_37 {dimension_numbers = #tpu.dot_dimension_numbers<[1], [0], [0], [1], [0, 0, 1, 1], [], []>} : vector<14x4xf32>, vector<4x32xf32>, vector<14x32xf32> -> vector<14x32xf32>
    %cst_38 = arith.constant dense<0.000000e+00> : vector<32xf32>
    %73 = vector.multi_reduction <add>, %72, %cst_38 [0] : vector<14x32xf32> to vector<32xf32>
    %74 = vector.shape_cast %73 : vector<32xf32> to vector<1x32xf32>
    %75 = arith.addf %66, %74 : vector<1x32xf32>
    %76 = arith.mulf %72, %72 : vector<14x32xf32>
    %cst_39 = arith.constant dense<0.000000e+00> : vector<32xf32>
    %77 = vector.multi_reduction <add>, %76, %cst_39 [0] : vector<14x32xf32> to vector<32xf32>
    %78 = vector.shape_cast %77 : vector<32xf32> to vector<1x32xf32>
    %79 = arith.addf %70, %78 : vector<1x32xf32>
    %80 = vector.extract_strided_slice %14 {offsets = [0, 28], sizes = [14, 4], strides = [1, 1]} : vector<14x32xf32> to vector<14x4xf32>
    %cst_40 = arith.constant dense<0.000000e+00> : vector<14x32xf32>
    %81 = tpu.matmul %80, %4, %cst_40 {dimension_numbers = #tpu.dot_dimension_numbers<[1], [0], [0], [1], [0, 0, 1, 1], [], []>} : vector<14x4xf32>, vector<4x32xf32>, vector<14x32xf32> -> vector<14x32xf32>
    %cst_41 = arith.constant dense<0.000000e+00> : vector<32xf32>
    %82 = vector.multi_reduction <add>, %81, %cst_41 [0] : vector<14x32xf32> to vector<32xf32>
    %83 = vector.shape_cast %82 : vector<32xf32> to vector<1x32xf32>
    %84 = arith.addf %75, %83 : vector<1x32xf32>
    %85 = arith.mulf %81, %81 : vector<14x32xf32>
    %cst_42 = arith.constant dense<0.000000e+00> : vector<32xf32>
    %86 = vector.multi_reduction <add>, %85, %cst_42 [0] : vector<14x32xf32> to vector<32xf32>
    %87 = vector.shape_cast %86 : vector<32xf32> to vector<1x32xf32>
    %88 = arith.addf %79, %87 : vector<1x32xf32>
    %cst_43 = arith.constant 0.00892857183 : f32
    %89 = vector.broadcast %cst_43 : f32 to vector<1x32xf32>
    %90 = arith.mulf %84, %89 : vector<1x32xf32>
    %cst_44 = arith.constant 0.00892857183 : f32
    %91 = vector.broadcast %cst_44 : f32 to vector<1x32xf32>
    %92 = arith.mulf %88, %91 : vector<1x32xf32>
    %93 = arith.mulf %90, %90 : vector<1x32xf32>
    %94 = arith.subf %92, %93 : vector<1x32xf32>
    %cst_45 = arith.constant 9.99999974E-6 : f32
    %95 = vector.broadcast %cst_45 : f32 to vector<1x32xf32>
    %96 = arith.addf %94, %95 : vector<1x32xf32>
    %97 = math.rsqrt %96 : vector<1x32xf32>
    %98 = arith.mulf %5, %97 : vector<1x32xf32>
    %99 = arith.mulf %90, %98 : vector<1x32xf32>
    %100 = arith.subf %6, %99 : vector<1x32xf32>
    %101 = vector.broadcast %98 : vector<1x32xf32> to vector<14x32xf32>
    %102 = arith.mulf %18, %101 : vector<14x32xf32>
    %103 = vector.broadcast %100 : vector<1x32xf32> to vector<14x32xf32>
    %104 = arith.addf %102, %103 : vector<14x32xf32>
    %cst_46 = arith.constant 0.000000e+00 : f32
    %105 = vector.broadcast %cst_46 : f32 to vector<14x32xf32>
    %106 = arith.maximumf %104, %105 : vector<14x32xf32>
    %cst_47 = arith.constant dense<0.000000e+00> : vector<14x32xf32>
    %107 = tpu.matmul %106, %7, %cst_47 {dimension_numbers = #tpu.dot_dimension_numbers<[1], [0], [0], [1], [0, 0, 1, 1], [], []>} : vector<14x32xf32>, vector<32x32xf32>, vector<14x32xf32> -> vector<14x32xf32>
    %108 = vector.broadcast %8 : vector<1x32xf32> to vector<14x32xf32>
    %109 = arith.addf %107, %108 : vector<14x32xf32>
    %c0_48 = arith.constant 0 : index
    %c0_49 = arith.constant 0 : index
    %110 = vector.load %arg20[%c0_48, %c0_49] : memref<14x256xf32, #tpu.memory_space<vmem>>, vector<14x32xf32>
    tpu.vector_store %arg20[%c0_48, %c0_49], %109 {strides = array<i32>} : memref<14x256xf32, #tpu.memory_space<vmem>>, vector<14x32xf32>,
    %111 = vector.broadcast %98 : vector<1x32xf32> to vector<14x32xf32>
    %112 = arith.mulf %27, %111 : vector<14x32xf32>
    %113 = vector.broadcast %100 : vector<1x32xf32> to vector<14x32xf32>
    %114 = arith.addf %112, %113 : vector<14x32xf32>
    %cst_50 = arith.constant 0.000000e+00 : f32
    %115 = vector.broadcast %cst_50 : f32 to vector<14x32xf32>
    %116 = arith.maximumf %114, %115 : vector<14x32xf32>
    %cst_51 = arith.constant dense<0.000000e+00> : vector<14x32xf32>
    %117 = tpu.matmul %116, %7, %cst_51 {dimension_numbers = #tpu.dot_dimension_numbers<[1], [0], [0], [1], [0, 0, 1, 1], [], []>} : vector<14x32xf32>, vector<32x32xf32>, vector<14x32xf32> -> vector<14x32xf32>
    %118 = vector.broadcast %8 : vector<1x32xf32> to vector<14x32xf32>
    %119 = arith.addf %117, %118 : vector<14x32xf32>
    %c0_52 = arith.constant 0 : index
    %c32 = arith.constant 32 : index
    %120 = vector.load %arg20[%c0_52, %c32] : memref<14x256xf32, #tpu.memory_space<vmem>>, vector<14x32xf32>
    tpu.vector_store %arg20[%c0_52, %c32], %119 {strides = array<i32>} : memref<14x256xf32, #tpu.memory_space<vmem>>, vector<14x32xf32>,
    %121 = vector.broadcast %98 : vector<1x32xf32> to vector<14x32xf32>
    %122 = arith.mulf %36, %121 : vector<14x32xf32>
    %123 = vector.broadcast %100 : vector<1x32xf32> to vector<14x32xf32>
    %124 = arith.addf %122, %123 : vector<14x32xf32>
    %cst_53 = arith.constant 0.000000e+00 : f32
    %125 = vector.broadcast %cst_53 : f32 to vector<14x32xf32>
    %126 = arith.maximumf %124, %125 : vector<14x32xf32>
    %cst_54 = arith.constant dense<0.000000e+00> : vector<14x32xf32>
    %127 = tpu.matmul %126, %7, %cst_54 {dimension_numbers = #tpu.dot_dimension_numbers<[1], [0], [0], [1], [0, 0, 1, 1], [], []>} : vector<14x32xf32>, vector<32x32xf32>, vector<14x32xf32> -> vector<14x32xf32>
    %128 = vector.broadcast %8 : vector<1x32xf32> to vector<14x32xf32>
    %129 = arith.addf %127, %128 : vector<14x32xf32>
    %c0_55 = arith.constant 0 : index
    %c64 = arith.constant 64 : index
    %130 = vector.load %arg20[%c0_55, %c64] : memref<14x256xf32, #tpu.memory_space<vmem>>, vector<14x32xf32>
    tpu.vector_store %arg20[%c0_55, %c64], %129 {strides = array<i32>} : memref<14x256xf32, #tpu.memory_space<vmem>>, vector<14x32xf32>,
    %131 = vector.broadcast %98 : vector<1x32xf32> to vector<14x32xf32>
    %132 = arith.mulf %45, %131 : vector<14x32xf32>
    %133 = vector.broadcast %100 : vector<1x32xf32> to vector<14x32xf32>
    %134 = arith.addf %132, %133 : vector<14x32xf32>
    %cst_56 = arith.constant 0.000000e+00 : f32
    %135 = vector.broadcast %cst_56 : f32 to vector<14x32xf32>
    %136 = arith.maximumf %134, %135 : vector<14x32xf32>
    %cst_57 = arith.constant dense<0.000000e+00> : vector<14x32xf32>
    %137 = tpu.matmul %136, %7, %cst_57 {dimension_numbers = #tpu.dot_dimension_numbers<[1], [0], [0], [1], [0, 0, 1, 1], [], []>} : vector<14x32xf32>, vector<32x32xf32>, vector<14x32xf32> -> vector<14x32xf32>
    %138 = vector.broadcast %8 : vector<1x32xf32> to vector<14x32xf32>
    %139 = arith.addf %137, %138 : vector<14x32xf32>
    %c0_58 = arith.constant 0 : index
    %c96 = arith.constant 96 : index
    %140 = vector.load %arg20[%c0_58, %c96] : memref<14x256xf32, #tpu.memory_space<vmem>>, vector<14x32xf32>
    tpu.vector_store %arg20[%c0_58, %c96], %139 {strides = array<i32>} : memref<14x256xf32, #tpu.memory_space<vmem>>, vector<14x32xf32>,
    %141 = vector.broadcast %98 : vector<1x32xf32> to vector<14x32xf32>
    %142 = arith.mulf %54, %141 : vector<14x32xf32>
    %143 = vector.broadcast %100 : vector<1x32xf32> to vector<14x32xf32>
    %144 = arith.addf %142, %143 : vector<14x32xf32>
    %cst_59 = arith.constant 0.000000e+00 : f32
    %145 = vector.broadcast %cst_59 : f32 to vector<14x32xf32>
    %146 = arith.maximumf %144, %145 : vector<14x32xf32>
    %cst_60 = arith.constant dense<0.000000e+00> : vector<14x32xf32>
    %147 = tpu.matmul %146, %7, %cst_60 {dimension_numbers = #tpu.dot_dimension_numbers<[1], [0], [0], [1], [0, 0, 1, 1], [], []>} : vector<14x32xf32>, vector<32x32xf32>, vector<14x32xf32> -> vector<14x32xf32>
    %148 = vector.broadcast %8 : vector<1x32xf32> to vector<14x32xf32>
    %149 = arith.addf %147, %148 : vector<14x32xf32>
    %c0_61 = arith.constant 0 : index
    %c128 = arith.constant 128 : index
    %150 = vector.load %arg20[%c0_61, %c128] : memref<14x256xf32, #tpu.memory_space<vmem>>, vector<14x32xf32>
    tpu.vector_store %arg20[%c0_61, %c128], %149 {strides = array<i32>} : memref<14x256xf32, #tpu.memory_space<vmem>>, vector<14x32xf32>,
    %151 = vector.broadcast %98 : vector<1x32xf32> to vector<14x32xf32>
    %152 = arith.mulf %63, %151 : vector<14x32xf32>
    %153 = vector.broadcast %100 : vector<1x32xf32> to vector<14x32xf32>
    %154 = arith.addf %152, %153 : vector<14x32xf32>
    %cst_62 = arith.constant 0.000000e+00 : f32
    %155 = vector.broadcast %cst_62 : f32 to vector<14x32xf32>
    %156 = arith.maximumf %154, %155 : vector<14x32xf32>
    %cst_63 = arith.constant dense<0.000000e+00> : vector<14x32xf32>
    %157 = tpu.matmul %156, %7, %cst_63 {dimension_numbers = #tpu.dot_dimension_numbers<[1], [0], [0], [1], [0, 0, 1, 1], [], []>} : vector<14x32xf32>, vector<32x32xf32>, vector<14x32xf32> -> vector<14x32xf32>
    %158 = vector.broadcast %8 : vector<1x32xf32> to vector<14x32xf32>
    %159 = arith.addf %157, %158 : vector<14x32xf32>
    %c0_64 = arith.constant 0 : index
    %c160 = arith.constant 160 : index
    %160 = vector.load %arg20[%c0_64, %c160] : memref<14x256xf32, #tpu.memory_space<vmem>>, vector<14x32xf32>
    tpu.vector_store %arg20[%c0_64, %c160], %159 {strides = array<i32>} : memref<14x256xf32, #tpu.memory_space<vmem>>, vector<14x32xf32>,
    %161 = vector.broadcast %98 : vector<1x32xf32> to vector<14x32xf32>
    %162 = arith.mulf %72, %161 : vector<14x32xf32>
    %163 = vector.broadcast %100 : vector<1x32xf32> to vector<14x32xf32>
    %164 = arith.addf %162, %163 : vector<14x32xf32>
    %cst_65 = arith.constant 0.000000e+00 : f32
    %165 = vector.broadcast %cst_65 : f32 to vector<14x32xf32>
    %166 = arith.maximumf %164, %165 : vector<14x32xf32>
    %cst_66 = arith.constant dense<0.000000e+00> : vector<14x32xf32>
    %167 = tpu.matmul %166, %7, %cst_66 {dimension_numbers = #tpu.dot_dimension_numbers<[1], [0], [0], [1], [0, 0, 1, 1], [], []>} : vector<14x32xf32>, vector<32x32xf32>, vector<14x32xf32> -> vector<14x32xf32>
    %168 = vector.broadcast %8 : vector<1x32xf32> to vector<14x32xf32>
    %169 = arith.addf %167, %168 : vector<14x32xf32>
    %c0_67 = arith.constant 0 : index
    %c192 = arith.constant 192 : index
    %170 = vector.load %arg20[%c0_67, %c192] : memref<14x256xf32, #tpu.memory_space<vmem>>, vector<14x32xf32>
    tpu.vector_store %arg20[%c0_67, %c192], %169 {strides = array<i32>} : memref<14x256xf32, #tpu.memory_space<vmem>>, vector<14x32xf32>,
    %171 = vector.broadcast %98 : vector<1x32xf32> to vector<14x32xf32>
    %172 = arith.mulf %81, %171 : vector<14x32xf32>
    %173 = vector.broadcast %100 : vector<1x32xf32> to vector<14x32xf32>
    %174 = arith.addf %172, %173 : vector<14x32xf32>
    %cst_68 = arith.constant 0.000000e+00 : f32
    %175 = vector.broadcast %cst_68 : f32 to vector<14x32xf32>
    %176 = arith.maximumf %174, %175 : vector<14x32xf32>
    %cst_69 = arith.constant dense<0.000000e+00> : vector<14x32xf32>
    %177 = tpu.matmul %176, %7, %cst_69 {dimension_numbers = #tpu.dot_dimension_numbers<[1], [0], [0], [1], [0, 0, 1, 1], [], []>} : vector<14x32xf32>, vector<32x32xf32>, vector<14x32xf32> -> vector<14x32xf32>
    %178 = vector.broadcast %8 : vector<1x32xf32> to vector<14x32xf32>
    %179 = arith.addf %177, %178 : vector<14x32xf32>
    %c0_70 = arith.constant 0 : index
    %c224 = arith.constant 224 : index
    %180 = vector.load %arg20[%c0_70, %c224] : memref<14x256xf32, #tpu.memory_space<vmem>>, vector<14x32xf32>
    tpu.vector_store %arg20[%c0_70, %c224], %179 {strides = array<i32>} : memref<14x256xf32, #tpu.memory_space<vmem>>, vector<14x32xf32>,
    %c0_71 = arith.constant 0 : index
    %c0_72 = arith.constant 0 : index
    %181 = vector.load %arg20[%c0_71, %c0_72] : memref<14x256xf32, #tpu.memory_space<vmem>>, vector<14x256xf32>
    %c0_73 = arith.constant 0 : index
    %c0_74 = arith.constant 0 : index
    %182 = vector.load %arg9[%c0_73, %c0_74] : memref<32x32xf32, #tpu.memory_space<vmem>>, vector<32x32xf32>
    %c0_75 = arith.constant 0 : index
    %c0_76 = arith.constant 0 : index
    %183 = vector.load %arg10[%c0_75, %c0_76] : memref<1x32xf32, #tpu.memory_space<vmem>>, vector<1x32xf32>
    %c0_77 = arith.constant 0 : index
    %c0_78 = arith.constant 0 : index
    %184 = vector.load %arg11[%c0_77, %c0_78] : memref<1x32xf32, #tpu.memory_space<vmem>>, vector<1x32xf32>
    %c0_79 = arith.constant 0 : index
    %c0_80 = arith.constant 0 : index
    %185 = vector.load %arg12[%c0_79, %c0_80] : memref<32x32xf32, #tpu.memory_space<vmem>>, vector<32x32xf32>
    %c0_81 = arith.constant 0 : index
    %c0_82 = arith.constant 0 : index
    %186 = vector.load %arg13[%c0_81, %c0_82] : memref<1x32xf32, #tpu.memory_space<vmem>>, vector<1x32xf32>
    %c1 = arith.constant 1 : index
    %187 = memref.load %arg3[%c1] : memref<3xf32, #tpu.memory_space<smem>>
    %cst_83 = arith.constant dense<0.000000e+00> : vector<14x256xf32>
    %188 = tpu.matmul %1, %181, %cst_83 {dimension_numbers = #tpu.dot_dimension_numbers<[1], [0], [0], [1], [0, 0, 1, 1], [], []>} : vector<14x14xf32>, vector<14x256xf32>, vector<14x256xf32> -> vector<14x256xf32>
    %cst_84 = arith.constant 1.000000e+00 : f32
    %189 = arith.addf %cst_84, %187 : f32
    %190 = vector.broadcast %189 : f32 to vector<14x256xf32>
    %191 = arith.mulf %190, %181 : vector<14x256xf32>
    %192 = arith.addf %191, %188 : vector<14x256xf32>
    %cst_85 = arith.constant 0.000000e+00 : f32
    %193 = vector.broadcast %cst_85 : f32 to vector<1x32xf32>
    %cst_86 = arith.constant 0.000000e+00 : f32
    %194 = vector.broadcast %cst_86 : f32 to vector<1x32xf32>
    %195 = vector.extract_strided_slice %192 {offsets = [0, 0], sizes = [14, 32], strides = [1, 1]} : vector<14x256xf32> to vector<14x32xf32>
    %cst_87 = arith.constant dense<0.000000e+00> : vector<14x32xf32>
    %196 = tpu.matmul %195, %182, %cst_87 {dimension_numbers = #tpu.dot_dimension_numbers<[1], [0], [0], [1], [0, 0, 1, 1], [], []>} : vector<14x32xf32>, vector<32x32xf32>, vector<14x32xf32> -> vector<14x32xf32>
    %cst_88 = arith.constant dense<0.000000e+00> : vector<32xf32>
    %197 = vector.multi_reduction <add>, %196, %cst_88 [0] : vector<14x32xf32> to vector<32xf32>
    %198 = vector.shape_cast %197 : vector<32xf32> to vector<1x32xf32>
    %199 = arith.addf %193, %198 : vector<1x32xf32>
    %200 = arith.mulf %196, %196 : vector<14x32xf32>
    %cst_89 = arith.constant dense<0.000000e+00> : vector<32xf32>
    %201 = vector.multi_reduction <add>, %200, %cst_89 [0] : vector<14x32xf32> to vector<32xf32>
    %202 = vector.shape_cast %201 : vector<32xf32> to vector<1x32xf32>
    %203 = arith.addf %194, %202 : vector<1x32xf32>
    %204 = vector.extract_strided_slice %192 {offsets = [0, 32], sizes = [14, 32], strides = [1, 1]} : vector<14x256xf32> to vector<14x32xf32>
    %cst_90 = arith.constant dense<0.000000e+00> : vector<14x32xf32>
    %205 = tpu.matmul %204, %182, %cst_90 {dimension_numbers = #tpu.dot_dimension_numbers<[1], [0], [0], [1], [0, 0, 1, 1], [], []>} : vector<14x32xf32>, vector<32x32xf32>, vector<14x32xf32> -> vector<14x32xf32>
    %cst_91 = arith.constant dense<0.000000e+00> : vector<32xf32>
    %206 = vector.multi_reduction <add>, %205, %cst_91 [0] : vector<14x32xf32> to vector<32xf32>
    %207 = vector.shape_cast %206 : vector<32xf32> to vector<1x32xf32>
    %208 = arith.addf %199, %207 : vector<1x32xf32>
    %209 = arith.mulf %205, %205 : vector<14x32xf32>
    %cst_92 = arith.constant dense<0.000000e+00> : vector<32xf32>
    %210 = vector.multi_reduction <add>, %209, %cst_92 [0] : vector<14x32xf32> to vector<32xf32>
    %211 = vector.shape_cast %210 : vector<32xf32> to vector<1x32xf32>
    %212 = arith.addf %203, %211 : vector<1x32xf32>
    %213 = vector.extract_strided_slice %192 {offsets = [0, 64], sizes = [14, 32], strides = [1, 1]} : vector<14x256xf32> to vector<14x32xf32>
    %cst_93 = arith.constant dense<0.000000e+00> : vector<14x32xf32>
    %214 = tpu.matmul %213, %182, %cst_93 {dimension_numbers = #tpu.dot_dimension_numbers<[1], [0], [0], [1], [0, 0, 1, 1], [], []>} : vector<14x32xf32>, vector<32x32xf32>, vector<14x32xf32> -> vector<14x32xf32>
    %cst_94 = arith.constant dense<0.000000e+00> : vector<32xf32>
    %215 = vector.multi_reduction <add>, %214, %cst_94 [0] : vector<14x32xf32> to vector<32xf32>
    %216 = vector.shape_cast %215 : vector<32xf32> to vector<1x32xf32>
    %217 = arith.addf %208, %216 : vector<1x32xf32>
    %218 = arith.mulf %214, %214 : vector<14x32xf32>
    %cst_95 = arith.constant dense<0.000000e+00> : vector<32xf32>
    %219 = vector.multi_reduction <add>, %218, %cst_95 [0] : vector<14x32xf32> to vector<32xf32>
    %220 = vector.shape_cast %219 : vector<32xf32> to vector<1x32xf32>
    %221 = arith.addf %212, %220 : vector<1x32xf32>
    %222 = vector.extract_strided_slice %192 {offsets = [0, 96], sizes = [14, 32], strides = [1, 1]} : vector<14x256xf32> to vector<14x32xf32>
    %cst_96 = arith.constant dense<0.000000e+00> : vector<14x32xf32>
    %223 = tpu.matmul %222, %182, %cst_96 {dimension_numbers = #tpu.dot_dimension_numbers<[1], [0], [0], [1], [0, 0, 1, 1], [], []>} : vector<14x32xf32>, vector<32x32xf32>, vector<14x32xf32> -> vector<14x32xf32>
    %cst_97 = arith.constant dense<0.000000e+00> : vector<32xf32>
    %224 = vector.multi_reduction <add>, %223, %cst_97 [0] : vector<14x32xf32> to vector<32xf32>
    %225 = vector.shape_cast %224 : vector<32xf32> to vector<1x32xf32>
    %226 = arith.addf %217, %225 : vector<1x32xf32>
    %227 = arith.mulf %223, %223 : vector<14x32xf32>
    %cst_98 = arith.constant dense<0.000000e+00> : vector<32xf32>
    %228 = vector.multi_reduction <add>, %227, %cst_98 [0] : vector<14x32xf32> to vector<32xf32>
    %229 = vector.shape_cast %228 : vector<32xf32> to vector<1x32xf32>
    %230 = arith.addf %221, %229 : vector<1x32xf32>
    %231 = vector.extract_strided_slice %192 {offsets = [0, 128], sizes = [14, 32], strides = [1, 1]} : vector<14x256xf32> to vector<14x32xf32>
    %cst_99 = arith.constant dense<0.000000e+00> : vector<14x32xf32>
    %232 = tpu.matmul %231, %182, %cst_99 {dimension_numbers = #tpu.dot_dimension_numbers<[1], [0], [0], [1], [0, 0, 1, 1], [], []>} : vector<14x32xf32>, vector<32x32xf32>, vector<14x32xf32> -> vector<14x32xf32>
    %cst_100 = arith.constant dense<0.000000e+00> : vector<32xf32>
    %233 = vector.multi_reduction <add>, %232, %cst_100 [0] : vector<14x32xf32> to vector<32xf32>
    %234 = vector.shape_cast %233 : vector<32xf32> to vector<1x32xf32>
    %235 = arith.addf %226, %234 : vector<1x32xf32>
    %236 = arith.mulf %232, %232 : vector<14x32xf32>
    %cst_101 = arith.constant dense<0.000000e+00> : vector<32xf32>
    %237 = vector.multi_reduction <add>, %236, %cst_101 [0] : vector<14x32xf32> to vector<32xf32>
    %238 = vector.shape_cast %237 : vector<32xf32> to vector<1x32xf32>
    %239 = arith.addf %230, %238 : vector<1x32xf32>
    %240 = vector.extract_strided_slice %192 {offsets = [0, 160], sizes = [14, 32], strides = [1, 1]} : vector<14x256xf32> to vector<14x32xf32>
    %cst_102 = arith.constant dense<0.000000e+00> : vector<14x32xf32>
    %241 = tpu.matmul %240, %182, %cst_102 {dimension_numbers = #tpu.dot_dimension_numbers<[1], [0], [0], [1], [0, 0, 1, 1], [], []>} : vector<14x32xf32>, vector<32x32xf32>, vector<14x32xf32> -> vector<14x32xf32>
    %cst_103 = arith.constant dense<0.000000e+00> : vector<32xf32>
    %242 = vector.multi_reduction <add>, %241, %cst_103 [0] : vector<14x32xf32> to vector<32xf32>
    %243 = vector.shape_cast %242 : vector<32xf32> to vector<1x32xf32>
    %244 = arith.addf %235, %243 : vector<1x32xf32>
    %245 = arith.mulf %241, %241 : vector<14x32xf32>
    %cst_104 = arith.constant dense<0.000000e+00> : vector<32xf32>
    %246 = vector.multi_reduction <add>, %245, %cst_104 [0] : vector<14x32xf32> to vector<32xf32>
    %247 = vector.shape_cast %246 : vector<32xf32> to vector<1x32xf32>
    %248 = arith.addf %239, %247 : vector<1x32xf32>
    %249 = vector.extract_strided_slice %192 {offsets = [0, 192], sizes = [14, 32], strides = [1, 1]} : vector<14x256xf32> to vector<14x32xf32>
    %cst_105 = arith.constant dense<0.000000e+00> : vector<14x32xf32>
    %250 = tpu.matmul %249, %182, %cst_105 {dimension_numbers = #tpu.dot_dimension_numbers<[1], [0], [0], [1], [0, 0, 1, 1], [], []>} : vector<14x32xf32>, vector<32x32xf32>, vector<14x32xf32> -> vector<14x32xf32>
    %cst_106 = arith.constant dense<0.000000e+00> : vector<32xf32>
    %251 = vector.multi_reduction <add>, %250, %cst_106 [0] : vector<14x32xf32> to vector<32xf32>
    %252 = vector.shape_cast %251 : vector<32xf32> to vector<1x32xf32>
    %253 = arith.addf %244, %252 : vector<1x32xf32>
    %254 = arith.mulf %250, %250 : vector<14x32xf32>
    %cst_107 = arith.constant dense<0.000000e+00> : vector<32xf32>
    %255 = vector.multi_reduction <add>, %254, %cst_107 [0] : vector<14x32xf32> to vector<32xf32>
    %256 = vector.shape_cast %255 : vector<32xf32> to vector<1x32xf32>
    %257 = arith.addf %248, %256 : vector<1x32xf32>
    %258 = vector.extract_strided_slice %192 {offsets = [0, 224], sizes = [14, 32], strides = [1, 1]} : vector<14x256xf32> to vector<14x32xf32>
    %cst_108 = arith.constant dense<0.000000e+00> : vector<14x32xf32>
    %259 = tpu.matmul %258, %182, %cst_108 {dimension_numbers = #tpu.dot_dimension_numbers<[1], [0], [0], [1], [0, 0, 1, 1], [], []>} : vector<14x32xf32>, vector<32x32xf32>, vector<14x32xf32> -> vector<14x32xf32>
    %cst_109 = arith.constant dense<0.000000e+00> : vector<32xf32>
    %260 = vector.multi_reduction <add>, %259, %cst_109 [0] : vector<14x32xf32> to vector<32xf32>
    %261 = vector.shape_cast %260 : vector<32xf32> to vector<1x32xf32>
    %262 = arith.addf %253, %261 : vector<1x32xf32>
    %263 = arith.mulf %259, %259 : vector<14x32xf32>
    %cst_110 = arith.constant dense<0.000000e+00> : vector<32xf32>
    %264 = vector.multi_reduction <add>, %263, %cst_110 [0] : vector<14x32xf32> to vector<32xf32>
    %265 = vector.shape_cast %264 : vector<32xf32> to vector<1x32xf32>
    %266 = arith.addf %257, %265 : vector<1x32xf32>
    %cst_111 = arith.constant 0.00892857183 : f32
    %267 = vector.broadcast %cst_111 : f32 to vector<1x32xf32>
    %268 = arith.mulf %262, %267 : vector<1x32xf32>
    %cst_112 = arith.constant 0.00892857183 : f32
    %269 = vector.broadcast %cst_112 : f32 to vector<1x32xf32>
    %270 = arith.mulf %266, %269 : vector<1x32xf32>
    %271 = arith.mulf %268, %268 : vector<1x32xf32>
    %272 = arith.subf %270, %271 : vector<1x32xf32>
    %cst_113 = arith.constant 9.99999974E-6 : f32
    %273 = vector.broadcast %cst_113 : f32 to vector<1x32xf32>
    %274 = arith.addf %272, %273 : vector<1x32xf32>
    %275 = math.rsqrt %274 : vector<1x32xf32>
    %276 = arith.mulf %183, %275 : vector<1x32xf32>
    %277 = arith.mulf %268, %276 : vector<1x32xf32>
    %278 = arith.subf %184, %277 : vector<1x32xf32>
    %279 = vector.broadcast %276 : vector<1x32xf32> to vector<14x32xf32>
    %280 = arith.mulf %196, %279 : vector<14x32xf32>
    %281 = vector.broadcast %278 : vector<1x32xf32> to vector<14x32xf32>
    %282 = arith.addf %280, %281 : vector<14x32xf32>
    %cst_114 = arith.constant 0.000000e+00 : f32
    %283 = vector.broadcast %cst_114 : f32 to vector<14x32xf32>
    %284 = arith.maximumf %282, %283 : vector<14x32xf32>
    %cst_115 = arith.constant dense<0.000000e+00> : vector<14x32xf32>
    %285 = tpu.matmul %284, %185, %cst_115 {dimension_numbers = #tpu.dot_dimension_numbers<[1], [0], [0], [1], [0, 0, 1, 1], [], []>} : vector<14x32xf32>, vector<32x32xf32>, vector<14x32xf32> -> vector<14x32xf32>
    %286 = vector.broadcast %186 : vector<1x32xf32> to vector<14x32xf32>
    %287 = arith.addf %285, %286 : vector<14x32xf32>
    %c0_116 = arith.constant 0 : index
    %c0_117 = arith.constant 0 : index
    %288 = vector.load %arg20[%c0_116, %c0_117] : memref<14x256xf32, #tpu.memory_space<vmem>>, vector<14x32xf32>
    tpu.vector_store %arg20[%c0_116, %c0_117], %287 {strides = array<i32>} : memref<14x256xf32, #tpu.memory_space<vmem>>, vector<14x32xf32>,
    %289 = vector.broadcast %276 : vector<1x32xf32> to vector<14x32xf32>
    %290 = arith.mulf %205, %289 : vector<14x32xf32>
    %291 = vector.broadcast %278 : vector<1x32xf32> to vector<14x32xf32>
    %292 = arith.addf %290, %291 : vector<14x32xf32>
    %cst_118 = arith.constant 0.000000e+00 : f32
    %293 = vector.broadcast %cst_118 : f32 to vector<14x32xf32>
    %294 = arith.maximumf %292, %293 : vector<14x32xf32>
    %cst_119 = arith.constant dense<0.000000e+00> : vector<14x32xf32>
    %295 = tpu.matmul %294, %185, %cst_119 {dimension_numbers = #tpu.dot_dimension_numbers<[1], [0], [0], [1], [0, 0, 1, 1], [], []>} : vector<14x32xf32>, vector<32x32xf32>, vector<14x32xf32> -> vector<14x32xf32>
    %296 = vector.broadcast %186 : vector<1x32xf32> to vector<14x32xf32>
    %297 = arith.addf %295, %296 : vector<14x32xf32>
    %c0_120 = arith.constant 0 : index
    %c32_121 = arith.constant 32 : index
    %298 = vector.load %arg20[%c0_120, %c32_121] : memref<14x256xf32, #tpu.memory_space<vmem>>, vector<14x32xf32>
    tpu.vector_store %arg20[%c0_120, %c32_121], %297 {strides = array<i32>} : memref<14x256xf32, #tpu.memory_space<vmem>>, vector<14x32xf32>,
    %299 = vector.broadcast %276 : vector<1x32xf32> to vector<14x32xf32>
    %300 = arith.mulf %214, %299 : vector<14x32xf32>
    %301 = vector.broadcast %278 : vector<1x32xf32> to vector<14x32xf32>
    %302 = arith.addf %300, %301 : vector<14x32xf32>
    %cst_122 = arith.constant 0.000000e+00 : f32
    %303 = vector.broadcast %cst_122 : f32 to vector<14x32xf32>
    %304 = arith.maximumf %302, %303 : vector<14x32xf32>
    %cst_123 = arith.constant dense<0.000000e+00> : vector<14x32xf32>
    %305 = tpu.matmul %304, %185, %cst_123 {dimension_numbers = #tpu.dot_dimension_numbers<[1], [0], [0], [1], [0, 0, 1, 1], [], []>} : vector<14x32xf32>, vector<32x32xf32>, vector<14x32xf32> -> vector<14x32xf32>
    %306 = vector.broadcast %186 : vector<1x32xf32> to vector<14x32xf32>
    %307 = arith.addf %305, %306 : vector<14x32xf32>
    %c0_124 = arith.constant 0 : index
    %c64_125 = arith.constant 64 : index
    %308 = vector.load %arg20[%c0_124, %c64_125] : memref<14x256xf32, #tpu.memory_space<vmem>>, vector<14x32xf32>
    tpu.vector_store %arg20[%c0_124, %c64_125], %307 {strides = array<i32>} : memref<14x256xf32, #tpu.memory_space<vmem>>, vector<14x32xf32>,
    %309 = vector.broadcast %276 : vector<1x32xf32> to vector<14x32xf32>
    %310 = arith.mulf %223, %309 : vector<14x32xf32>
    %311 = vector.broadcast %278 : vector<1x32xf32> to vector<14x32xf32>
    %312 = arith.addf %310, %311 : vector<14x32xf32>
    %cst_126 = arith.constant 0.000000e+00 : f32
    %313 = vector.broadcast %cst_126 : f32 to vector<14x32xf32>
    %314 = arith.maximumf %312, %313 : vector<14x32xf32>
    %cst_127 = arith.constant dense<0.000000e+00> : vector<14x32xf32>
    %315 = tpu.matmul %314, %185, %cst_127 {dimension_numbers = #tpu.dot_dimension_numbers<[1], [0], [0], [1], [0, 0, 1, 1], [], []>} : vector<14x32xf32>, vector<32x32xf32>, vector<14x32xf32> -> vector<14x32xf32>
    %316 = vector.broadcast %186 : vector<1x32xf32> to vector<14x32xf32>
    %317 = arith.addf %315, %316 : vector<14x32xf32>
    %c0_128 = arith.constant 0 : index
    %c96_129 = arith.constant 96 : index
    %318 = vector.load %arg20[%c0_128, %c96_129] : memref<14x256xf32, #tpu.memory_space<vmem>>, vector<14x32xf32>
    tpu.vector_store %arg20[%c0_128, %c96_129], %317 {strides = array<i32>} : memref<14x256xf32, #tpu.memory_space<vmem>>, vector<14x32xf32>,
    %319 = vector.broadcast %276 : vector<1x32xf32> to vector<14x32xf32>
    %320 = arith.mulf %232, %319 : vector<14x32xf32>
    %321 = vector.broadcast %278 : vector<1x32xf32> to vector<14x32xf32>
    %322 = arith.addf %320, %321 : vector<14x32xf32>
    %cst_130 = arith.constant 0.000000e+00 : f32
    %323 = vector.broadcast %cst_130 : f32 to vector<14x32xf32>
    %324 = arith.maximumf %322, %323 : vector<14x32xf32>
    %cst_131 = arith.constant dense<0.000000e+00> : vector<14x32xf32>
    %325 = tpu.matmul %324, %185, %cst_131 {dimension_numbers = #tpu.dot_dimension_numbers<[1], [0], [0], [1], [0, 0, 1, 1], [], []>} : vector<14x32xf32>, vector<32x32xf32>, vector<14x32xf32> -> vector<14x32xf32>
    %326 = vector.broadcast %186 : vector<1x32xf32> to vector<14x32xf32>
    %327 = arith.addf %325, %326 : vector<14x32xf32>
    %c0_132 = arith.constant 0 : index
    %c128_133 = arith.constant 128 : index
    %328 = vector.load %arg20[%c0_132, %c128_133] : memref<14x256xf32, #tpu.memory_space<vmem>>, vector<14x32xf32>
    tpu.vector_store %arg20[%c0_132, %c128_133], %327 {strides = array<i32>} : memref<14x256xf32, #tpu.memory_space<vmem>>, vector<14x32xf32>,
    %329 = vector.broadcast %276 : vector<1x32xf32> to vector<14x32xf32>
    %330 = arith.mulf %241, %329 : vector<14x32xf32>
    %331 = vector.broadcast %278 : vector<1x32xf32> to vector<14x32xf32>
    %332 = arith.addf %330, %331 : vector<14x32xf32>
    %cst_134 = arith.constant 0.000000e+00 : f32
    %333 = vector.broadcast %cst_134 : f32 to vector<14x32xf32>
    %334 = arith.maximumf %332, %333 : vector<14x32xf32>
    %cst_135 = arith.constant dense<0.000000e+00> : vector<14x32xf32>
    %335 = tpu.matmul %334, %185, %cst_135 {dimension_numbers = #tpu.dot_dimension_numbers<[1], [0], [0], [1], [0, 0, 1, 1], [], []>} : vector<14x32xf32>, vector<32x32xf32>, vector<14x32xf32> -> vector<14x32xf32>
    %336 = vector.broadcast %186 : vector<1x32xf32> to vector<14x32xf32>
    %337 = arith.addf %335, %336 : vector<14x32xf32>
    %c0_136 = arith.constant 0 : index
    %c160_137 = arith.constant 160 : index
    %338 = vector.load %arg20[%c0_136, %c160_137] : memref<14x256xf32, #tpu.memory_space<vmem>>, vector<14x32xf32>
    tpu.vector_store %arg20[%c0_136, %c160_137], %337 {strides = array<i32>} : memref<14x256xf32, #tpu.memory_space<vmem>>, vector<14x32xf32>,
    %339 = vector.broadcast %276 : vector<1x32xf32> to vector<14x32xf32>
    %340 = arith.mulf %250, %339 : vector<14x32xf32>
    %341 = vector.broadcast %278 : vector<1x32xf32> to vector<14x32xf32>
    %342 = arith.addf %340, %341 : vector<14x32xf32>
    %cst_138 = arith.constant 0.000000e+00 : f32
    %343 = vector.broadcast %cst_138 : f32 to vector<14x32xf32>
    %344 = arith.maximumf %342, %343 : vector<14x32xf32>
    %cst_139 = arith.constant dense<0.000000e+00> : vector<14x32xf32>
    %345 = tpu.matmul %344, %185, %cst_139 {dimension_numbers = #tpu.dot_dimension_numbers<[1], [0], [0], [1], [0, 0, 1, 1], [], []>} : vector<14x32xf32>, vector<32x32xf32>, vector<14x32xf32> -> vector<14x32xf32>
    %346 = vector.broadcast %186 : vector<1x32xf32> to vector<14x32xf32>
    %347 = arith.addf %345, %346 : vector<14x32xf32>
    %c0_140 = arith.constant 0 : index
    %c192_141 = arith.constant 192 : index
    %348 = vector.load %arg20[%c0_140, %c192_141] : memref<14x256xf32, #tpu.memory_space<vmem>>, vector<14x32xf32>
    tpu.vector_store %arg20[%c0_140, %c192_141], %347 {strides = array<i32>} : memref<14x256xf32, #tpu.memory_space<vmem>>, vector<14x32xf32>,
    %349 = vector.broadcast %276 : vector<1x32xf32> to vector<14x32xf32>
    %350 = arith.mulf %259, %349 : vector<14x32xf32>
    %351 = vector.broadcast %278 : vector<1x32xf32> to vector<14x32xf32>
    %352 = arith.addf %350, %351 : vector<14x32xf32>
    %cst_142 = arith.constant 0.000000e+00 : f32
    %353 = vector.broadcast %cst_142 : f32 to vector<14x32xf32>
    %354 = arith.maximumf %352, %353 : vector<14x32xf32>
    %cst_143 = arith.constant dense<0.000000e+00> : vector<14x32xf32>
    %355 = tpu.matmul %354, %185, %cst_143 {dimension_numbers = #tpu.dot_dimension_numbers<[1], [0], [0], [1], [0, 0, 1, 1], [], []>} : vector<14x32xf32>, vector<32x32xf32>, vector<14x32xf32> -> vector<14x32xf32>
    %356 = vector.broadcast %186 : vector<1x32xf32> to vector<14x32xf32>
    %357 = arith.addf %355, %356 : vector<14x32xf32>
    %c0_144 = arith.constant 0 : index
    %c224_145 = arith.constant 224 : index
    %358 = vector.load %arg20[%c0_144, %c224_145] : memref<14x256xf32, #tpu.memory_space<vmem>>, vector<14x32xf32>
    tpu.vector_store %arg20[%c0_144, %c224_145], %357 {strides = array<i32>} : memref<14x256xf32, #tpu.memory_space<vmem>>, vector<14x32xf32>,
    %c0_146 = arith.constant 0 : index
    %c0_147 = arith.constant 0 : index
    %359 = vector.load %arg20[%c0_146, %c0_147] : memref<14x256xf32, #tpu.memory_space<vmem>>, vector<14x256xf32>
    %c0_148 = arith.constant 0 : index
    %c0_149 = arith.constant 0 : index
    %360 = vector.load %arg14[%c0_148, %c0_149] : memref<32x32xf32, #tpu.memory_space<vmem>>, vector<32x32xf32>
    %c0_150 = arith.constant 0 : index
    %c0_151 = arith.constant 0 : index
    %361 = vector.load %arg15[%c0_150, %c0_151] : memref<1x32xf32, #tpu.memory_space<vmem>>, vector<1x32xf32>
    %c0_152 = arith.constant 0 : index
    %c0_153 = arith.constant 0 : index
    %362 = vector.load %arg16[%c0_152, %c0_153] : memref<1x32xf32, #tpu.memory_space<vmem>>, vector<1x32xf32>
    %c0_154 = arith.constant 0 : index
    %c0_155 = arith.constant 0 : index
    %363 = vector.load %arg17[%c0_154, %c0_155] : memref<32x16xf32, #tpu.memory_space<vmem>>, vector<32x16xf32>
    %c0_156 = arith.constant 0 : index
    %c0_157 = arith.constant 0 : index
    %364 = vector.load %arg18[%c0_156, %c0_157] : memref<1x16xf32, #tpu.memory_space<vmem>>, vector<1x16xf32>
    %c2 = arith.constant 2 : index
    %365 = memref.load %arg3[%c2] : memref<3xf32, #tpu.memory_space<smem>>
    %cst_158 = arith.constant dense<0.000000e+00> : vector<14x256xf32>
    %366 = tpu.matmul %1, %359, %cst_158 {dimension_numbers = #tpu.dot_dimension_numbers<[1], [0], [0], [1], [0, 0, 1, 1], [], []>} : vector<14x14xf32>, vector<14x256xf32>, vector<14x256xf32> -> vector<14x256xf32>
    %cst_159 = arith.constant 1.000000e+00 : f32
    %367 = arith.addf %cst_159, %365 : f32
    %368 = vector.broadcast %367 : f32 to vector<14x256xf32>
    %369 = arith.mulf %368, %359 : vector<14x256xf32>
    %370 = arith.addf %369, %366 : vector<14x256xf32>
    %cst_160 = arith.constant 0.000000e+00 : f32
    %371 = vector.broadcast %cst_160 : f32 to vector<1x32xf32>
    %cst_161 = arith.constant 0.000000e+00 : f32
    %372 = vector.broadcast %cst_161 : f32 to vector<1x32xf32>
    %373 = vector.extract_strided_slice %370 {offsets = [0, 0], sizes = [14, 32], strides = [1, 1]} : vector<14x256xf32> to vector<14x32xf32>
    %cst_162 = arith.constant dense<0.000000e+00> : vector<14x32xf32>
    %374 = tpu.matmul %373, %360, %cst_162 {dimension_numbers = #tpu.dot_dimension_numbers<[1], [0], [0], [1], [0, 0, 1, 1], [], []>} : vector<14x32xf32>, vector<32x32xf32>, vector<14x32xf32> -> vector<14x32xf32>
    %cst_163 = arith.constant dense<0.000000e+00> : vector<32xf32>
    %375 = vector.multi_reduction <add>, %374, %cst_163 [0] : vector<14x32xf32> to vector<32xf32>
    %376 = vector.shape_cast %375 : vector<32xf32> to vector<1x32xf32>
    %377 = arith.addf %371, %376 : vector<1x32xf32>
    %378 = arith.mulf %374, %374 : vector<14x32xf32>
    %cst_164 = arith.constant dense<0.000000e+00> : vector<32xf32>
    %379 = vector.multi_reduction <add>, %378, %cst_164 [0] : vector<14x32xf32> to vector<32xf32>
    %380 = vector.shape_cast %379 : vector<32xf32> to vector<1x32xf32>
    %381 = arith.addf %372, %380 : vector<1x32xf32>
    %382 = vector.extract_strided_slice %370 {offsets = [0, 32], sizes = [14, 32], strides = [1, 1]} : vector<14x256xf32> to vector<14x32xf32>
    %cst_165 = arith.constant dense<0.000000e+00> : vector<14x32xf32>
    %383 = tpu.matmul %382, %360, %cst_165 {dimension_numbers = #tpu.dot_dimension_numbers<[1], [0], [0], [1], [0, 0, 1, 1], [], []>} : vector<14x32xf32>, vector<32x32xf32>, vector<14x32xf32> -> vector<14x32xf32>
    %cst_166 = arith.constant dense<0.000000e+00> : vector<32xf32>
    %384 = vector.multi_reduction <add>, %383, %cst_166 [0] : vector<14x32xf32> to vector<32xf32>
    %385 = vector.shape_cast %384 : vector<32xf32> to vector<1x32xf32>
    %386 = arith.addf %377, %385 : vector<1x32xf32>
    %387 = arith.mulf %383, %383 : vector<14x32xf32>
    %cst_167 = arith.constant dense<0.000000e+00> : vector<32xf32>
    %388 = vector.multi_reduction <add>, %387, %cst_167 [0] : vector<14x32xf32> to vector<32xf32>
    %389 = vector.shape_cast %388 : vector<32xf32> to vector<1x32xf32>
    %390 = arith.addf %381, %389 : vector<1x32xf32>
    %391 = vector.extract_strided_slice %370 {offsets = [0, 64], sizes = [14, 32], strides = [1, 1]} : vector<14x256xf32> to vector<14x32xf32>
    %cst_168 = arith.constant dense<0.000000e+00> : vector<14x32xf32>
    %392 = tpu.matmul %391, %360, %cst_168 {dimension_numbers = #tpu.dot_dimension_numbers<[1], [0], [0], [1], [0, 0, 1, 1], [], []>} : vector<14x32xf32>, vector<32x32xf32>, vector<14x32xf32> -> vector<14x32xf32>
    %cst_169 = arith.constant dense<0.000000e+00> : vector<32xf32>
    %393 = vector.multi_reduction <add>, %392, %cst_169 [0] : vector<14x32xf32> to vector<32xf32>
    %394 = vector.shape_cast %393 : vector<32xf32> to vector<1x32xf32>
    %395 = arith.addf %386, %394 : vector<1x32xf32>
    %396 = arith.mulf %392, %392 : vector<14x32xf32>
    %cst_170 = arith.constant dense<0.000000e+00> : vector<32xf32>
    %397 = vector.multi_reduction <add>, %396, %cst_170 [0] : vector<14x32xf32> to vector<32xf32>
    %398 = vector.shape_cast %397 : vector<32xf32> to vector<1x32xf32>
    %399 = arith.addf %390, %398 : vector<1x32xf32>
    %400 = vector.extract_strided_slice %370 {offsets = [0, 96], sizes = [14, 32], strides = [1, 1]} : vector<14x256xf32> to vector<14x32xf32>
    %cst_171 = arith.constant dense<0.000000e+00> : vector<14x32xf32>
    %401 = tpu.matmul %400, %360, %cst_171 {dimension_numbers = #tpu.dot_dimension_numbers<[1], [0], [0], [1], [0, 0, 1, 1], [], []>} : vector<14x32xf32>, vector<32x32xf32>, vector<14x32xf32> -> vector<14x32xf32>
    %cst_172 = arith.constant dense<0.000000e+00> : vector<32xf32>
    %402 = vector.multi_reduction <add>, %401, %cst_172 [0] : vector<14x32xf32> to vector<32xf32>
    %403 = vector.shape_cast %402 : vector<32xf32> to vector<1x32xf32>
    %404 = arith.addf %395, %403 : vector<1x32xf32>
    %405 = arith.mulf %401, %401 : vector<14x32xf32>
    %cst_173 = arith.constant dense<0.000000e+00> : vector<32xf32>
    %406 = vector.multi_reduction <add>, %405, %cst_173 [0] : vector<14x32xf32> to vector<32xf32>
    %407 = vector.shape_cast %406 : vector<32xf32> to vector<1x32xf32>
    %408 = arith.addf %399, %407 : vector<1x32xf32>
    %409 = vector.extract_strided_slice %370 {offsets = [0, 128], sizes = [14, 32], strides = [1, 1]} : vector<14x256xf32> to vector<14x32xf32>
    %cst_174 = arith.constant dense<0.000000e+00> : vector<14x32xf32>
    %410 = tpu.matmul %409, %360, %cst_174 {dimension_numbers = #tpu.dot_dimension_numbers<[1], [0], [0], [1], [0, 0, 1, 1], [], []>} : vector<14x32xf32>, vector<32x32xf32>, vector<14x32xf32> -> vector<14x32xf32>
    %cst_175 = arith.constant dense<0.000000e+00> : vector<32xf32>
    %411 = vector.multi_reduction <add>, %410, %cst_175 [0] : vector<14x32xf32> to vector<32xf32>
    %412 = vector.shape_cast %411 : vector<32xf32> to vector<1x32xf32>
    %413 = arith.addf %404, %412 : vector<1x32xf32>
    %414 = arith.mulf %410, %410 : vector<14x32xf32>
    %cst_176 = arith.constant dense<0.000000e+00> : vector<32xf32>
    %415 = vector.multi_reduction <add>, %414, %cst_176 [0] : vector<14x32xf32> to vector<32xf32>
    %416 = vector.shape_cast %415 : vector<32xf32> to vector<1x32xf32>
    %417 = arith.addf %408, %416 : vector<1x32xf32>
    %418 = vector.extract_strided_slice %370 {offsets = [0, 160], sizes = [14, 32], strides = [1, 1]} : vector<14x256xf32> to vector<14x32xf32>
    %cst_177 = arith.constant dense<0.000000e+00> : vector<14x32xf32>
    %419 = tpu.matmul %418, %360, %cst_177 {dimension_numbers = #tpu.dot_dimension_numbers<[1], [0], [0], [1], [0, 0, 1, 1], [], []>} : vector<14x32xf32>, vector<32x32xf32>, vector<14x32xf32> -> vector<14x32xf32>
    %cst_178 = arith.constant dense<0.000000e+00> : vector<32xf32>
    %420 = vector.multi_reduction <add>, %419, %cst_178 [0] : vector<14x32xf32> to vector<32xf32>
    %421 = vector.shape_cast %420 : vector<32xf32> to vector<1x32xf32>
    %422 = arith.addf %413, %421 : vector<1x32xf32>
    %423 = arith.mulf %419, %419 : vector<14x32xf32>
    %cst_179 = arith.constant dense<0.000000e+00> : vector<32xf32>
    %424 = vector.multi_reduction <add>, %423, %cst_179 [0] : vector<14x32xf32> to vector<32xf32>
    %425 = vector.shape_cast %424 : vector<32xf32> to vector<1x32xf32>
    %426 = arith.addf %417, %425 : vector<1x32xf32>
    %427 = vector.extract_strided_slice %370 {offsets = [0, 192], sizes = [14, 32], strides = [1, 1]} : vector<14x256xf32> to vector<14x32xf32>
    %cst_180 = arith.constant dense<0.000000e+00> : vector<14x32xf32>
    %428 = tpu.matmul %427, %360, %cst_180 {dimension_numbers = #tpu.dot_dimension_numbers<[1], [0], [0], [1], [0, 0, 1, 1], [], []>} : vector<14x32xf32>, vector<32x32xf32>, vector<14x32xf32> -> vector<14x32xf32>
    %cst_181 = arith.constant dense<0.000000e+00> : vector<32xf32>
    %429 = vector.multi_reduction <add>, %428, %cst_181 [0] : vector<14x32xf32> to vector<32xf32>
    %430 = vector.shape_cast %429 : vector<32xf32> to vector<1x32xf32>
    %431 = arith.addf %422, %430 : vector<1x32xf32>
    %432 = arith.mulf %428, %428 : vector<14x32xf32>
    %cst_182 = arith.constant dense<0.000000e+00> : vector<32xf32>
    %433 = vector.multi_reduction <add>, %432, %cst_182 [0] : vector<14x32xf32> to vector<32xf32>
    %434 = vector.shape_cast %433 : vector<32xf32> to vector<1x32xf32>
    %435 = arith.addf %426, %434 : vector<1x32xf32>
    %436 = vector.extract_strided_slice %370 {offsets = [0, 224], sizes = [14, 32], strides = [1, 1]} : vector<14x256xf32> to vector<14x32xf32>
    %cst_183 = arith.constant dense<0.000000e+00> : vector<14x32xf32>
    %437 = tpu.matmul %436, %360, %cst_183 {dimension_numbers = #tpu.dot_dimension_numbers<[1], [0], [0], [1], [0, 0, 1, 1], [], []>} : vector<14x32xf32>, vector<32x32xf32>, vector<14x32xf32> -> vector<14x32xf32>
    %cst_184 = arith.constant dense<0.000000e+00> : vector<32xf32>
    %438 = vector.multi_reduction <add>, %437, %cst_184 [0] : vector<14x32xf32> to vector<32xf32>
    %439 = vector.shape_cast %438 : vector<32xf32> to vector<1x32xf32>
    %440 = arith.addf %431, %439 : vector<1x32xf32>
    %441 = arith.mulf %437, %437 : vector<14x32xf32>
    %cst_185 = arith.constant dense<0.000000e+00> : vector<32xf32>
    %442 = vector.multi_reduction <add>, %441, %cst_185 [0] : vector<14x32xf32> to vector<32xf32>
    %443 = vector.shape_cast %442 : vector<32xf32> to vector<1x32xf32>
    %444 = arith.addf %435, %443 : vector<1x32xf32>
    %cst_186 = arith.constant 0.00892857183 : f32
    %445 = vector.broadcast %cst_186 : f32 to vector<1x32xf32>
    %446 = arith.mulf %440, %445 : vector<1x32xf32>
    %cst_187 = arith.constant 0.00892857183 : f32
    %447 = vector.broadcast %cst_187 : f32 to vector<1x32xf32>
    %448 = arith.mulf %444, %447 : vector<1x32xf32>
    %449 = arith.mulf %446, %446 : vector<1x32xf32>
    %450 = arith.subf %448, %449 : vector<1x32xf32>
    %cst_188 = arith.constant 9.99999974E-6 : f32
    %451 = vector.broadcast %cst_188 : f32 to vector<1x32xf32>
    %452 = arith.addf %450, %451 : vector<1x32xf32>
    %453 = math.rsqrt %452 : vector<1x32xf32>
    %454 = arith.mulf %361, %453 : vector<1x32xf32>
    %455 = arith.mulf %446, %454 : vector<1x32xf32>
    %456 = arith.subf %362, %455 : vector<1x32xf32>
    %cst_189 = arith.constant 0.000000e+00 : f32
    %457 = vector.broadcast %cst_189 : f32 to vector<14x32xf32>
    %458 = vector.extract_strided_slice %2 {offsets = [0, 0], sizes = [14, 1], strides = [1, 1]} : vector<14x8xf32> to vector<14x1xf32>
    %459 = vector.broadcast %454 : vector<1x32xf32> to vector<14x32xf32>
    %460 = arith.mulf %374, %459 : vector<14x32xf32>
    %461 = vector.broadcast %456 : vector<1x32xf32> to vector<14x32xf32>
    %462 = arith.addf %460, %461 : vector<14x32xf32>
    %cst_190 = arith.constant 0.000000e+00 : f32
    %463 = vector.broadcast %cst_190 : f32 to vector<14x32xf32>
    %464 = arith.maximumf %462, %463 : vector<14x32xf32>
    %465 = vector.broadcast %458 : vector<14x1xf32> to vector<14x32xf32>
    %466 = arith.mulf %465, %464 : vector<14x32xf32>
    %467 = arith.addf %457, %466 : vector<14x32xf32>
    %468 = vector.extract_strided_slice %2 {offsets = [0, 1], sizes = [14, 1], strides = [1, 1]} : vector<14x8xf32> to vector<14x1xf32>
    %469 = vector.broadcast %454 : vector<1x32xf32> to vector<14x32xf32>
    %470 = arith.mulf %383, %469 : vector<14x32xf32>
    %471 = vector.broadcast %456 : vector<1x32xf32> to vector<14x32xf32>
    %472 = arith.addf %470, %471 : vector<14x32xf32>
    %cst_191 = arith.constant 0.000000e+00 : f32
    %473 = vector.broadcast %cst_191 : f32 to vector<14x32xf32>
    %474 = arith.maximumf %472, %473 : vector<14x32xf32>
    %475 = vector.broadcast %468 : vector<14x1xf32> to vector<14x32xf32>
    %476 = arith.mulf %475, %474 : vector<14x32xf32>
    %477 = arith.addf %467, %476 : vector<14x32xf32>
    %478 = vector.extract_strided_slice %2 {offsets = [0, 2], sizes = [14, 1], strides = [1, 1]} : vector<14x8xf32> to vector<14x1xf32>
    %479 = vector.broadcast %454 : vector<1x32xf32> to vector<14x32xf32>
    %480 = arith.mulf %392, %479 : vector<14x32xf32>
    %481 = vector.broadcast %456 : vector<1x32xf32> to vector<14x32xf32>
    %482 = arith.addf %480, %481 : vector<14x32xf32>
    %cst_192 = arith.constant 0.000000e+00 : f32
    %483 = vector.broadcast %cst_192 : f32 to vector<14x32xf32>
    %484 = arith.maximumf %482, %483 : vector<14x32xf32>
    %485 = vector.broadcast %478 : vector<14x1xf32> to vector<14x32xf32>
    %486 = arith.mulf %485, %484 : vector<14x32xf32>
    %487 = arith.addf %477, %486 : vector<14x32xf32>
    %488 = vector.extract_strided_slice %2 {offsets = [0, 3], sizes = [14, 1], strides = [1, 1]} : vector<14x8xf32> to vector<14x1xf32>
    %489 = vector.broadcast %454 : vector<1x32xf32> to vector<14x32xf32>
    %490 = arith.mulf %401, %489 : vector<14x32xf32>
    %491 = vector.broadcast %456 : vector<1x32xf32> to vector<14x32xf32>
    %492 = arith.addf %490, %491 : vector<14x32xf32>
    %cst_193 = arith.constant 0.000000e+00 : f32
    %493 = vector.broadcast %cst_193 : f32 to vector<14x32xf32>
    %494 = arith.maximumf %492, %493 : vector<14x32xf32>
    %495 = vector.broadcast %488 : vector<14x1xf32> to vector<14x32xf32>
    %496 = arith.mulf %495, %494 : vector<14x32xf32>
    %497 = arith.addf %487, %496 : vector<14x32xf32>
    %498 = vector.extract_strided_slice %2 {offsets = [0, 4], sizes = [14, 1], strides = [1, 1]} : vector<14x8xf32> to vector<14x1xf32>
    %499 = vector.broadcast %454 : vector<1x32xf32> to vector<14x32xf32>
    %500 = arith.mulf %410, %499 : vector<14x32xf32>
    %501 = vector.broadcast %456 : vector<1x32xf32> to vector<14x32xf32>
    %502 = arith.addf %500, %501 : vector<14x32xf32>
    %cst_194 = arith.constant 0.000000e+00 : f32
    %503 = vector.broadcast %cst_194 : f32 to vector<14x32xf32>
    %504 = arith.maximumf %502, %503 : vector<14x32xf32>
    %505 = vector.broadcast %498 : vector<14x1xf32> to vector<14x32xf32>
    %506 = arith.mulf %505, %504 : vector<14x32xf32>
    %507 = arith.addf %497, %506 : vector<14x32xf32>
    %508 = vector.extract_strided_slice %2 {offsets = [0, 5], sizes = [14, 1], strides = [1, 1]} : vector<14x8xf32> to vector<14x1xf32>
    %509 = vector.broadcast %454 : vector<1x32xf32> to vector<14x32xf32>
    %510 = arith.mulf %419, %509 : vector<14x32xf32>
    %511 = vector.broadcast %456 : vector<1x32xf32> to vector<14x32xf32>
    %512 = arith.addf %510, %511 : vector<14x32xf32>
    %cst_195 = arith.constant 0.000000e+00 : f32
    %513 = vector.broadcast %cst_195 : f32 to vector<14x32xf32>
    %514 = arith.maximumf %512, %513 : vector<14x32xf32>
    %515 = vector.broadcast %508 : vector<14x1xf32> to vector<14x32xf32>
    %516 = arith.mulf %515, %514 : vector<14x32xf32>
    %517 = arith.addf %507, %516 : vector<14x32xf32>
    %518 = vector.extract_strided_slice %2 {offsets = [0, 6], sizes = [14, 1], strides = [1, 1]} : vector<14x8xf32> to vector<14x1xf32>
    %519 = vector.broadcast %454 : vector<1x32xf32> to vector<14x32xf32>
    %520 = arith.mulf %428, %519 : vector<14x32xf32>
    %521 = vector.broadcast %456 : vector<1x32xf32> to vector<14x32xf32>
    %522 = arith.addf %520, %521 : vector<14x32xf32>
    %cst_196 = arith.constant 0.000000e+00 : f32
    %523 = vector.broadcast %cst_196 : f32 to vector<14x32xf32>
    %524 = arith.maximumf %522, %523 : vector<14x32xf32>
    %525 = vector.broadcast %518 : vector<14x1xf32> to vector<14x32xf32>
    %526 = arith.mulf %525, %524 : vector<14x32xf32>
    %527 = arith.addf %517, %526 : vector<14x32xf32>
    %528 = vector.extract_strided_slice %2 {offsets = [0, 7], sizes = [14, 1], strides = [1, 1]} : vector<14x8xf32> to vector<14x1xf32>
    %529 = vector.broadcast %454 : vector<1x32xf32> to vector<14x32xf32>
    %530 = arith.mulf %437, %529 : vector<14x32xf32>
    %531 = vector.broadcast %456 : vector<1x32xf32> to vector<14x32xf32>
    %532 = arith.addf %530, %531 : vector<14x32xf32>
    %cst_197 = arith.constant 0.000000e+00 : f32
    %533 = vector.broadcast %cst_197 : f32 to vector<14x32xf32>
    %534 = arith.maximumf %532, %533 : vector<14x32xf32>
    %535 = vector.broadcast %528 : vector<14x1xf32> to vector<14x32xf32>
    %536 = arith.mulf %535, %534 : vector<14x32xf32>
    %537 = arith.addf %527, %536 : vector<14x32xf32>
    %cst_198 = arith.constant dense<0.000000e+00> : vector<14xf32>
    %538 = vector.multi_reduction <add>, %2, %cst_198 [1] : vector<14x8xf32> to vector<14xf32>
    %539 = vector.shape_cast %538 : vector<14xf32> to vector<14x1xf32>
    %cst_199 = arith.constant dense<0.000000e+00> : vector<14x16xf32>
    %540 = tpu.matmul %537, %363, %cst_199 {dimension_numbers = #tpu.dot_dimension_numbers<[1], [0], [0], [1], [0, 0, 1, 1], [], []>} : vector<14x32xf32>, vector<32x16xf32>, vector<14x16xf32> -> vector<14x16xf32>
    %541 = vector.broadcast %539 : vector<14x1xf32> to vector<14x16xf32>
    %542 = vector.broadcast %364 : vector<1x16xf32> to vector<14x16xf32>
    %543 = arith.mulf %541, %542 : vector<14x16xf32>
    %544 = arith.addf %540, %543 : vector<14x16xf32>
    %c0_200 = arith.constant 0 : index
    %c0_201 = arith.constant 0 : index
    %545 = vector.load %arg19[%c0_200, %c0_201] : memref<14x16xf32, #tpu.memory_space<vmem>>, vector<14x16xf32>
    tpu.vector_store %arg19[%c0_200, %c0_201], %544 {strides = array<i32>} : memref<14x16xf32, #tpu.memory_space<vmem>>, vector<14x16xf32>,
    return
  }
}

</mosaic_0001>

<bundles_post_ra>
// kernel: tpu_custom_call.1
= control target key start
LH: loop header
LB: loop body
LE: loop exit
PB: predicated region body
PF: predicated region fallthrough
CT: control target
= control target key end

     0   :  { %s3993_s0 = inlined_call_operand.hbm [shape: bf16[14,14], index: 0, kind: input, shape index: {}]   ;;  %s3994_s1 = inlined_call_operand.hbm [shape: f32[14,32], index: 1, kind: input, shape index: {}]   ;;  %s3995_s2 = inlined_call_operand.vmem [shape: f32[14,8], index: 2, kind: input, shape index: {}]   ;;  %s3996_s3 = inlined_call_operand.hbm [shape: f32[3], index: 3, kind: input, shape index: {}]   ;;  %s3997_s4 = inlined_call_operand.hbm [shape: f32[4,32], index: 4, kind: input, shape index: {}]   ;;  %s3998_s5 = inlined_call_operand.hbm [shape: f32[1,32], index: 5, kind: input, shape index: {}]   ;;  %s3999_s6 = inlined_call_operand.hbm [shape: f32[1,32], index: 6, kind: input, shape index: {}]   ;;  %s4000_s7 = inlined_call_operand.vmem [shape: f32[32,32], index: 7, kind: input, shape index: {}]   ;;  %s4001_s8 = inlined_call_operand.hbm [shape: f32[1,32], index: 8, kind: input, shape index: {}]   ;;  %s4002_s9 = inlined_call_operand.vmem [shape: f32[32,32], index: 9, kind: input, shape index: {}]   ;;  %s4003_s10 = inlined_call_operand.vmem [shape: f32[1,32], index: 10, kind: input, shape index: {}]   ;;  %s4004_s11 = inlined_call_operand.vmem [shape: f32[1,32], index: 11, kind: input, shape index: {}]   ;;  %s4005_s12 = inlined_call_operand.hbm [shape: f32[32,32], index: 12, kind: input, shape index: {}]   ;;  %s4006_s13 = inlined_call_operand.vmem [shape: f32[1,32], index: 13, kind: input, shape index: {}]   ;;  %s4007_s14 = inlined_call_operand.hbm [shape: f32[32,32], index: 14, kind: input, shape index: {}]   ;;  %s4008_s15 = inlined_call_operand.vmem [shape: f32[1,32], index: 15, kind: input, shape index: {}]   ;;  %s4009_s16 = inlined_call_operand.vmem [shape: f32[1,32], index: 16, kind: input, shape index: {}]   ;;  %s4010_s17 = inlined_call_operand.vmem [shape: f32[32,16], index: 17, kind: input, shape index: {}]   ;;  %s4011_s18 = inlined_call_operand.vmem [shape: f32[1,16], index: 18, kind: input, shape index: {}]   ;;  %s4012_s19 = inlined_call_operand.hbm [shape: f32[14,16], index: 19, kind: output, shape index: {}]  }
   0x1   :  { %4018 = sst [smem:[#allocation28_spill]] %s3993_s0 }
   0x2   :  { %4019 = sst [smem:[#allocation29_spill]] %s3994_s1 }
   0x3   :  { %4020 = sst [smem:[#allocation30_spill]] %s3995_s2 }
   0x4   :  { %4021 = sst [smem:[#allocation31_spill]] %s3996_s3 }
   0x5   :  { %24 = vsyncpa [#allocation4], 0 }
   0x6   :  { %25 = vsyncpa [#allocation8], 0 }
   0x7   :  { %26 = vsyncpa [#allocation6], 0 }
   0x8   :  { %27 = vsyncpa [#allocation12], 0 }
   0x9   :  { %28 = vsyncpa [#allocation15], 0 }
   0xa   :  { %29 = vsyncpa [#allocation18], 0  ;;  %s4022_s20 = sld [smem:[#allocation29_spill]] }
  0x10   :  { %s48_s21 = sshll.u32 %s4022_s20, 4  ;;  %s49_s21 = int_to_ptr.hbm [resolvable:$true] %s48_s21 }
  0x11   :  { %30 = vsyncpa [#allocation5], 0  ;;  %s3071_s1 = smov [#allocation7]   ;;  %s84_s24 = sshll.u32 %s3998_s5, 4  ;;  %s85_s24 = int_to_ptr.hbm [resolvable:$true] %s84_s24 }
  0x12   :  { %s50_s22 = sshll.u32 %s3071_s1, 4  ;;  %s4014_s25 = smov 128   ;;  %s51_s22 = int_to_ptr.vmem [resolvable:$true] %s50_s22 }
  0x13   :  { %s4016_s3 = smov 8   ;;  %s3074_s26 = smov [#allocation11]  }
  0x14   :  { %56 = dma.hbm_to_vmem [thread:$0]  %s49_s21, 256, %s51_s22, [#allocation8], %s4014_s25, %s4014_s25, %s4016_s3  }
  0x15   :  { %s86_s27 = sshll.u32 %s3074_s26, 4  ;;  %s108_s0 = sshll.u32 %s4001_s8, 4  ;;  %s87_s27 = int_to_ptr.vmem [resolvable:$true] %s86_s27  ;;  %s109_s0 = int_to_ptr.hbm [resolvable:$true] %s108_s0 }
  0x16   :  { %89 = dma.hbm_to_vmem [thread:$0]  %s85_s24, 16, %s87_s27, [#allocation12]  }
  0x17   :  { %s4023_s1 = sld [smem:[#allocation28_spill]]  ;;  %s3075_s2 = smov [#allocation14]  }
  0x18   :  { %s110_s23 = sshll.u32 %s3075_s2, 4  ;;  %s3076_s21 = smov [#allocation3]   ;;  %s111_s23 = int_to_ptr.vmem [resolvable:$true] %s110_s23 }
  0x19   :  { %113 = dma.hbm_to_vmem [thread:$0]  %s109_s0, 16, %s111_s23, [#allocation15]  }
  0x1a   :  { %s37_s22 = sshll.u32 %s3076_s21, 4  ;;  %s3077_s26 = smov 64   ;;  %s38_s22 = int_to_ptr.vmem [resolvable:$true] %s37_s22 }
  0x1b   :  { %s3078_s25 = smov 4   ;;  %s4024_s24 = sld [smem:[#allocation31_spill]] }
  0x1c   :  { %s73_s20 = sshll.u32 %s3997_s4, 4  ;;  %s3080_s0 = smov [#allocation10]   ;;  %s74_s20 = int_to_ptr.hbm [resolvable:$true] %s73_s20 }
  0x1d   :  { %s35_s5 = sshll.u32 %s4023_s1, 4  ;;  %s3079_s1 = smov [#allocation9]   ;;  %s36_s5 = int_to_ptr.hbm [resolvable:$true] %s35_s5 }
  0x1e   :  { %43 = dma.hbm_to_vmem [thread:$0]  %s36_s5, 128, %s38_s22, [#allocation4], %s3077_s26, %s3077_s26, %s3078_s25  }
  0x1f   :  { %s75_s2 = sshll.u32 %s3080_s0, 4  ;;  %s95_s3 = sshll.u32 %s3999_s6, 4  ;;  %s76_s2 = int_to_ptr.vmem [resolvable:$true] %s75_s2  ;;  %s96_s3 = int_to_ptr.hbm [resolvable:$true] %s95_s3 }
  0x20   :  { %78 = dma.hbm_to_vmem [thread:$0]  %s74_s20, 64, %s76_s2, [#allocation8]  }
  0x21   :  { %s64_s27 = sshll.u32 %s4024_s24, 4  ;;  %s124_s22 = sshll.u32 %s4005_s12, 4  ;;  %s65_s27 = int_to_ptr.hbm [resolvable:$true] %s64_s27  ;;  %s125_s22 = int_to_ptr.hbm [resolvable:$true] %s124_s22 }
  0x22   :  { %67 = dma.hbm_to_smem %s65_s27, 16, %s3079_s1, [#allocation6]  }
  0x23   :  { %s3081_s8 = smov [#allocation13]   ;;  %s3082_s4 = smov [#allocation16]  }
  0x24   :  { %s97_s28 = sshll.u32 %s3081_s8, 4  ;;  %s126_s24 = sshll.u32 %s3082_s4, 4  ;;  %s98_s28 = int_to_ptr.vmem [resolvable:$true] %s97_s28  ;;  %s127_s24 = int_to_ptr.vmem [resolvable:$true] %s126_s24 }
  0x25   :  { %100 = dma.hbm_to_vmem [thread:$0]  %s96_s3, 16, %s98_s28, [#allocation12]  }
  0x26   :  { %s139_s30 = sshll.u32 %s4007_s14, 4  ;;  %s4025_s6 = smov 8   ;;  %s140_s30 = int_to_ptr.hbm [resolvable:$true] %s139_s30 }
  0x27   :  { %s4026_s1 = smov 128   ;;  %s3083_s20 = smov [#allocation17]  }
  0x28   :  { %132 = dma.hbm_to_vmem [thread:$0]  %s125_s22, 512, %s127_s24, [#allocation15], %s4026_s1, %s4026_s1, %s4025_s6  }
  0x29   :  { %s141_s0 = sshll.u32 %s3083_s20, 4  ;;  %s142_s0 = int_to_ptr.vmem [resolvable:$true] %s141_s0 }
  0x2a   :  { %147 = dma.hbm_to_vmem [thread:$0]  %s140_s30, 512, %s142_s0, [#allocation18], %s4026_s1, %s4026_s1, %s4025_s6  }
  0x2b   :  { %3055 = dma.done.wait [#allocation4], 128  }
  0x2c   :  { %3056 = vsyncadd [#allocation4], 4294967168 }
  0x2d   :  { %3057 = dma.done.wait [#allocation8], 256  }
  0x2e   :  { %3058 = vsyncadd [#allocation8], 4294967040 }
  0x2f   :  { %3059 = dma.done.wait [#allocation6], 16  }
  0x30   :  { %3060 = vsyncadd [#allocation6], 4294967280 }
  0x31   :  { %3061 = dma.done.wait [#allocation8], 64  }
  0x32   :  { %3062 = vsyncadd [#allocation8], 4294967232 }
  0x33   :  { %3063 = dma.done.wait [#allocation12], 32  }
  0x34   :  { %3064 = vsyncadd [#allocation12], 4294967264 }
  0x35   :  { %3065 = dma.done.wait [#allocation15], 528  }
  0x36   :  { %3066 = vsyncadd [#allocation15], 4294966768 }
  0x37   :  { %3067 = dma.done.wait [#allocation18], 512  }
  0x38   :  { %3068 = vsyncadd [#allocation18], 4294966784 }
  0x39   :  { %192 = sfence }
  0x3a   :  { %v200_v0 = vld [vmem:[#allocation7 + $0x8] sm:$0x3f]  ;;  %vm217_vm0 = vcmask 1045504   ;;  %v199_v1 = vld [vmem:[#allocation7] sm:$0xff]  ;;  %v193_v2 = vld [vmem:[#allocation3] sm:$0xf] }
  0x3b   :  { %2663 = vmatpush.msk.msra.mxu0 %vm217_vm0, %v200_v0  ;;  %vm210_vm1 = vcmask 113664   ;;  %v3241_v3 = vunpack.c.l.bf16 %v193_v2  ;;  %v194_v4 = vld [vmem:[#allocation3 + $0x4] sm:$0x7]  ;;  %v201_v6 = vld [vmem:[#allocation10] sm:$0xf]  ;;  %vm257_vm2 = vcmask 1043456  }
  0x3c   :  { %v3245_v5 = vunpack.c.l.bf16 %v194_v4  ;;  %2666 = vmatpush.msk.msra.mxu1 %vm257_vm2, %v201_v6  ;;  %2770 = vmatpush.msk.msra.mxu3 %vm257_vm2, %v201_v6  ;;  %s209_s12 = sld [smem:[#allocation9]]  ;;  %vm250_vm3 = vcmask 31744   ;;  %s3084_s3 = smov 112   ;;  %vm286_vm4 = vcmask 259072   ;;  %vm284_vm5 = vcmask 261120  }
  0x3d   :  { %236 = vmatpush.msra.mxu0 %v199_v1  ;;  %2771 = vmatpush.msk.msra.mxu2 %vm257_vm2, %v201_v6  ;;  %s3085_s2 = smov 116   ;;  %s3086_s23 = smov 120   ;;  %vm788_vm9 = vcmask 521472   ;;  %vm786_vm10 = vcmask 523520   ;;  %vm835_vm11 = vcmask 783872   ;;  %vm882_vm12 = vcmask 1046272  }
  0x3e   :  { %2664 = vmatmul.msk.f32.vlgmr.msra.gmra.mxu0 %vm210_vm1, %v3241_v3  ;;  %2672 = vmatpush.msk.msrb.mxu3 %vm257_vm2, %v201_v6  ;;  %s3087_s21 = smov 124   ;;  %s3088_s25 = smov 108   ;;  %vm833_vm13 = vcmask 785920   ;;  %vm880_vm14 = vcmask 1048320  }
  0x3f   :  { %2669 = vmatpush.msk.msrb.mxu0 %vm257_vm2, %v201_v6  ;;  %2675 = vmatpush.msk.msrb.mxu1 %vm257_vm2, %v201_v6  ;;  %s3089_s5 = smov 100   ;;  %s3090_s22 = smov 104  }
  0x40   :  { %2678 = vmatpush.msk.msrb.mxu2 %vm257_vm2, %v201_v6  ;;  %s3092_s0 = smov 96   ;;  %s4027_s30 = sld [smem:[#allocation30_spill]] }
  0x41   :  { %2684 = vmatpush.msk.msra.mxu0 %vm257_vm2, %v201_v6  ;;  %s3101_s8 = smov [#allocation19]  }
  0x42   :  { %s244_s14 = sadd.f32 1.0, %s209_s12  ;;  %s2643_s28 = sshll.u32 %s3101_s8, 4  ;;  %s2644_s28 = int_to_ptr.vmem [resolvable:$true] %s2643_s28 }
  0x44   :  { %v245_v7 = vstv %s244_s14 }
  0x45   :  { %v246_v8 = vmul.f32 %v245_v7, %v199_v1  ;;  %v247_v11 = vmul.f32 %v245_v7, %v200_v0 }
  0x46   :  { %2665 = vmatmul.msk.f32.gmra.mxu0 %vm210_vm1, %v3245_v5 }
  0xbb   :  { %v238_v9 = vpop.f32.mrf.mxu0 }
  0xbc   :  { %v248_v10 = vadd.f32 %v246_v8, %v238_v9 }
  0xbe   :  { %467 = vrot.lane.b32.xlu2 %v248_v10, %s3084_s3  ;;  %414 = vrot.lane.b32.xlu1 %v248_v10, %s3085_s2 }
  0xbf   :  { %361 = vrot.lane.b32.xlu0 %v248_v10, %s3086_s23  ;;  %2667 = vmatmul.msk.f32.vlgmr.msra.gmra.mxu1 %vm250_vm3, %v248_v10 }
  0xc0   :  { %2687 = vmatpush.msk.msra.mxu1 %vm257_vm2, %v201_v6 }
  0xc3   :  { %v241_v12 = vpop.f32.mrf.mxu0 }
  0xc4   :  { %v249_v13 = vadd.f32 %v247_v11, %v241_v12 }
  0xc6   :  { %308 = vrot.lane.b32.xlu2 %v248_v10, %s3087_s21  ;;  %363 = vrot.lane.b32.xlu1 %v249_v13, %s3086_s23 }
  0xc7   :  { %310 = vrot.lane.b32.xlu0 %v249_v13, %s3087_s21  ;;  %2668 = vmatmul.msk.f32.vlgmr.msra.gmra.mxu3 %vm250_vm3, %v249_v13 }
  0xc8   :  { %2681 = vmatpush.msk.msra.mxu3 %vm257_vm2, %v201_v6 }
  0xce   :  { %469 = vrot.lane.b32.xlu2 %v249_v13, %s3084_s3  ;;  %416 = vrot.lane.b32.xlu1 %v249_v13, %s3085_s2 }
  0xcf   :  { %520 = vrot.lane.b32.xlu0 %v248_v10, %s3088_s25 }
  0xd6   :  { %626 = vrot.lane.b32.xlu2 %v248_v10, %s3089_s5  ;;  %573 = vrot.lane.b32.xlu1 %v248_v10, %s3090_s22 }
  0xd7   :  { %522 = vrot.lane.b32.xlu0 %v249_v13, %s3088_s25 }
  0xde   :  { %628 = vrot.lane.b32.xlu1 %v249_v13, %s3089_s5 }
  0xdf   :  { %575 = vrot.lane.b32.xlu0 %v249_v13, %s3090_s22 }
 0x118   :  { %v468_v14 = vpop.permute.xlu2 %467 }
 0x120   :  { %v309_v15 = vpop.permute.xlu2 %308 }
 0x121   :  { %2670 = vmatmul.msk.f32.vlgmr.msrb.gmra.mxu0 %vm250_vm3, %v309_v15 }
 0x128   :  { %v470_v20 = vpop.permute.xlu2 %469 }
 0x130   :  { %v415_v16 = vpop.permute.xlu1 %414  ;;  %v627_v23 = vpop.permute.xlu2 %626 }
 0x131   :  { %v362_v17 = vpop.permute.xlu0 %361  ;;  %2676 = vmatmul.msk.f32.vlgmr.msrb.gmra.mxu1 %vm250_vm3, %v415_v16 }
 0x132   :  { %2673 = vmatmul.msk.f32.vlgmr.msrb.gmra.mxu3 %vm250_vm3, %v362_v17 }
 0x138   :  { %v364_v18 = vpop.permute.xlu1 %363 }
 0x139   :  { %v311_v19 = vpop.permute.xlu0 %310 }
 0x13a   :  { %2671 = vmatmul.msk.f32.vlgmr.msra.gmra.mxu2 %vm250_vm3, %v311_v19  ;;  %2674 = vmatmul.msk.f32.gmra.mxu3 %vm250_vm3, %v364_v18 }
 0x13c   :  { %v3277_v29 = vpop.f32.mrf.mxu1 }
 0x13d   :  { %v296_v31 = vmul.f32 %v3277_v29, %v3277_v29  ;;  %v285_v34 = vsel %vm284_vm5, %v3277_v29, 0.0 }
 0x13f   :  { %v298_v35 = vsel %vm284_vm5, %v296_v31, 0.0 }
 0x140   :  { %v417_v21 = vpop.permute.xlu1 %416 }
 0x141   :  { %v521_v22 = vpop.permute.xlu0 %520  ;;  %2677 = vmatmul.msk.f32.gmra.mxu1 %vm250_vm3, %v417_v21 }
 0x142   :  { %2679 = vmatmul.msk.f32.vlgmr.msrb.gmra.mxu2 %vm250_vm3, %v468_v14  ;;  %2682 = vmatmul.msk.f32.vlgmr.msra.gmra.mxu3 %vm250_vm3, %v521_v22 }
 0x148   :  { %v574_v24 = vpop.permute.xlu1 %573 }
 0x149   :  { %v523_v25 = vpop.permute.xlu0 %522  ;;  %2685 = vmatmul.msk.f32.vlgmr.msra.gmra.mxu0 %vm250_vm3, %v574_v24  ;;  %2688 = vmatmul.msk.f32.vlgmr.msra.gmra.mxu1 %vm250_vm3, %v627_v23 }
 0x14a   :  { %2680 = vmatmul.msk.f32.gmra.mxu2 %vm250_vm3, %v470_v20  ;;  %2683 = vmatmul.msk.f32.gmra.mxu3 %vm250_vm3, %v523_v25  ;;  %v3275_v28 = vpop.f32.mrf.mxu3 }
 0x14b   :  { %v297_v30 = vmul.f32 %v3275_v28, %v3275_v28  ;;  %v287_v32 = vsel %vm286_vm4, %v3275_v28, 0.0 }
 0x14c   :  { %v288_v36 = vadd.f32 %v287_v32, %v285_v34 }
 0x14d   :  { %v299_v33 = vsel %vm286_vm4, %v297_v30, 0.0 }
 0x14e   :  { %v300_v37 = vadd.f32 %v299_v33, %v298_v35  ;;  %v289_v38 = vrot.slane %v288_v36, 4 }
 0x150   :  { %v629_v26 = vpop.permute.xlu1 %628  ;;  %v301_v39 = vrot.slane %v300_v37, 4  ;;  %v290_v40 = vadd.f32 %v289_v38, %v288_v36 }
 0x151   :  { %v576_v27 = vpop.permute.xlu0 %575  ;;  %2689 = vmatmul.msk.f32.gmra.mxu1 %vm250_vm3, %v629_v26 }
 0x152   :  { %2686 = vmatmul.msk.f32.gmra.mxu0 %vm250_vm3, %v576_v27  ;;  %v302_v41 = vadd.f32 %v301_v39, %v300_v37  ;;  %v291_v42 = vrot.slane %v290_v40, 2 }
 0x154   :  { %v303_v43 = vrot.slane %v302_v41, 2  ;;  %v292_v47 = vadd.f32 %v291_v42, %v290_v40 }
 0x156   :  { %v304_v48 = vadd.f32 %v303_v43, %v302_v41  ;;  %v293_v50 = vrot.slane %v292_v47, 1 }
 0x158   :  { %v305_v51 = vrot.slane %v304_v48, 1  ;;  %v294_v22 = vadd.f32 %v293_v50, %v292_v47 }
 0x15a   :  { %v306_v23 = vadd.f32 %v305_v51, %v304_v48 }
 0x19e   :  { %v3291_v45 = vpop.f32.mrf.mxu0 }
 0x19f   :  { %v349_v49 = vmul.f32 %v3291_v45, %v3291_v45  ;;  %v339_v52 = vsel %vm284_vm5, %v3291_v45, 0.0 }
 0x1a1   :  { %v351_v54 = vsel %vm284_vm5, %v349_v49, 0.0 }
 0x1ae   :  { %v3293_v46 = vpop.f32.mrf.mxu1 }
 0x1af   :  { %v445_v55 = vsel %vm284_vm5, %v3293_v46, 0.0  ;;  %v455_v56 = vmul.f32 %v3293_v46, %v3293_v46 }
 0x1b1   :  { %v457_v15 = vsel %vm284_vm5, %v455_v56, 0.0 }
 0x1b5   :  { %v3289_v44 = vpop.f32.mrf.mxu3 }
 0x1b6   :  { %v402_v53 = vmul.f32 %v3289_v44, %v3289_v44  ;;  %v392_v57 = vsel %vm284_vm5, %v3289_v44, 0.0 }
 0x1b8   :  { %v404_v7 = vsel %vm284_vm5, %v402_v53, 0.0 }
 0x1bd   :  { %v3308_v58 = vpop.f32.mrf.mxu2  ;;  %v3310_v59 = vpop.f32.mrf.mxu3 }
 0x1be   :  { %v340_v60 = vsel %vm286_vm4, %v3308_v58, 0.0  ;;  %v350_v61 = vmul.f32 %v3308_v58, %v3308_v58  ;;  %v393_v62 = vsel %vm286_vm4, %v3310_v59, 0.0  ;;  %v403_v63 = vmul.f32 %v3310_v59, %v3310_v59  ;;  %v3320_v0 = vpop.f32.mrf.mxu1 }
 0x1bf   :  { %v341_v1 = vadd.f32 %v340_v60, %v339_v52  ;;  %v394_v2 = vadd.f32 %v393_v62, %v392_v57  ;;  %v446_v4 = vsel %vm286_vm4, %v3320_v0, 0.0  ;;  %v456_v6 = vmul.f32 %v3320_v0, %v3320_v0 }
 0x1c0   :  { %v352_v8 = vsel %vm286_vm4, %v350_v61, 0.0  ;;  %v405_v9 = vsel %vm286_vm4, %v403_v63, 0.0  ;;  %v447_v10 = vadd.f32 %v446_v4, %v445_v55 }
 0x1c1   :  { %v342_v11 = vrot.slane %v341_v1, 4  ;;  %v353_v12 = vadd.f32 %v352_v8, %v351_v54  ;;  %v395_v13 = vrot.slane %v394_v2, 4  ;;  %v406_v14 = vadd.f32 %v405_v9, %v404_v7 }
 0x1c2   :  { %v448_v16 = vrot.slane %v447_v10, 4  ;;  %v458_v17 = vsel %vm286_vm4, %v456_v6, 0.0 }
 0x1c3   :  { %v343_v18 = vadd.f32 %v342_v11, %v341_v1  ;;  %v354_v19 = vrot.slane %v353_v12, 4  ;;  %v396_v20 = vadd.f32 %v395_v13, %v394_v2  ;;  %v407_v21 = vrot.slane %v406_v14, 4 }
 0x1c4   :  { %v449_v24 = vadd.f32 %v448_v16, %v447_v10  ;;  %v459_v25 = vadd.f32 %v458_v17, %v457_v15 }
 0x1c5   :  { %v344_v26 = vrot.slane %v343_v18, 2  ;;  %v355_v27 = vadd.f32 %v354_v19, %v353_v12  ;;  %v397_v30 = vrot.slane %v396_v20, 2  ;;  %v408_v31 = vadd.f32 %v407_v21, %v406_v14  ;;  %v3331_v32 = vpop.f32.mrf.mxu2  ;;  %v3333_v33 = vpop.f32.mrf.mxu3 }
 0x1c6   :  { %v450_v34 = vrot.slane %v449_v24, 2  ;;  %v460_v35 = vrot.slane %v459_v25, 4  ;;  %v498_v36 = vsel %vm284_vm5, %v3331_v32, 0.0  ;;  %v508_v37 = vmul.f32 %v3331_v32, %v3331_v32  ;;  %v3339_v38 = vpop.f32.mrf.mxu0  ;;  %v3341_v43 = vpop.f32.mrf.mxu1 }
 0x1c7   :  { %v345_v39 = vadd.f32 %v344_v26, %v343_v18  ;;  %v356_v40 = vrot.slane %v355_v27, 2  ;;  %v398_v41 = vadd.f32 %v397_v30, %v396_v20  ;;  %v409_v42 = vrot.slane %v408_v31, 2 }
 0x1c8   :  { %v451_v47 = vadd.f32 %v450_v34, %v449_v24  ;;  %v461_v48 = vadd.f32 %v460_v35, %v459_v25  ;;  %v510_v49 = vsel %vm284_vm5, %v508_v37, 0.0  ;;  %v551_v50 = vsel %vm284_vm5, %v3333_v33, 0.0 }
 0x1c9   :  { %v346_v51 = vrot.slane %v345_v39, 1  ;;  %v357_v52 = vadd.f32 %v356_v40, %v355_v27  ;;  %v399_v53 = vrot.slane %v398_v41, 1  ;;  %v410_v54 = vadd.f32 %v409_v42, %v408_v31 }
 0x1ca   :  { %v452_v55 = vrot.slane %v451_v47, 1  ;;  %v462_v56 = vrot.slane %v461_v48, 2  ;;  %v561_v57 = vmul.f32 %v3333_v33, %v3333_v33  ;;  %v604_v60 = vsel %vm284_vm5, %v3339_v38, 0.0 }
 0x1cb   :  { %v347_v61 = vadd.f32 %v346_v51, %v345_v39  ;;  %v358_v62 = vrot.slane %v357_v52, 1  ;;  %v400_v63 = vadd.f32 %v399_v53, %v398_v41  ;;  %v411_v1 = vrot.slane %v410_v54, 1 }
 0x1cc   :  { %v453_v2 = vadd.f32 %v452_v55, %v451_v47  ;;  %v463_v4 = vadd.f32 %v462_v56, %v461_v48  ;;  %v563_v6 = vsel %vm284_vm5, %v561_v57, 0.0  ;;  %v614_v7 = vmul.f32 %v3339_v38, %v3339_v38 }
 0x1cd   :  { %v348_v8 = vadd.f32 %v347_v61, %v294_v22  ;;  %v359_v9 = vadd.f32 %v358_v62, %v357_v52  ;;  %v412_v10 = vadd.f32 %v411_v1, %v410_v54  ;;  %v657_v11 = vsel %vm284_vm5, %v3341_v43, 0.0  ;;  %v3355_v12 = vpop.f32.mrf.mxu2  ;;  %v3357_v13 = vpop.f32.mrf.mxu3 }
 0x1ce   :  { %v464_v14 = vrot.slane %v463_v4, 1  ;;  %v616_v15 = vsel %vm284_vm5, %v614_v7, 0.0  ;;  %v667_v16 = vmul.f32 %v3341_v43, %v3341_v43  ;;  %v499_v17 = vsel %vm286_vm4, %v3355_v12, 0.0  ;;  %v3374_v35 = vpop.f32.mrf.mxu1 }
 0x1cf   :  { %v360_v18 = vadd.f32 %v359_v9, %v306_v23  ;;  %v401_v19 = vadd.f32 %v400_v63, %v348_v8  ;;  %v500_v20 = vadd.f32 %v499_v17, %v498_v36  ;;  %v509_v21 = vmul.f32 %v3355_v12, %v3355_v12  ;;  %v3366_v22 = vpop.f32.mrf.mxu0 }
 0x1d0   :  { %v465_v24 = vadd.f32 %v464_v14, %v463_v4  ;;  %v669_v25 = vsel %vm284_vm5, %v667_v16, 0.0  ;;  %v552_v26 = vsel %vm286_vm4, %v3357_v13, 0.0  ;;  %v562_v27 = vmul.f32 %v3357_v13, %v3357_v13 }
 0x1d1   :  { %v413_v30 = vadd.f32 %v412_v10, %v360_v18  ;;  %v454_v31 = vadd.f32 %v453_v2, %v401_v19  ;;  %v501_v34 = vrot.slane %v500_v20, 4  ;;  %v511_v23 = vsel %vm286_vm4, %v509_v21, 0.0 }
 0x1d2   :  { %v512_v36 = vadd.f32 %v511_v23, %v510_v49  ;;  %v553_v37 = vadd.f32 %v552_v26, %v551_v50  ;;  %v564_v39 = vsel %vm286_vm4, %v562_v27, 0.0  ;;  %v605_v40 = vsel %vm286_vm4, %v3366_v22, 0.0 }
 0x1d3   :  { %v466_v41 = vadd.f32 %v465_v24, %v413_v30  ;;  %v502_v42 = vadd.f32 %v501_v34, %v500_v20  ;;  %v565_v47 = vadd.f32 %v564_v39, %v563_v6  ;;  %v606_v48 = vadd.f32 %v605_v40, %v604_v60 }
 0x1d4   :  { %v513_v51 = vrot.slane %v512_v36, 4  ;;  %v554_v52 = vrot.slane %v553_v37, 4  ;;  %v615_v53 = vmul.f32 %v3366_v22, %v3366_v22  ;;  %v658_v54 = vsel %vm286_vm4, %v3374_v35, 0.0 }
 0x1d5   :  { %v503_v55 = vrot.slane %v502_v42, 2  ;;  %v566_v49 = vrot.slane %v565_v47, 4  ;;  %v607_v50 = vrot.slane %v606_v48, 4  ;;  %v659_v56 = vadd.f32 %v658_v54, %v657_v11 }
 0x1d6   :  { %v514_v57 = vadd.f32 %v513_v51, %v512_v36  ;;  %v555_v61 = vadd.f32 %v554_v52, %v553_v37  ;;  %v617_v62 = vsel %vm286_vm4, %v615_v53, 0.0  ;;  %v668_v63 = vmul.f32 %v3374_v35, %v3374_v35 }
 0x1d7   :  { %v504_v60 = vadd.f32 %v503_v55, %v502_v42  ;;  %v567_v1 = vadd.f32 %v566_v49, %v565_v47  ;;  %v608_v2 = vadd.f32 %v607_v50, %v606_v48  ;;  %v618_v4 = vadd.f32 %v617_v62, %v616_v15 }
 0x1d8   :  { %v515_v6 = vrot.slane %v514_v57, 2  ;;  %v556_v7 = vrot.slane %v555_v61, 2  ;;  %v660_v8 = vrot.slane %v659_v56, 4  ;;  %v670_v9 = vsel %vm286_vm4, %v668_v63, 0.0 }
 0x1d9   :  { %v505_v10 = vrot.slane %v504_v60, 1  ;;  %v568_v14 = vrot.slane %v567_v1, 2  ;;  %v609_v16 = vrot.slane %v608_v2, 2  ;;  %v619_v11 = vrot.slane %v618_v4, 4 }
 0x1da   :  { %v516_v17 = vadd.f32 %v515_v6, %v514_v57  ;;  %v557_v18 = vadd.f32 %v556_v7, %v555_v61  ;;  %v661_v19 = vadd.f32 %v660_v8, %v659_v56  ;;  %v671_v20 = vadd.f32 %v670_v9, %v669_v25  ;;  %v206_v9 = vld [vmem:[%s4000_s7 + $0x10] sm:$0xff] }
 0x1db   :  { %v506_v21 = vadd.f32 %v505_v10, %v504_v60  ;;  %v569_v24 = vadd.f32 %v568_v14, %v567_v1  ;;  %v610_v26 = vadd.f32 %v609_v16, %v608_v2  ;;  %v620_v27 = vadd.f32 %v619_v11, %v618_v4  ;;  %v205_v14 = vld [vmem:[%s4000_s7 + $0x8] sm:$0xff]  ;;  %v204_v11 = vld [vmem:[%s4000_s7] sm:$0xff] }
 0x1dc   :  { %v517_v30 = vrot.slane %v516_v17, 1  ;;  %v558_v34 = vrot.slane %v557_v18, 1  ;;  %v662_v15 = vrot.slane %v661_v19, 2  ;;  %v672_v23 = vrot.slane %v671_v20, 4 }
 0x1dd   :  { %v507_v36 = vadd.f32 %v506_v21, %v454_v31  ;;  %v570_v37 = vrot.slane %v569_v24, 1  ;;  %v611_v39 = vrot.slane %v610_v26, 1  ;;  %v621_v40 = vrot.slane %v620_v27, 2 }
 0x1de   :  { %v518_v42 = vadd.f32 %v517_v30, %v516_v17  ;;  %v559_v47 = vadd.f32 %v558_v34, %v557_v18  ;;  %v663_v48 = vadd.f32 %v662_v15, %v661_v19  ;;  %v673_v51 = vadd.f32 %v672_v23, %v671_v20  ;;  %v203_v15 = vld [vmem:[#allocation13] sm:$0x1] }
 0x1df   :  { %v571_v52 = vadd.f32 %v570_v37, %v569_v24  ;;  %v612_v53 = vadd.f32 %v611_v39, %v610_v26  ;;  %v622_v54 = vadd.f32 %v621_v40, %v620_v27  ;;  %v202_v26 = vld [vmem:[#allocation11] sm:$0x1] }
 0x1e0   :  { %v519_v25 = vadd.f32 %v518_v42, %v466_v41  ;;  %v560_v55 = vadd.f32 %v559_v47, %v507_v36  ;;  %v664_v49 = vrot.slane %v663_v48, 1  ;;  %v674_v50 = vrot.slane %v673_v51, 2  ;;  %v207_v41 = vld [vmem:[%s4000_s7 + $0x18] sm:$0xff]  ;;  %s3091_s7 = smov 32  }
 0x1e1   :  { %v623_v56 = vrot.slane %v622_v54, 1  ;;  %814 = vmatpush.msrb.mxu0 %v207_v41  ;;  %730 = vmatpush.msra.mxu2 %v207_v41 }
 0x1e2   :  { %v572_v57 = vadd.f32 %v571_v52, %v519_v25  ;;  %v613_v61 = vadd.f32 %v612_v53, %v560_v55  ;;  %v665_v62 = vadd.f32 %v664_v49, %v663_v48  ;;  %v675_v63 = vadd.f32 %v674_v50, %v673_v51  ;;  %767 = vmatpush.msrb.mxu3 %v207_v41 }
 0x1e3   :  { %v624_v31 = vadd.f32 %v623_v56, %v622_v54  ;;  %861 = vmatpush.msrb.mxu1 %v207_v41  ;;  %731 = vmatpush.msra.mxu2 %v206_v9 }
 0x1e4   :  { %v666_v60 = vadd.f32 %v665_v62, %v613_v61  ;;  %v676_v1 = vrot.slane %v675_v63, 1  ;;  %815 = vmatpush.msrb.mxu0 %v206_v9  ;;  %768 = vmatpush.msrb.mxu3 %v206_v9 }
 0x1e5   :  { %v625_v2 = vadd.f32 %v624_v31, %v572_v57  ;;  %862 = vmatpush.msrb.mxu1 %v206_v9  ;;  %732 = vmatpush.msra.mxu2 %v205_v14 }
 0x1e6   :  { %v677_v4 = vadd.f32 %v676_v1, %v675_v63  ;;  %v679_v6 = vmul.f32 0.008928572, %v666_v60  ;;  %816 = vmatpush.msrb.mxu0 %v205_v14  ;;  %769 = vmatpush.msrb.mxu3 %v205_v14 }
 0x1e7   :  { %863 = vmatpush.msrb.mxu1 %v205_v14  ;;  %733 = vmatpush.msra.mxu2 %v204_v11 }
 0x1e8   :  { %v678_v7 = vadd.f32 %v677_v4, %v625_v2  ;;  %v681_v8 = vmul.f32 %v679_v6, %v679_v6  ;;  %817 = vmatpush.msrb.mxu0 %v204_v11  ;;  %770 = vmatpush.msrb.mxu3 %v204_v11 }
 0x1e9   :  { %864 = vmatpush.msrb.mxu1 %v204_v11  ;;  %908 = vmatpush.msrb.mxu2 %v207_v41 }
 0x1ea   :  { %v680_v10 = vmul.f32 0.008928572, %v678_v7  ;;  %990 = vmatpush.msra.mxu0 %v207_v41  ;;  %945 = vmatpush.msra.mxu3 %v207_v41 }
 0x1eb   :  { %1035 = vmatpush.msra.mxu1 %v207_v41  ;;  %909 = vmatpush.msrb.mxu2 %v206_v9 }
 0x1ec   :  { %v682_v16 = vsub.f32 %v680_v10, %v681_v8  ;;  %991 = vmatpush.msra.mxu0 %v206_v9  ;;  %946 = vmatpush.msra.mxu3 %v206_v9 }
 0x1ed   :  { %1036 = vmatpush.msra.mxu1 %v206_v9  ;;  %910 = vmatpush.msrb.mxu2 %v205_v14 }
 0x1ee   :  { %v683_v17 = vadd.f32 1e-05, %v682_v16  ;;  %992 = vmatpush.msra.mxu0 %v205_v14  ;;  %947 = vmatpush.msra.mxu3 %v205_v14 }
 0x1ef   :  { %1037 = vmatpush.msra.mxu1 %v205_v14  ;;  %911 = vmatpush.msrb.mxu2 %v204_v11 }
 0x1f0   :  { %2821 = vrsqrt.f32 %v683_v17  ;;  %993 = vmatpush.msra.mxu0 %v204_v11  ;;  %948 = vmatpush.msra.mxu3 %v204_v11  ;;  %vm690_vm7 = vweird.f32 %v683_v17 }
 0x1f1   :  { %1038 = vmatpush.msra.mxu1 %v204_v11 }
 0x1f6   :  { %v2822_v18 = vpop.eup %2821 }
 0x1f7   :  { %v685_v19 = vmul.f32 %v2822_v18, %v683_v17  ;;  %vm691_vm6 = vweird.f32 %v2822_v18 }
 0x1f8   :  { %vm692_vm8 = vmor %vm690_vm7, %vm691_vm6  ;;  %vm2593_vm6 = vcmask 64512   ;;  %vm2597_vm7 = vcmask 62464  }
 0x1f9   :  { %v686_v20 = vmul.f32 %v2822_v18, %v685_v19 }
 0x1fb   :  { %v687_v21 = vmul.f32 0.5, %v686_v20 }
 0x1fd   :  { %v688_v24 = vsub.f32 1.5, %v687_v21 }
 0x1ff   :  { %v689_v27 = vmul.f32 %v2822_v18, %v688_v24 }
 0x201   :  { %v693_v30 = vsel %vm692_vm8, %v2822_v18, %v689_v27  ;;  %vm2635_vm8 = vcmask 130048  }
 0x202   :  { %v694_v34 = vmul.f32 %v693_v30, %v202_v26 }
 0x204   :  { %v695_v23 = vmul.f32 %v694_v34, %v679_v6  ;;  %v698_v36 = vperm.slane %v694_v34, 0 }
 0x206   :  { %v696_v37 = vsub.f32 %v203_v15, %v695_v23  ;;  %v700_v39 = vmul.f32 %v698_v36, %v3277_v29  ;;  %v743_v42 = vmul.f32 %v698_v36, %v3291_v45  ;;  %v790_v47 = vmul.f32 %v698_v36, %v3289_v44 }
 0x207   :  { %v837_v48 = vmul.f32 %v698_v36, %v3293_v46  ;;  %v701_v29 = vmul.f32 %v698_v36, %v3275_v28  ;;  %v744_v45 = vmul.f32 %v698_v36, %v3308_v58  ;;  %v791_v44 = vmul.f32 %v698_v36, %v3310_v59 }
 0x208   :  { %v703_v40 = vperm.slane %v696_v37, 0  ;;  %v838_v46 = vmul.f32 %v698_v36, %v3320_v0  ;;  %v884_v28 = vmul.f32 %v698_v36, %v3331_v32  ;;  %v921_v58 = vmul.f32 %v698_v36, %v3333_v33 }
 0x209   :  { %v966_v59 = vmul.f32 %v698_v36, %v3339_v38  ;;  %v1011_v0 = vmul.f32 %v698_v36, %v3341_v43  ;;  %v885_v32 = vmul.f32 %v698_v36, %v3355_v12  ;;  %v922_v33 = vmul.f32 %v698_v36, %v3357_v13  ;;  %v2818_v13 = vld [vmem:[#allocation14] ss:$0 sm:$0xff] }
 0x20a   :  { %v705_v51 = vadd.f32 %v703_v40, %v700_v39  ;;  %v745_v52 = vadd.f32 %v743_v42, %v703_v40  ;;  %v792_v53 = vadd.f32 %v790_v47, %v703_v40  ;;  %v839_v54 = vadd.f32 %v837_v48, %v703_v40 }
 0x20b   :  { %v706_v56 = vadd.f32 %v703_v40, %v701_v29  ;;  %v746_v57 = vadd.f32 %v744_v45, %v703_v40  ;;  %v793_v61 = vadd.f32 %v791_v44, %v703_v40  ;;  %v840_v62 = vadd.f32 %v838_v46, %v703_v40 }
 0x20c   :  { %v707_v25 = vmax.f32 %v705_v51, 0.0  ;;  %v747_v55 = vmax.f32 %v745_v52, 0.0  ;;  %v794_v49 = vmax.f32 %v792_v53, 0.0  ;;  %v841_v50 = vmax.f32 %v839_v54, 0.0 }
 0x20d   :  { %v708_v63 = vmax.f32 %v706_v56, 0.0  ;;  %v748_v31 = vmax.f32 %v746_v57, 0.0  ;;  %v795_v60 = vmax.f32 %v793_v61, 0.0  ;;  %v842_v1 = vmax.f32 %v840_v62, 0.0 }
 0x20e   :  { %2690 = vmatmul.msk.f32.vlgmr.msra.gmra.mxu2 %vm284_vm5, %v707_v25  ;;  %2692 = vmatmul.msk.f32.vlgmr.msrb.gmra.mxu3 %vm284_vm5, %v747_v55  ;;  %v886_v2 = vadd.f32 %v884_v28, %v703_v40  ;;  %v923_v4 = vadd.f32 %v921_v58, %v703_v40  ;;  %v968_v6 = vadd.f32 %v966_v59, %v703_v40 }
 0x20f   :  { %2694 = vmatmul.msk.f32.vlgmr.msrb.gmra.mxu0 %vm284_vm5, %v794_v49  ;;  %2696 = vmatmul.msk.f32.vlgmr.msrb.gmra.mxu1 %vm284_vm5, %v841_v50  ;;  %v1013_v7 = vadd.f32 %v1011_v0, %v703_v40  ;;  %v1012_v38 = vmul.f32 %v698_v36, %v3374_v35  ;;  %v967_v43 = vmul.f32 %v698_v36, %v3366_v22  ;;  %v1063_v0 = vld [vmem:[%s4002_s9 + $0x18] sm:$0xff] }
 0x210   :  { %v888_v8 = vmax.f32 %v886_v2, 0.0  ;;  %v925_v41 = vmax.f32 %v923_v4, 0.0  ;;  %v970_v9 = vmax.f32 %v968_v6, 0.0  ;;  %v887_v14 = vadd.f32 %v885_v32, %v703_v40  ;;  %v1062_v2 = vld [vmem:[%s4002_s9 + $0x10] sm:$0xff]  ;;  %1152 = vmatpush.msrb.mxu0 %v1063_v0  ;;  %1205 = vmatpush.msrb.mxu1 %v1063_v0 }
 0x211   :  { %v1015_v10 = vmax.f32 %v1013_v7, 0.0  ;;  %v924_v16 = vadd.f32 %v922_v33, %v703_v40  ;;  %v969_v11 = vadd.f32 %v967_v43, %v703_v40  ;;  %v1014_v17 = vadd.f32 %v1012_v38, %v703_v40  ;;  %v1061_v33 = vld [vmem:[%s4002_s9 + $0x8] sm:$0xff]  ;;  %v1060_v38 = vld [vmem:[%s4002_s9] sm:$0xff]  ;;  %s2706_s9 = sld [smem:[#allocation9 + $0x1]] }
 0x212   :  { %v889_v18 = vmax.f32 %v887_v14, 0.0  ;;  %1153 = vmatpush.msrb.mxu0 %v1062_v2  ;;  %1206 = vmatpush.msrb.mxu1 %v1062_v2 }
 0x213   :  { %v926_v19 = vmax.f32 %v924_v16, 0.0  ;;  %v971_v20 = vmax.f32 %v969_v11, 0.0  ;;  %v1016_v21 = vmax.f32 %v1014_v17, 0.0 }
 0x214   :  { %1154 = vmatpush.msrb.mxu0 %v1061_v33  ;;  %1207 = vmatpush.msrb.mxu1 %v1061_v33 }
 0x216   :  { %2691 = vmatmul.msk.f32.gmra.mxu2 %vm284_vm5, %v708_v63  ;;  %2693 = vmatmul.msk.f32.gmra.mxu3 %vm284_vm5, %v748_v31 }
 0x217   :  { %2695 = vmatmul.msk.f32.gmra.mxu0 %vm284_vm5, %v795_v60  ;;  %2697 = vmatmul.msk.f32.gmra.mxu1 %vm284_vm5, %v842_v1  ;;  %s1124_s22 = sadd.f32 1.0, %s2706_s9 }
 0x218   :  { %1155 = vmatpush.msrb.mxu0 %v1060_v38  ;;  %1208 = vmatpush.msrb.mxu1 %v1060_v38 }
 0x219   :  { %v1125_v43 = vstv %s1124_s22 }
 0x21e   :  { %2698 = vmatmul.msk.f32.vlgmr.msrb.gmra.mxu2 %vm284_vm5, %v888_v8  ;;  %2700 = vmatmul.msk.f32.vlgmr.msra.gmra.mxu3 %vm284_vm5, %v925_v41 }
 0x21f   :  { %2702 = vmatmul.msk.f32.vlgmr.msra.gmra.mxu0 %vm284_vm5, %v970_v9  ;;  %2704 = vmatmul.msk.f32.vlgmr.msra.gmra.mxu1 %vm284_vm5, %v1015_v10 }
 0x220   :  { %1362 = vmatpush.msra.mxu0 %v1063_v0  ;;  %1415 = vmatpush.msra.mxu1 %v1063_v0 }
 0x222   :  { %1363 = vmatpush.msra.mxu0 %v1062_v2  ;;  %1416 = vmatpush.msra.mxu1 %v1062_v2 }
 0x224   :  { %1364 = vmatpush.msra.mxu0 %v1061_v33  ;;  %1417 = vmatpush.msra.mxu1 %v1061_v33 }
 0x226   :  { %2699 = vmatmul.msk.f32.gmra.mxu2 %vm284_vm5, %v889_v18  ;;  %2701 = vmatmul.msk.f32.gmra.mxu3 %vm284_vm5, %v926_v19 }
 0x227   :  { %2703 = vmatmul.msk.f32.gmra.mxu0 %vm284_vm5, %v971_v20  ;;  %2705 = vmatmul.msk.f32.gmra.mxu1 %vm284_vm5, %v1016_v21 }
 0x228   :  { %1365 = vmatpush.msra.mxu0 %v1060_v38  ;;  %1418 = vmatpush.msra.mxu1 %v1060_v38 }
 0x28c   :  { %v819_v12 = vpop.f32.mrf.mxu0  ;;  %v866_v35 = vpop.f32.mrf.mxu1 }
 0x28d   :  { %v867_v36 = vadd.f32 %v2818_v13, %v866_v35  ;;  %v820_v47 = vadd.f32 %v2818_v13, %v819_v12 }
 0x291   :  { %v735_v22 = vpop.f32.mrf.mxu2  ;;  %v772_v24 = vpop.f32.mrf.mxu3 }
 0x292   :  { %v736_v26 = vadd.f32 %v2818_v13, %v735_v22  ;;  %v773_v27 = vadd.f32 %v2818_v13, %v772_v24 }
 0x294   :  { %741 = vst.msk [vmem:[#allocation2] sm:$0xff] %vm284_vm5, %v736_v26  ;;  %v822_v30 = vpop.f32.mrf.mxu0  ;;  %780 = vrot.lane.b32.xlu1 %v773_v27, %s3091_s7  ;;  %v869_v40 = vpop.f32.mrf.mxu1 }
 0x295   :  { %v823_v34 = vadd.f32 %v2818_v13, %v822_v30  ;;  %v870_v52 = vadd.f32 %v2818_v13, %v869_v40 }
 0x297   :  { %829 = vrot.lane.b32.xlu0 %v823_v34, %s3077_s26 }
 0x299   :  { %v738_v15 = vpop.f32.mrf.mxu2  ;;  %v775_v23 = vpop.f32.mrf.mxu3 }
 0x29a   :  { %v739_v37 = vadd.f32 %v2818_v13, %v738_v15  ;;  %v776_v39 = vadd.f32 %v2818_v13, %v775_v23 }
 0x29c   :  { %742 = vst.msk [vmem:[#allocation2 + $0x10] sm:$0x3f] %vm286_vm4, %v739_v37  ;;  %v995_v42 = vpop.f32.mrf.mxu0  ;;  %782 = vrot.lane.b32.xlu2 %v776_v39, %s3091_s7  ;;  %874 = vrot.lane.b32.xlu1 %v867_v36, %s3092_s0  ;;  %v1040_v55 = vpop.f32.mrf.mxu1 }
 0x29d   :  { %v1041_v45 = vadd.f32 %v2818_v13, %v1040_v55  ;;  %v996_v56 = vadd.f32 %v2818_v13, %v995_v42 }
 0x29f   :  { %827 = vrot.lane.b32.xlu0 %v820_v47, %s3077_s26 }
 0x2a1   :  { %v913_v48 = vpop.f32.mrf.mxu2  ;;  %v950_v51 = vpop.f32.mrf.mxu3 }
 0x2a2   :  { %v914_v53 = vadd.f32 %v2818_v13, %v913_v48  ;;  %v951_v54 = vadd.f32 %v2818_v13, %v950_v51 }
 0x2a4   :  { %919 = vst.msk [vmem:[#allocation2 + $0x8] sm:$0xff] %vm284_vm5, %v914_v53  ;;  %v998_v25 = vpop.f32.mrf.mxu0  ;;  %876 = vrot.lane.b32.xlu2 %v870_v52, %s3092_s0  ;;  %958 = vrot.lane.b32.xlu1 %v951_v54, %s3091_s7  ;;  %v1043_v57 = vpop.f32.mrf.mxu1 }
 0x2a5   :  { %v999_v49 = vadd.f32 %v2818_v13, %v998_v25  ;;  %v1044_v61 = vadd.f32 %v2818_v13, %v1043_v57 }
 0x2a7   :  { %1005 = vrot.lane.b32.xlu0 %v999_v49, %s3077_s26 }
 0x2a9   :  { %v916_v50 = vpop.f32.mrf.mxu2  ;;  %v953_v29 = vpop.f32.mrf.mxu3 }
 0x2aa   :  { %v917_v44 = vadd.f32 %v2818_v13, %v916_v50  ;;  %v954_v46 = vadd.f32 %v2818_v13, %v953_v29 }
 0x2ac   :  { %920 = vst.msk [vmem:[#allocation2 + $0x18] sm:$0x3f] %vm286_vm4, %v917_v44  ;;  %960 = vrot.lane.b32.xlu2 %v954_v46, %s3091_s7  ;;  %1048 = vrot.lane.b32.xlu1 %v1041_v45, %s3092_s0 }
 0x2af   :  { %1003 = vrot.lane.b32.xlu0 %v996_v56, %s3077_s26 }
 0x2b4   :  { %1050 = vrot.lane.b32.xlu2 %v1044_v61, %s3092_s0 }
 0x2f6   :  { %v783_v62 = vpop.permute.xlu2 %782 }
 0x2f7   :  { %789 = vst.msk [vmem:[#allocation2 + $0x10] sm:$0x3f] %vm788_vm9, %v783_v62 }
 0x2fe   :  { %v877_v63 = vpop.permute.xlu2 %876 }
 0x306   :  { %v961_v31 = vpop.permute.xlu2 %960  ;;  %v781_v60 = vpop.permute.xlu1 %780 }
 0x307   :  { %965 = vst.msk [vmem:[#allocation2 + $0x18] sm:$0x3f] %vm788_vm9, %v961_v31 }
 0x308   :  { %787 = vst.msk [vmem:[#allocation2] sm:$0xff] %vm786_vm10, %v781_v60 }
 0x309   :  { %v830_v1 = vpop.permute.xlu0 %829 }
 0x30a   :  { %836 = vst.msk [vmem:[#allocation2 + $0x10] sm:$0x3f] %vm835_vm11, %v830_v1 }
 0x30b   :  { %883 = vst.msk [vmem:[#allocation2 + $0x10] sm:$0x3f] %vm882_vm12, %v877_v63 }
 0x30e   :  { %v875_v28 = vpop.permute.xlu1 %874  ;;  %v1051_v7 = vpop.permute.xlu2 %1050 }
 0x311   :  { %v828_v58 = vpop.permute.xlu0 %827 }
 0x312   :  { %834 = vst.msk [vmem:[#allocation2] sm:$0xff] %vm833_vm13, %v828_v58  ;;  %v3453_v59 = vld [vmem:[#allocation2 + $0x10] sm:$0x3f] }
 0x313   :  { %881 = vst.msk [vmem:[#allocation2] sm:$0xff] %vm880_vm14, %v875_v28  ;;  %2707 = vmatpush.msk.msra.mxu2 %vm217_vm0, %v3453_v59  ;;  %v1128_v17 = vmul.f32 %v1125_v43, %v3453_v59 }
 0x316   :  { %v959_v4 = vpop.permute.xlu1 %958 }
 0x317   :  { %964 = vst.msk [vmem:[#allocation2 + $0x8] sm:$0xff] %vm786_vm10, %v959_v4 }
 0x319   :  { %v1006_v6 = vpop.permute.xlu0 %1005 }
 0x31a   :  { %1010 = vst.msk [vmem:[#allocation2 + $0x18] sm:$0x3f] %vm835_vm11, %v1006_v6  ;;  %v1056_v8 = vld [vmem:[#allocation2] sm:$0xff] }
 0x31b   :  { %1055 = vst.msk [vmem:[#allocation2 + $0x18] sm:$0x3f] %vm882_vm12, %v1051_v7  ;;  %1093 = vmatpush.msra.mxu2 %v1056_v8  ;;  %v1126_v14 = vmul.f32 %v1125_v43, %v1056_v8 }
 0x31c   :  { %2708 = vmatmul.msk.f32.vlgmr.msra.gmra.mxu2 %vm210_vm1, %v3241_v3 }
 0x31d   :  { %1258 = vmatpush.msrb.mxu2 %v1063_v0 }
 0x31e   :  { %v1049_v9 = vpop.permute.xlu1 %1048 }
 0x31f   :  { %1259 = vmatpush.msrb.mxu2 %v1062_v2 }
 0x321   :  { %v1004_v41 = vpop.permute.xlu0 %1003  ;;  %1260 = vmatpush.msrb.mxu2 %v1061_v33 }
 0x322   :  { %1009 = vst.msk [vmem:[#allocation2 + $0x8] sm:$0xff] %vm833_vm13, %v1004_v41  ;;  %v1059_v10 = vld [vmem:[#allocation2 + $0x18] sm:$0x3f] }
 0x323   :  { %1054 = vst.msk [vmem:[#allocation2 + $0x8] sm:$0xff] %vm880_vm14, %v1049_v9  ;;  %2710 = vmatpush.msk.msrb.mxu3 %vm217_vm0, %v1059_v10  ;;  %1261 = vmatpush.msrb.mxu2 %v1060_v38  ;;  %v1129_v13 = vmul.f32 %v1125_v43, %v1059_v10 }
 0x324   :  { %2709 = vmatmul.msk.f32.gmra.mxu2 %vm210_vm1, %v3245_v5 }
 0x325   :  { %1468 = vmatpush.msra.mxu2 %v1063_v0 }
 0x327   :  { %1469 = vmatpush.msra.mxu2 %v1062_v2 }
 0x329   :  { %1470 = vmatpush.msra.mxu2 %v1061_v33 }
 0x32a   :  { %v1057_v32 = vld [vmem:[#allocation2 + $0x8] sm:$0xff] }
 0x32b   :  { %1116 = vmatpush.msrb.mxu3 %v1057_v32  ;;  %1471 = vmatpush.msra.mxu2 %v1060_v38  ;;  %v1127_v20 = vmul.f32 %v1125_v43, %v1057_v32 }
 0x32c   :  { %2711 = vmatmul.msk.f32.vlgmr.msrb.gmra.mxu3 %vm210_vm1, %v3241_v3 }
 0x32d   :  { %1311 = vmatpush.msra.mxu3 %v1063_v0 }
 0x32f   :  { %1312 = vmatpush.msra.mxu3 %v1062_v2 }
 0x331   :  { %1313 = vmatpush.msra.mxu3 %v1061_v33 }
 0x333   :  { %1314 = vmatpush.msra.mxu3 %v1060_v38 }
 0x334   :  { %2712 = vmatmul.msk.f32.gmra.mxu3 %vm210_vm1, %v3245_v5 }
 0x335   :  { %1521 = vmatpush.msrb.mxu3 %v1063_v0 }
 0x337   :  { %1522 = vmatpush.msrb.mxu3 %v1062_v2 }
 0x339   :  { %1523 = vmatpush.msrb.mxu3 %v1061_v33 }
 0x33b   :  { %1524 = vmatpush.msrb.mxu3 %v1060_v38 }
 0x39f   :  { %v1095_v16 = vpop.f32.mrf.mxu2 }
 0x3a0   :  { %v1130_v11 = vadd.f32 %v1126_v14, %v1095_v16 }
 0x3a2   :  { %1185 = vrot.lane.b32.xlu1 %v1130_v11, %s3092_s0  ;;  %1291 = vrot.lane.b32.xlu0 %v1130_v11, %s3091_s7 }
 0x3a3   :  { %1238 = vrot.lane.b32.xlu2 %v1130_v11, %s3077_s26  ;;  %2713 = vmatmul.msk.f32.vlgmr.msrb.gmra.mxu0 %vm284_vm5, %v1130_v11 }
 0x3a7   :  { %v1098_v18 = vpop.f32.mrf.mxu2 }
 0x3a8   :  { %v1132_v19 = vadd.f32 %v1128_v17, %v1098_v18 }
 0x3aa   :  { %1187 = vrot.lane.b32.xlu1 %v1132_v19, %s3092_s0  ;;  %1293 = vrot.lane.b32.xlu0 %v1132_v19, %s3091_s7 }
 0x3ab   :  { %1240 = vrot.lane.b32.xlu2 %v1132_v19, %s3077_s26  ;;  %2714 = vmatmul.msk.f32.gmra.mxu0 %vm284_vm5, %v1132_v19 }
 0x3af   :  { %v1118_v21 = vpop.f32.mrf.mxu3 }
 0x3b0   :  { %v1131_v12 = vadd.f32 %v1127_v20, %v1118_v21 }
 0x3b2   :  { %1395 = vrot.lane.b32.xlu1 %v1131_v12, %s3092_s0  ;;  %1501 = vrot.lane.b32.xlu0 %v1131_v12, %s3091_s7 }
 0x3b3   :  { %1448 = vrot.lane.b32.xlu2 %v1131_v12, %s3077_s26  ;;  %2721 = vmatmul.msk.f32.vlgmr.msra.gmra.mxu0 %vm284_vm5, %v1131_v12 }
 0x3b7   :  { %v1121_v35 = vpop.f32.mrf.mxu3 }
 0x3b8   :  { %v1133_v22 = vadd.f32 %v1129_v13, %v1121_v35 }
 0x3ba   :  { %1397 = vrot.lane.b32.xlu1 %v1133_v22, %s3092_s0  ;;  %1503 = vrot.lane.b32.xlu0 %v1133_v22, %s3091_s7 }
 0x3bb   :  { %1450 = vrot.lane.b32.xlu2 %v1133_v22, %s3077_s26  ;;  %2722 = vmatmul.msk.f32.gmra.mxu0 %vm284_vm5, %v1133_v22 }
 0x3fd   :  { %v1239_v24 = vpop.permute.xlu2 %1238 }
 0x3fe   :  { %2717 = vmatmul.msk.f32.vlgmr.msrb.gmra.mxu2 %vm284_vm5, %v1239_v24 }
 0x405   :  { %v1241_v26 = vpop.permute.xlu2 %1240 }
 0x406   :  { %2718 = vmatmul.msk.f32.gmra.mxu2 %vm284_vm5, %v1241_v26 }
 0x40d   :  { %v1449_v27 = vpop.permute.xlu2 %1448 }
 0x40e   :  { %2725 = vmatmul.msk.f32.vlgmr.msra.gmra.mxu2 %vm284_vm5, %v1449_v27 }
 0x414   :  { %v1186_v30 = vpop.permute.xlu1 %1185  ;;  %v1292_v34 = vpop.permute.xlu0 %1291 }
 0x415   :  { %v1451_v15 = vpop.permute.xlu2 %1450  ;;  %2715 = vmatmul.msk.f32.vlgmr.msrb.gmra.mxu1 %vm284_vm5, %v1186_v30  ;;  %2719 = vmatmul.msk.f32.vlgmr.msra.gmra.mxu3 %vm284_vm5, %v1292_v34 }
 0x416   :  { %2726 = vmatmul.msk.f32.gmra.mxu2 %vm284_vm5, %v1451_v15 }
 0x41c   :  { %v1188_v23 = vpop.permute.xlu1 %1187  ;;  %v1294_v36 = vpop.permute.xlu0 %1293 }
 0x41d   :  { %2716 = vmatmul.msk.f32.gmra.mxu1 %vm284_vm5, %v1188_v23  ;;  %2720 = vmatmul.msk.f32.gmra.mxu3 %vm284_vm5, %v1294_v36 }
 0x420   :  { %v3513_v47 = vpop.f32.mrf.mxu0 }
 0x421   :  { %v1163_v25 = vsel %vm284_vm5, %v3513_v47, 0.0  ;;  %v1173_v55 = vmul.f32 %v3513_v47, %v3513_v47 }
 0x423   :  { %v1175_v46 = vsel %vm284_vm5, %v1173_v55, 0.0 }
 0x424   :  { %v1396_v37 = vpop.permute.xlu1 %1395  ;;  %v1502_v39 = vpop.permute.xlu0 %1501 }
 0x425   :  { %2723 = vmatmul.msk.f32.vlgmr.msra.gmra.mxu1 %vm284_vm5, %v1396_v37  ;;  %2727 = vmatmul.msk.f32.vlgmr.msrb.gmra.mxu3 %vm284_vm5, %v1502_v39 }
 0x428   :  { %v3515_v48 = vpop.f32.mrf.mxu0 }
 0x429   :  { %v1164_v53 = vsel %vm286_vm4, %v3515_v48, 0.0  ;;  %v1174_v54 = vmul.f32 %v3515_v48, %v3515_v48 }
 0x42a   :  { %v1165_v49 = vadd.f32 %v1164_v53, %v1163_v25 }
 0x42b   :  { %v1176_v45 = vsel %vm286_vm4, %v1174_v54, 0.0 }
 0x42c   :  { %v1398_v40 = vpop.permute.xlu1 %1397  ;;  %v1504_v42 = vpop.permute.xlu0 %1503  ;;  %v1166_v56 = vrot.slane %v1165_v49, 4  ;;  %v1177_v57 = vadd.f32 %v1176_v45, %v1175_v46 }
 0x42d   :  { %2724 = vmatmul.msk.f32.gmra.mxu1 %vm284_vm5, %v1398_v40  ;;  %2728 = vmatmul.msk.f32.gmra.mxu3 %vm284_vm5, %v1504_v42 }
 0x42e   :  { %v1167_v60 = vadd.f32 %v1166_v56, %v1165_v49  ;;  %v1178_v28 = vrot.slane %v1177_v57, 4 }
 0x430   :  { %v3517_v51 = vpop.f32.mrf.mxu0  ;;  %v1168_v9 = vrot.slane %v1167_v60, 2  ;;  %v1179_v32 = vadd.f32 %v1178_v28, %v1177_v57 }
 0x431   :  { %v1383_v61 = vmul.f32 %v3517_v51, %v3517_v51  ;;  %v1373_v58 = vsel %vm284_vm5, %v3517_v51, 0.0 }
 0x432   :  { %v1169_v11 = vadd.f32 %v1168_v9, %v1167_v60  ;;  %v1180_v18 = vrot.slane %v1179_v32, 2 }
 0x433   :  { %v1385_v59 = vsel %vm284_vm5, %v1383_v61, 0.0 }
 0x434   :  { %v1170_v30 = vrot.slane %v1169_v11, 1  ;;  %v1181_v23 = vadd.f32 %v1180_v18, %v1179_v32 }
 0x438   :  { %v3529_v50 = vpop.f32.mrf.mxu0 }
 0x439   :  { %v1384_v44 = vmul.f32 %v3529_v50, %v3529_v50  ;;  %v1374_v62 = vsel %vm286_vm4, %v3529_v50, 0.0 }
 0x43a   :  { %v1375_v4 = vadd.f32 %v1374_v62, %v1373_v58 }
 0x43b   :  { %v1386_v63 = vsel %vm286_vm4, %v1384_v44, 0.0 }
 0x43c   :  { %v1387_v6 = vadd.f32 %v1386_v63, %v1385_v59  ;;  %v1376_v33 = vrot.slane %v1375_v4, 4 }
 0x43e   :  { %v1388_v38 = vrot.slane %v1387_v6, 4  ;;  %v1377_v21 = vadd.f32 %v1376_v33, %v1375_v4 }
 0x440   :  { %v1389_v12 = vadd.f32 %v1388_v38, %v1387_v6  ;;  %v1378_v40 = vrot.slane %v1377_v21, 2  ;;  %v1182_v38 = vrot.slane %v1181_v23, 1 }
 0x442   :  { %v1390_v42 = vrot.slane %v1389_v12, 2 }
 0x481   :  { %v3519_v52 = vpop.f32.mrf.mxu2 }
 0x482   :  { %v1269_v0 = vsel %vm284_vm5, %v3519_v52, 0.0  ;;  %v1279_v7 = vmul.f32 %v3519_v52, %v3519_v52 }
 0x484   :  { %v1281_v43 = vsel %vm284_vm5, %v1279_v7, 0.0 }
 0x489   :  { %v3531_v29 = vpop.f32.mrf.mxu2 }
 0x48a   :  { %v1270_v31 = vsel %vm286_vm4, %v3531_v29, 0.0  ;;  %v1280_v1 = vmul.f32 %v3531_v29, %v3531_v29 }
 0x48b   :  { %v1271_v8 = vadd.f32 %v1270_v31, %v1269_v0 }
 0x48c   :  { %v1282_v10 = vsel %vm286_vm4, %v1280_v1, 0.0 }
 0x48d   :  { %v1272_v14 = vrot.slane %v1271_v8, 4  ;;  %v1283_v16 = vadd.f32 %v1282_v10, %v1281_v43  ;;  %v3599_v43 = vadd.f32 %v1378_v40, %v1377_v21 }
 0x48f   :  { %v1273_v13 = vadd.f32 %v1272_v14, %v1271_v8  ;;  %v1284_v22 = vrot.slane %v1283_v16, 4  ;;  %v3601_v14 = vadd.f32 %v1390_v42, %v1389_v12  ;;  %v1380_v21 = vrot.slane %v3599_v43, 1 }
 0x491   :  { %v3551_v2 = vpop.f32.mrf.mxu2  ;;  %v1274_v25 = vrot.slane %v1273_v13, 2  ;;  %v1285_v55 = vadd.f32 %v1284_v22, %v1283_v16  ;;  %v1392_v12 = vrot.slane %v3601_v14, 1 }
 0x492   :  { %v3555_v41 = vpop.f32.mrf.mxu1  ;;  %v1489_v36 = vmul.f32 %v3551_v2, %v3551_v2  ;;  %v1479_v44 = vsel %vm284_vm5, %v3551_v2, 0.0 }
 0x493   :  { %v1226_v19 = vmul.f32 %v3555_v41, %v3555_v41  ;;  %v1216_v24 = vsel %vm284_vm5, %v3555_v41, 0.0  ;;  %v1286_v4 = vrot.slane %v1285_v55, 2  ;;  %v1275_v16 = vadd.f32 %v1274_v25, %v1273_v13 }
 0x494   :  { %v1491_v62 = vsel %vm284_vm5, %v1489_v36, 0.0 }
 0x495   :  { %v1228_v37 = vsel %vm284_vm5, %v1226_v19, 0.0  ;;  %v1276_v40 = vrot.slane %v1275_v16, 1 }
 0x498   :  { %v3559_v17 = vpop.f32.mrf.mxu3 }
 0x499   :  { %v3563_v20 = vpop.f32.mrf.mxu2  ;;  %v1332_v49 = vmul.f32 %v3559_v17, %v3559_v17  ;;  %v1322_v63 = vsel %vm284_vm5, %v3559_v17, 0.0 }
 0x49a   :  { %v3565_v35 = vpop.f32.mrf.mxu1  ;;  %v1490_v34 = vmul.f32 %v3563_v20, %v3563_v20  ;;  %v1480_v45 = vsel %vm286_vm4, %v3563_v20, 0.0 }
 0x49b   :  { %v1217_v26 = vsel %vm286_vm4, %v3565_v35, 0.0  ;;  %v1227_v27 = vmul.f32 %v3565_v35, %v3565_v35  ;;  %v1481_v1 = vadd.f32 %v1480_v45, %v1479_v44  ;;  %v1334_v6 = vsel %vm284_vm5, %v1332_v49, 0.0 }
 0x49c   :  { %v1218_v15 = vadd.f32 %v1217_v26, %v1216_v24  ;;  %v1492_v46 = vsel %vm286_vm4, %v1490_v34, 0.0  ;;  %v1171_v26 = vadd.f32 %v1170_v30, %v1169_v11 }
 0x49d   :  { %v1229_v39 = vsel %vm286_vm4, %v1227_v27, 0.0  ;;  %v1493_v7 = vadd.f32 %v1492_v46, %v1491_v62  ;;  %v1482_v18 = vrot.slane %v1481_v1, 4  ;;  %v1287_v27 = vadd.f32 %v1286_v4, %v1285_v55 }
 0x49e   :  { %v1219_v53 = vrot.slane %v1218_v15, 4  ;;  %v1230_v54 = vadd.f32 %v1229_v39, %v1228_v37 }
 0x49f   :  { %v1483_v42 = vadd.f32 %v1482_v18, %v1481_v1  ;;  %v1288_v55 = vrot.slane %v1287_v27, 1  ;;  %v1277_v1 = vadd.f32 %v1276_v40, %v1275_v16 }
 0x4a0   :  { %v1220_v56 = vadd.f32 %v1219_v53, %v1218_v15  ;;  %v1231_v57 = vrot.slane %v1230_v54, 4  ;;  %v3586_v61 = vpop.f32.mrf.mxu3  ;;  %v1494_v15 = vrot.slane %v1493_v7, 4 }
 0x4a1   :  { %v1323_v31 = vsel %vm286_vm4, %v3586_v61, 0.0  ;;  %v1333_v60 = vmul.f32 %v3586_v61, %v3586_v61  ;;  %v1289_v4 = vadd.f32 %v1288_v55, %v1287_v27 }
 0x4a2   :  { %v1221_v28 = vrot.slane %v1220_v56, 2  ;;  %v1232_v58 = vadd.f32 %v1231_v57, %v1230_v54  ;;  %v1324_v59 = vadd.f32 %v1323_v31, %v1322_v63  ;;  %v3595_v0 = vpop.f32.mrf.mxu1  ;;  %v1183_v54 = vadd.f32 %v1182_v38, %v1181_v23 }
 0x4a3   :  { %v1335_v8 = vsel %vm286_vm4, %v1333_v60, 0.0  ;;  %v1436_v13 = vmul.f32 %v3595_v0, %v3595_v0  ;;  %v1495_v44 = vadd.f32 %v1494_v15, %v1493_v7  ;;  %v1426_v57 = vsel %vm284_vm5, %v3595_v0, 0.0 }
 0x4a4   :  { %v1222_v9 = vadd.f32 %v1221_v28, %v1220_v56  ;;  %v1233_v10 = vrot.slane %v1232_v58, 2  ;;  %v1325_v32 = vrot.slane %v1324_v59, 4  ;;  %v1336_v33 = vadd.f32 %v1335_v8, %v1334_v6 }
 0x4a5   :  { %v1438_v63 = vsel %vm284_vm5, %v1436_v13, 0.0  ;;  %v1484_v28 = vrot.slane %v1483_v42, 2 }
 0x4a6   :  { %v1234_v19 = vadd.f32 %v1233_v10, %v1232_v58  ;;  %v1326_v22 = vadd.f32 %v1325_v32, %v1324_v59  ;;  %v1337_v24 = vrot.slane %v1336_v33, 4  ;;  %v1223_v34 = vrot.slane %v1222_v9, 1 }
 0x4a8   :  { %v1235_v36 = vrot.slane %v1234_v19, 1  ;;  %v1327_v37 = vrot.slane %v1326_v22, 2  ;;  %v1338_v39 = vadd.f32 %v1337_v24, %v1336_v33  ;;  %v3603_v53 = vpop.f32.mrf.mxu3  ;;  %v1224_v49 = vadd.f32 %v1223_v34, %v1222_v9 }
 0x4a9   :  { %v1542_v7 = vmul.f32 %v3603_v53, %v3603_v53  ;;  %v1496_v9 = vrot.slane %v1495_v44, 2  ;;  %v1532_v32 = vsel %vm284_vm5, %v3603_v53, 0.0  ;;  %v1485_v24 = vadd.f32 %v1484_v28, %v1483_v42 }
 0x4aa   :  { %v1328_v25 = vadd.f32 %v1327_v37, %v1326_v22  ;;  %v1339_v11 = vrot.slane %v1338_v39, 2  ;;  %v3609_v30 = vpop.f32.mrf.mxu1  ;;  %v1236_v46 = vadd.f32 %v1235_v36, %v1234_v19  ;;  %v1225_v6 = vadd.f32 %v1224_v49, %v1171_v26 }
 0x4ab   :  { %v1427_v45 = vsel %vm286_vm4, %v3609_v30, 0.0  ;;  %v1437_v23 = vmul.f32 %v3609_v30, %v3609_v30  ;;  %v1544_v36 = vsel %vm284_vm5, %v1542_v7, 0.0 }
 0x4ac   :  { %v1340_v56 = vadd.f32 %v1339_v11, %v1338_v39  ;;  %v1329_v62 = vrot.slane %v1328_v25, 1  ;;  %v1428_v31 = vadd.f32 %v1427_v45, %v1426_v57  ;;  %v1237_v10 = vadd.f32 %v1236_v46, %v1183_v54 }
 0x4ad   :  { %v1439_v60 = vsel %vm286_vm4, %v1437_v23, 0.0  ;;  %v1278_v15 = vadd.f32 %v1277_v1, %v1225_v6  ;;  %v1497_v11 = vadd.f32 %v1496_v9, %v1495_v44  ;;  %v1393_v57 = vadd.f32 %v1392_v12, %v3601_v14 }
 0x4ae   :  { %v1341_v58 = vrot.slane %v1340_v56, 1  ;;  %v1440_v59 = vadd.f32 %v1439_v60, %v1438_v63  ;;  %v1429_v8 = vrot.slane %v1428_v31, 4  ;;  %v1330_v18 = vadd.f32 %v1329_v62, %v1328_v25 }
 0x4af   :  { %v1290_v54 = vadd.f32 %v1289_v4, %v1237_v10  ;;  %v1486_v63 = vrot.slane %v1485_v24, 1  ;;  %v1498_v28 = vrot.slane %v1497_v11, 1 }
 0x4b0   :  { %v1441_v33 = vrot.slane %v1440_v59, 4  ;;  %v3623_v38 = vpop.f32.mrf.mxu3  ;;  %v1430_v19 = vadd.f32 %v1429_v8, %v1428_v31  ;;  %v1342_v26 = vadd.f32 %v1341_v58, %v1340_v56  ;;  %v1331_v55 = vadd.f32 %v1330_v18, %v1278_v15 }
 0x4b1   :  { %v1533_v16 = vsel %vm286_vm4, %v3623_v38, 0.0  ;;  %v1543_v22 = vmul.f32 %v3623_v38, %v3623_v38  ;;  %v1381_v56 = vadd.f32 %v1380_v21, %v3599_v43  ;;  %v1487_v9 = vadd.f32 %v1486_v63, %v1485_v24  ;;  %v1067_v24 = vld [vmem:[#allocation16 + $0x8] sm:$0xff] }
 0x4b2   :  { %v1442_v27 = vadd.f32 %v1441_v33, %v1440_v59  ;;  %v1534_v34 = vadd.f32 %v1533_v16, %v1532_v32  ;;  %v1431_v37 = vrot.slane %v1430_v19, 2  ;;  %v1343_v45 = vadd.f32 %v1342_v26, %v1290_v54 }
 0x4b3   :  { %v1545_v39 = vsel %vm286_vm4, %v1543_v22, 0.0  ;;  %v1382_v58 = vadd.f32 %v1381_v56, %v1331_v55  ;;  %v1499_v43 = vadd.f32 %v1498_v28, %v1497_v11 }
 0x4b4   :  { %v1443_v13 = vrot.slane %v1442_v27, 2  ;;  %v1535_v40 = vrot.slane %v1534_v34, 4  ;;  %v1546_v25 = vadd.f32 %v1545_v39, %v1544_v36  ;;  %v1432_v49 = vadd.f32 %v1431_v37, %v1430_v19  ;;  %v1066_v39 = vld [vmem:[#allocation16] sm:$0xff] }
 0x4b5   :  { %v1394_v4 = vadd.f32 %v1393_v57, %v1343_v45 }
 0x4b6   :  { %v1444_v23 = vadd.f32 %v1443_v13, %v1442_v27  ;;  %v1536_v46 = vadd.f32 %v1535_v40, %v1534_v34  ;;  %v1547_v42 = vrot.slane %v1546_v25, 4  ;;  %v1433_v62 = vrot.slane %v1432_v49, 1  ;;  %v1069_v27 = vld [vmem:[#allocation16 + $0x18] sm:$0xff]  ;;  %v1068_v34 = vld [vmem:[#allocation16 + $0x10] sm:$0xff] }
 0x4b7   :  { %1687 = vmatpush.msrb.mxu2 %v1069_v27  ;;  %1605 = vmatpush.msrb.mxu0 %v1069_v27 }
 0x4b8   :  { %v1445_v31 = vrot.slane %v1444_v23, 1  ;;  %v1537_v60 = vrot.slane %v1536_v46, 2  ;;  %v1548_v1 = vadd.f32 %v1547_v42, %v1546_v25  ;;  %v1434_v59 = vadd.f32 %v1433_v62, %v1432_v49  ;;  %1642 = vmatpush.msrb.mxu1 %v1069_v27  ;;  %1732 = vmatpush.msra.mxu3 %v1069_v27  ;;  %v1064_v49 = vld [vmem:[%s4003_s10] sm:$0x1]  ;;  %s2645_s10 = sshll.u32 %s4012_s19, 4  ;;  %s2646_s10 = int_to_ptr.hbm [resolvable:$true] %s2645_s10 }
 0x4b9   :  { %1606 = vmatpush.msrb.mxu0 %v1068_v34  ;;  %1688 = vmatpush.msrb.mxu2 %v1068_v34  ;;  %v1065_v42 = vld [vmem:[%s4004_s11] sm:$0x1] }
 0x4ba   :  { %v1446_v44 = vadd.f32 %v1445_v31, %v1444_v23  ;;  %v1538_v6 = vadd.f32 %v1537_v60, %v1536_v46  ;;  %v1549_v7 = vrot.slane %v1548_v1, 2  ;;  %v1435_v8 = vadd.f32 %v1434_v59, %v1382_v58  ;;  %1643 = vmatpush.msrb.mxu1 %v1068_v34  ;;  %1733 = vmatpush.msra.mxu3 %v1068_v34 }
 0x4bb   :  { %1607 = vmatpush.msrb.mxu0 %v1067_v24  ;;  %1689 = vmatpush.msrb.mxu2 %v1067_v24 }
 0x4bc   :  { %v1447_v10 = vadd.f32 %v1446_v44, %v1394_v4  ;;  %v1539_v32 = vrot.slane %v1538_v6, 1  ;;  %v1550_v33 = vadd.f32 %v1549_v7, %v1548_v1  ;;  %v1488_v21 = vadd.f32 %v1487_v9, %v1435_v8  ;;  %1644 = vmatpush.msrb.mxu1 %v1067_v24  ;;  %1734 = vmatpush.msra.mxu3 %v1067_v24 }
 0x4bd   :  { %1608 = vmatpush.msrb.mxu0 %v1066_v39  ;;  %1690 = vmatpush.msrb.mxu2 %v1066_v39 }
 0x4be   :  { %v1540_v14 = vadd.f32 %v1539_v32, %v1538_v6  ;;  %v1551_v12 = vrot.slane %v1550_v33, 1  ;;  %v1500_v18 = vadd.f32 %v1499_v43, %v1447_v10  ;;  %1645 = vmatpush.msrb.mxu1 %v1066_v39  ;;  %1735 = vmatpush.msra.mxu3 %v1066_v39 }
 0x4bf   :  { %1859 = vmatpush.msra.mxu2 %v1069_v27  ;;  %1777 = vmatpush.msra.mxu0 %v1069_v27 }
 0x4c0   :  { %v1541_v19 = vadd.f32 %v1540_v14, %v1488_v21  ;;  %v1552_v16 = vadd.f32 %v1551_v12, %v1550_v33  ;;  %1814 = vmatpush.msra.mxu1 %v1069_v27  ;;  %1904 = vmatpush.msrb.mxu3 %v1069_v27 }
 0x4c1   :  { %1778 = vmatpush.msra.mxu0 %v1068_v34  ;;  %1860 = vmatpush.msra.mxu2 %v1068_v34 }
 0x4c2   :  { %v1553_v22 = vadd.f32 %v1552_v16, %v1500_v18  ;;  %v1554_v26 = vmul.f32 0.008928572, %v1541_v19  ;;  %1815 = vmatpush.msra.mxu1 %v1068_v34  ;;  %1905 = vmatpush.msrb.mxu3 %v1068_v34 }
 0x4c3   :  { %1779 = vmatpush.msra.mxu0 %v1067_v24  ;;  %1861 = vmatpush.msra.mxu2 %v1067_v24 }
 0x4c4   :  { %v1555_v15 = vmul.f32 0.008928572, %v1553_v22  ;;  %v1556_v36 = vmul.f32 %v1554_v26, %v1554_v26  ;;  %1816 = vmatpush.msra.mxu1 %v1067_v24  ;;  %1906 = vmatpush.msrb.mxu3 %v1067_v24 }
 0x4c5   :  { %1780 = vmatpush.msra.mxu0 %v1066_v39  ;;  %1862 = vmatpush.msra.mxu2 %v1066_v39 }
 0x4c6   :  { %v1557_v37 = vsub.f32 %v1555_v15, %v1556_v36  ;;  %1817 = vmatpush.msra.mxu1 %v1066_v39  ;;  %1907 = vmatpush.msrb.mxu3 %v1066_v39 }
 0x4c8   :  { %v1558_v54 = vadd.f32 1e-05, %v1557_v37 }
 0x4ca   :  { %2823 = vrsqrt.f32 %v1558_v54  ;;  %vm1565_vm2 = vweird.f32 %v1558_v54 }
 0x4d0   :  { %v2824_v13 = vpop.eup %2823 }
 0x4d1   :  { %v1560_v40 = vmul.f32 %v2824_v13, %v1558_v54  ;;  %vm1566_vm15 = vweird.f32 %v2824_v13 }
 0x4d2   :  { %vm1567_vm3 = vmor %vm1565_vm2, %vm1566_vm15 }
 0x4d3   :  { %v1561_v25 = vmul.f32 %v2824_v13, %v1560_v40 }
 0x4d5   :  { %v1562_v11 = vmul.f32 0.5, %v1561_v25 }
 0x4d7   :  { %v1563_v55 = vsub.f32 1.5, %v1562_v11 }
 0x4d9   :  { %v1564_v45 = vmul.f32 %v2824_v13, %v1563_v55 }
 0x4db   :  { %v1568_v23 = vsel %vm1567_vm3, %v2824_v13, %v1564_v45 }
 0x4dc   :  { %v1569_v46 = vmul.f32 %v1568_v23, %v1064_v49 }
 0x4de   :  { %v1570_v56 = vmul.f32 %v1569_v46, %v1554_v26  ;;  %v1573_v57 = vperm.slane %v1569_v46, 0 }
 0x4e0   :  { %v1571_v62 = vsub.f32 %v1065_v42, %v1570_v56  ;;  %v1575_v63 = vmul.f32 %v1573_v57, %v3513_v47  ;;  %v1618_v60 = vmul.f32 %v1573_v57, %v3555_v41  ;;  %v1663_v1 = vmul.f32 %v1573_v57, %v3519_v52 }
 0x4e1   :  { %v1708_v28 = vmul.f32 %v1573_v57, %v3559_v17  ;;  %v1576_v47 = vmul.f32 %v1573_v57, %v3515_v48  ;;  %v1619_v41 = vmul.f32 %v1573_v57, %v3565_v35  ;;  %v1664_v52 = vmul.f32 %v1573_v57, %v3531_v29 }
 0x4e2   :  { %v1578_v31 = vperm.slane %v1571_v62, 0  ;;  %v1709_v17 = vmul.f32 %v1573_v57, %v3586_v61  ;;  %v1753_v48 = vmul.f32 %v1573_v57, %v3517_v51  ;;  %v1790_v35 = vmul.f32 %v1573_v57, %v3595_v0 }
 0x4e3   :  { %v1835_v29 = vmul.f32 %v1573_v57, %v3551_v2  ;;  %v1880_v61 = vmul.f32 %v1573_v57, %v3603_v53  ;;  %v1754_v51 = vmul.f32 %v1573_v57, %v3529_v50  ;;  %v1791_v0 = vmul.f32 %v1573_v57, %v3609_v30  ;;  %v2819_v50 = vld [vmem:[%s4006_s13] ss:$0 sm:$0xff]  ;;  %s2745_s13 = sld [smem:[#allocation9 + $0x2]] }
 0x4e4   :  { %v1580_v58 = vadd.f32 %v1578_v31, %v1575_v63  ;;  %v1620_v59 = vadd.f32 %v1618_v60, %v1578_v31  ;;  %v1665_v4 = vadd.f32 %v1663_v1, %v1578_v31  ;;  %v1710_v44 = vadd.f32 %v1708_v28, %v1578_v31 }
 0x4e5   :  { %v1581_v10 = vadd.f32 %v1578_v31, %v1576_v47  ;;  %v1621_v32 = vadd.f32 %v1619_v41, %v1578_v31  ;;  %v1666_v33 = vadd.f32 %v1664_v52, %v1578_v31  ;;  %v1711_v43 = vadd.f32 %v1709_v17, %v1578_v31 }
 0x4e6   :  { %v1582_v6 = vmax.f32 %v1580_v58, 0.0  ;;  %v1622_v7 = vmax.f32 %v1620_v59, 0.0  ;;  %v1667_v8 = vmax.f32 %v1665_v4, 0.0  ;;  %v1712_v9 = vmax.f32 %v1710_v44, 0.0 }
 0x4e7   :  { %v1583_v21 = vmax.f32 %v1581_v10, 0.0  ;;  %v1623_v14 = vmax.f32 %v1621_v32, 0.0  ;;  %v1668_v12 = vmax.f32 %v1666_v33, 0.0  ;;  %v1713_v18 = vmax.f32 %v1711_v43, 0.0 }
 0x4e8   :  { %2729 = vmatmul.msk.f32.vlgmr.msrb.gmra.mxu0 %vm284_vm5, %v1582_v6  ;;  %2731 = vmatmul.msk.f32.vlgmr.msrb.gmra.mxu1 %vm284_vm5, %v1622_v7  ;;  %v1755_v19 = vadd.f32 %v1753_v48, %v1578_v31  ;;  %v1792_v16 = vadd.f32 %v1790_v35, %v1578_v31  ;;  %v1837_v22 = vadd.f32 %v1835_v29, %v1578_v31 }
 0x4e9   :  { %2733 = vmatmul.msk.f32.vlgmr.msrb.gmra.mxu2 %vm284_vm5, %v1667_v8  ;;  %2735 = vmatmul.msk.f32.vlgmr.msra.gmra.mxu3 %vm284_vm5, %v1712_v9  ;;  %v1882_v26 = vadd.f32 %v1880_v61, %v1578_v31  ;;  %v1881_v2 = vmul.f32 %v1573_v57, %v3623_v38  ;;  %v1836_v53 = vmul.f32 %v1573_v57, %v3563_v20  ;;  %s1993_s27 = sadd.f32 1.0, %s2745_s13 }
 0x4ea   :  { %v1757_v27 = vmax.f32 %v1755_v19, 0.0  ;;  %v1794_v34 = vmax.f32 %v1792_v16, 0.0  ;;  %v1839_v15 = vmax.f32 %v1837_v22, 0.0  ;;  %v1756_v24 = vadd.f32 %v1754_v51, %v1578_v31  ;;  %v1932_v19 = vld [vmem:[#allocation17 + $0x18] sm:$0xff]  ;;  %v1931_v16 = vld [vmem:[#allocation17 + $0x10] sm:$0xff] }
 0x4eb   :  { %v1884_v36 = vmax.f32 %v1882_v26, 0.0  ;;  %v1793_v37 = vadd.f32 %v1791_v0, %v1578_v31  ;;  %v1838_v39 = vadd.f32 %v1836_v53, %v1578_v31  ;;  %v1883_v54 = vadd.f32 %v1881_v2, %v1578_v31  ;;  %2021 = vmatpush.msrb.mxu2 %v1932_v19  ;;  %2074 = vmatpush.msra.mxu3 %v1932_v19  ;;  %v1930_v0 = vld [vmem:[#allocation17 + $0x8] sm:$0xff]  ;;  %v1929_v2 = vld [vmem:[#allocation17] sm:$0xff] }
 0x4ec   :  { %v1758_v13 = vmax.f32 %v1756_v24, 0.0 }
 0x4ed   :  { %v1795_v40 = vmax.f32 %v1793_v37, 0.0  ;;  %v1840_v25 = vmax.f32 %v1838_v39, 0.0  ;;  %v1885_v11 = vmax.f32 %v1883_v54, 0.0  ;;  %2022 = vmatpush.msrb.mxu2 %v1931_v16  ;;  %2075 = vmatpush.msra.mxu3 %v1931_v16 }
 0x4ef   :  { %2023 = vmatpush.msrb.mxu2 %v1930_v0  ;;  %2076 = vmatpush.msra.mxu3 %v1930_v0 }
 0x4f0   :  { %2730 = vmatmul.msk.f32.gmra.mxu0 %vm284_vm5, %v1583_v21  ;;  %2732 = vmatmul.msk.f32.gmra.mxu1 %vm284_vm5, %v1623_v14 }
 0x4f1   :  { %2734 = vmatmul.msk.f32.gmra.mxu2 %vm284_vm5, %v1668_v12  ;;  %2736 = vmatmul.msk.f32.gmra.mxu3 %vm284_vm5, %v1713_v18 }
 0x4f2   :  { %2024 = vmatpush.msrb.mxu2 %v1929_v2  ;;  %2077 = vmatpush.msra.mxu3 %v1929_v2 }
 0x4f8   :  { %2737 = vmatmul.msk.f32.vlgmr.msra.gmra.mxu0 %vm284_vm5, %v1757_v27  ;;  %2739 = vmatmul.msk.f32.vlgmr.msra.gmra.mxu1 %vm284_vm5, %v1794_v34 }
 0x4f9   :  { %2741 = vmatmul.msk.f32.vlgmr.msra.gmra.mxu2 %vm284_vm5, %v1839_v15  ;;  %2743 = vmatmul.msk.f32.vlgmr.msrb.gmra.mxu3 %vm284_vm5, %v1884_v36 }
 0x4fa   :  { %2231 = vmatpush.msra.mxu2 %v1932_v19  ;;  %2284 = vmatpush.msrb.mxu3 %v1932_v19 }
 0x4fc   :  { %2232 = vmatpush.msra.mxu2 %v1931_v16  ;;  %2285 = vmatpush.msrb.mxu3 %v1931_v16 }
 0x4fe   :  { %2233 = vmatpush.msra.mxu2 %v1930_v0  ;;  %2286 = vmatpush.msrb.mxu3 %v1930_v0 }
 0x500   :  { %2738 = vmatmul.msk.f32.gmra.mxu0 %vm284_vm5, %v1758_v13  ;;  %2740 = vmatmul.msk.f32.gmra.mxu1 %vm284_vm5, %v1795_v40 }
 0x501   :  { %2742 = vmatmul.msk.f32.gmra.mxu2 %vm284_vm5, %v1840_v25  ;;  %2744 = vmatmul.msk.f32.gmra.mxu3 %vm284_vm5, %v1885_v11 }
 0x502   :  { %2234 = vmatpush.msra.mxu2 %v1929_v2  ;;  %2287 = vmatpush.msrb.mxu3 %v1929_v2 }
 0x565   :  { %v1610_v20 = vpop.f32.mrf.mxu0  ;;  %v1647_v30 = vpop.f32.mrf.mxu1 }
 0x566   :  { %v1611_v38 = vadd.f32 %v2819_v50, %v1610_v20  ;;  %v1648_v55 = vadd.f32 %v2819_v50, %v1647_v30 }
 0x568   :  { %1616 = vst.msk [vmem:[#allocation2] sm:$0xff] %vm284_vm5, %v1611_v38  ;;  %1655 = vrot.lane.b32.xlu1 %v1648_v55, %s3091_s7 }
 0x56c   :  { %v1692_v49 = vpop.f32.mrf.mxu2  ;;  %v1737_v45 = vpop.f32.mrf.mxu3 }
 0x56d   :  { %v1613_v23 = vpop.f32.mrf.mxu0  ;;  %v1650_v46 = vpop.f32.mrf.mxu1  ;;  %v1738_v42 = vadd.f32 %v2819_v50, %v1737_v45  ;;  %v1693_v6 = vadd.f32 %v2819_v50, %v1692_v49 }
 0x56e   :  { %v1614_v56 = vadd.f32 %v2819_v50, %v1613_v23  ;;  %v1651_v57 = vadd.f32 %v2819_v50, %v1650_v46 }
 0x570   :  { %1617 = vst.msk [vmem:[#allocation2 + $0x10] sm:$0x3f] %vm286_vm4, %v1614_v56  ;;  %1657 = vrot.lane.b32.xlu2 %v1651_v57, %s3091_s7  ;;  %1745 = vrot.lane.b32.xlu1 %v1738_v42, %s3092_s0 }
 0x574   :  { %v1695_v62 = vpop.f32.mrf.mxu2  ;;  %v1740_v63 = vpop.f32.mrf.mxu3 }
 0x575   :  { %v1696_v31 = vadd.f32 %v2819_v50, %v1695_v62  ;;  %v1782_v60 = vpop.f32.mrf.mxu0  ;;  %v1819_v1 = vpop.f32.mrf.mxu1  ;;  %v1741_v28 = vadd.f32 %v2819_v50, %v1740_v63  ;;  %v3745_v62 = vld [vmem:[%s4027_s30] sm:$0xff]  ;;  %v3093_v63 = vmov 2  }
 0x576   :  { %v1783_v58 = vadd.f32 %v2819_v50, %v1782_v60  ;;  %v1820_v59 = vadd.f32 %v2819_v50, %v1819_v1  ;;  %2805 = vset.pattern.permute.xlu1 %v3093_v63  ;;  %v3095_v60 = vmov 0  }
 0x577   :  { %1702 = vrot.lane.b32.xlu0 %v1696_v31, %s3077_s26  ;;  %v3094_v31 = vmov 1   ;;  %2803 = vset.pattern.permute.xlu2 %v3095_v60 }
 0x578   :  { %1788 = vst.msk [vmem:[#allocation2 + $0x8] sm:$0xff] %vm284_vm5, %v1783_v58  ;;  %1747 = vrot.lane.b32.xlu2 %v1741_v28, %s3092_s0  ;;  %1827 = vrot.lane.b32.xlu1 %v1820_v59, %s3091_s7  ;;  %v3754_v58 = vld [vmem:[%s4027_s30 + $0x8] sm:$0x3f]  ;;  %v3096_v59 = vmov 4  }
 0x579   :  { %2804 = vset.pattern.permute.xlu0 %v3094_v31 }
 0x57c   :  { %v1864_v4 = vpop.f32.mrf.mxu2  ;;  %v1909_v44 = vpop.f32.mrf.mxu3 }
 0x57d   :  { %v1785_v7 = vpop.f32.mrf.mxu0  ;;  %v1822_v8 = vpop.f32.mrf.mxu1  ;;  %v1910_v9 = vadd.f32 %v2819_v50, %v1909_v44  ;;  %v1865_v33 = vadd.f32 %v2819_v50, %v1864_v4  ;;  %v3097_v4 = vmov 3   ;;  %v3098_v44 = vmov 6  }
 0x57e   :  { %v1786_v47 = vadd.f32 %v2819_v50, %v1785_v7  ;;  %v1823_v41 = vadd.f32 %v2819_v50, %v1822_v8  ;;  %v3100_v7 = vmov 7  }
 0x57f   :  { %1700 = vrot.lane.b32.xlu0 %v1693_v6, %s3077_s26  ;;  %v3099_v6 = vmov 5  }
 0x580   :  { %1789 = vst.msk [vmem:[#allocation2 + $0x18] sm:$0x3f] %vm286_vm4, %v1786_v47  ;;  %1829 = vrot.lane.b32.xlu2 %v1823_v41, %s3091_s7  ;;  %1917 = vrot.lane.b32.xlu1 %v1910_v9, %s3092_s0 }
 0x584   :  { %v1867_v52 = vpop.f32.mrf.mxu2  ;;  %v1912_v17 = vpop.f32.mrf.mxu3 }
 0x585   :  { %v1868_v10 = vadd.f32 %v2819_v50, %v1867_v52  ;;  %v1913_v32 = vadd.f32 %v2819_v50, %v1912_v17 }
 0x587   :  { %1874 = vrot.lane.b32.xlu0 %v1868_v10, %s3077_s26 }
 0x588   :  { %1919 = vrot.lane.b32.xlu2 %v1913_v32, %s3092_s0 }
 0x58f   :  { %1872 = vrot.lane.b32.xlu0 %v1865_v33, %s3077_s26 }
 0x5ca   :  { %v1658_v43 = vpop.permute.xlu2 %1657 }
 0x5cb   :  { %1662 = vst.msk [vmem:[#allocation2 + $0x10] sm:$0x3f] %vm788_vm9, %v1658_v43 }
 0x5d2   :  { %v1748_v21 = vpop.permute.xlu2 %1747 }
 0x5da   :  { %v1830_v14 = vpop.permute.xlu2 %1829  ;;  %v1656_v12 = vpop.permute.xlu1 %1655 }
 0x5db   :  { %1834 = vst.msk [vmem:[#allocation2 + $0x18] sm:$0x3f] %vm788_vm9, %v1830_v14 }
 0x5dc   :  { %1661 = vst.msk [vmem:[#allocation2] sm:$0xff] %vm786_vm10, %v1656_v12 }
 0x5e2   :  { %v1746_v18 = vpop.permute.xlu1 %1745  ;;  %v1920_v26 = vpop.permute.xlu2 %1919 }
 0x5e9   :  { %v1703_v48 = vpop.permute.xlu0 %1702 }
 0x5ea   :  { %1707 = vst.msk [vmem:[#allocation2 + $0x10] sm:$0x3f] %vm835_vm11, %v1703_v48  ;;  %v1828_v35 = vpop.permute.xlu1 %1827 }
 0x5eb   :  { %1752 = vst.msk [vmem:[#allocation2 + $0x10] sm:$0x3f] %vm882_vm12, %v1748_v21 }
 0x5ec   :  { %1833 = vst.msk [vmem:[#allocation2 + $0x8] sm:$0xff] %vm786_vm10, %v1828_v35 }
 0x5f1   :  { %v1701_v29 = vpop.permute.xlu0 %1700 }
 0x5f2   :  { %1706 = vst.msk [vmem:[#allocation2] sm:$0xff] %vm833_vm13, %v1701_v29  ;;  %v3697_v61 = vld [vmem:[#allocation2 + $0x10] sm:$0x3f]  ;;  %v1918_v15 = vpop.permute.xlu1 %1917 }
 0x5f3   :  { %1751 = vst.msk [vmem:[#allocation2] sm:$0xff] %vm880_vm14, %v1746_v18  ;;  %2746 = vmatpush.msk.msrb.mxu0 %vm217_vm0, %v3697_v61 }
 0x5f9   :  { %v1875_v22 = vpop.permute.xlu0 %1874 }
 0x5fa   :  { %1879 = vst.msk [vmem:[#allocation2 + $0x18] sm:$0x3f] %vm835_vm11, %v1875_v22  ;;  %v1925_v27 = vld [vmem:[#allocation2] sm:$0xff] }
 0x5fb   :  { %1924 = vst.msk [vmem:[#allocation2 + $0x18] sm:$0x3f] %vm882_vm12, %v1920_v26  ;;  %1962 = vmatpush.msrb.mxu0 %v1925_v27 }
 0x5fc   :  { %2747 = vmatmul.msk.f32.vlgmr.msrb.gmra.mxu0 %vm210_vm1, %v3241_v3 }
 0x5fd   :  { %2127 = vmatpush.msra.mxu0 %v1932_v19 }
 0x5ff   :  { %2128 = vmatpush.msra.mxu0 %v1931_v16 }
 0x601   :  { %v1873_v34 = vpop.permute.xlu0 %1872  ;;  %2129 = vmatpush.msra.mxu0 %v1930_v0 }
 0x602   :  { %1878 = vst.msk [vmem:[#allocation2 + $0x8] sm:$0xff] %vm833_vm13, %v1873_v34  ;;  %v1928_v36 = vld [vmem:[#allocation2 + $0x18] sm:$0x3f] }
 0x603   :  { %1923 = vst.msk [vmem:[#allocation2 + $0x8] sm:$0xff] %vm880_vm14, %v1918_v15  ;;  %2749 = vmatpush.msk.msrb.mxu1 %vm217_vm0, %v1928_v36  ;;  %2130 = vmatpush.msra.mxu0 %v1929_v2 }
 0x604   :  { %2748 = vmatmul.msk.f32.gmra.mxu0 %vm210_vm1, %v3245_v5 }
 0x605   :  { %2337 = vmatpush.msrb.mxu0 %v1932_v19 }
 0x607   :  { %2338 = vmatpush.msrb.mxu0 %v1931_v16 }
 0x609   :  { %2339 = vmatpush.msrb.mxu0 %v1930_v0 }
 0x60a   :  { %v1926_v51 = vld [vmem:[#allocation2 + $0x8] sm:$0xff] }
 0x60b   :  { %1985 = vmatpush.msrb.mxu1 %v1926_v51  ;;  %2340 = vmatpush.msrb.mxu0 %v1929_v2 }
 0x60c   :  { %2750 = vmatmul.msk.f32.vlgmr.msrb.gmra.mxu1 %vm210_vm1, %v3241_v3  ;;  %v1994_v3 = vstv %s1993_s27 }
 0x60d   :  { %2180 = vmatpush.msra.mxu1 %v1932_v19  ;;  %v1997_v37 = vmul.f32 %v1994_v3, %v3697_v61  ;;  %v1996_v13 = vmul.f32 %v1994_v3, %v1926_v51  ;;  %v1998_v11 = vmul.f32 %v1994_v3, %v1928_v36 }
 0x60f   :  { %2181 = vmatpush.msra.mxu1 %v1931_v16 }
 0x611   :  { %2182 = vmatpush.msra.mxu1 %v1930_v0 }
 0x613   :  { %2183 = vmatpush.msra.mxu1 %v1929_v2 }
 0x614   :  { %2751 = vmatmul.msk.f32.gmra.mxu1 %vm210_vm1, %v3245_v5  ;;  %v1995_v5 = vmul.f32 %v1994_v3, %v1925_v27 }
 0x615   :  { %2390 = vmatpush.msrb.mxu1 %v1932_v19 }
 0x617   :  { %2391 = vmatpush.msrb.mxu1 %v1931_v16 }
 0x619   :  { %2392 = vmatpush.msrb.mxu1 %v1930_v0 }
 0x61b   :  { %2393 = vmatpush.msrb.mxu1 %v1929_v2 }
 0x679   :  { %v1964_v53 = vpop.f32.mrf.mxu0 }
 0x67a   :  { %v1999_v24 = vadd.f32 %v1995_v5, %v1964_v53 }
 0x67c   :  { %2107 = vrot.lane.b32.xlu1 %v1999_v24, %s3077_s26  ;;  %2054 = vrot.lane.b32.xlu2 %v1999_v24, %s3092_s0 }
 0x67d   :  { %2752 = vmatmul.msk.f32.vlgmr.msrb.gmra.mxu2 %vm284_vm5, %v1999_v24 }
 0x681   :  { %v1967_v39 = vpop.f32.mrf.mxu0 }
 0x682   :  { %v2001_v54 = vadd.f32 %v1997_v37, %v1967_v39 }
 0x684   :  { %2160 = vrot.lane.b32.xlu2 %v1999_v24, %s3091_s7  ;;  %2056 = vrot.lane.b32.xlu0 %v2001_v54, %s3092_s0 }
 0x685   :  { %2753 = vmatmul.msk.f32.gmra.mxu2 %vm284_vm5, %v2001_v54 }
 0x689   :  { %v1987_v40 = vpop.f32.mrf.mxu1 }
 0x68a   :  { %v2000_v25 = vadd.f32 %v1996_v13, %v1987_v40 }
 0x68c   :  { %2264 = vrot.lane.b32.xlu1 %v2000_v25, %s3092_s0  ;;  %2162 = vrot.lane.b32.xlu2 %v2001_v54, %s3091_s7 }
 0x68d   :  { %2109 = vrot.lane.b32.xlu0 %v2001_v54, %s3077_s26  ;;  %2760 = vmatmul.msk.f32.vlgmr.msra.gmra.mxu2 %vm284_vm5, %v2000_v25 }
 0x691   :  { %v1990_v50 = vpop.f32.mrf.mxu1 }
 0x692   :  { %v2002_v20 = vadd.f32 %v1998_v11, %v1990_v50 }
 0x694   :  { %2317 = vrot.lane.b32.xlu1 %v2000_v25, %s3077_s26  ;;  %2370 = vrot.lane.b32.xlu2 %v2000_v25, %s3091_s7 }
 0x695   :  { %2266 = vrot.lane.b32.xlu0 %v2002_v20, %s3092_s0  ;;  %2761 = vmatmul.msk.f32.gmra.mxu2 %vm284_vm5, %v2002_v20 }
 0x69c   :  { %2372 = vrot.lane.b32.xlu1 %v2002_v20, %s3091_s7  ;;  %2455 = vperm.xlu2 %2803, %v3745_v62  }
 0x69d   :  { %2319 = vrot.lane.b32.xlu0 %v2002_v20, %s3077_s26 }
 0x6a4   :  { %2492 = vperm.xlu1 %2805, %v3745_v62   ;;  %2806 = vset.pattern.permute.xlu2 %v3097_v4 }
 0x6a5   :  { %2474 = vperm.xlu0 %2804, %v3745_v62   ;;  %2510 = vperm.xlu2 %2806, %v3745_v62  }
 0x6ac   :  { %2807 = vset.pattern.permute.xlu1 %v3096_v59 }
 0x6ad   :  { %2478 = vperm.xlu0 %2804, %v3754_v58   ;;  %2528 = vperm.xlu1 %2807, %v3745_v62  }
 0x6ae   :  { %2808 = vset.pattern.permute.xlu2 %v3095_v60 }
 0x6af   :  { %2460 = vperm.xlu2 %2808, %v3754_v58  }
 0x6b5   :  { %2811 = vset.pattern.permute.xlu0 %v3098_v44  ;;  %2809 = vset.pattern.permute.xlu1 %v3099_v6 }
 0x6b6   :  { %2564 = vperm.xlu0 %2811, %v3745_v62   ;;  %2546 = vperm.xlu1 %2809, %v3745_v62  }
 0x6b7   :  { %2810 = vset.pattern.permute.xlu2 %v3093_v63 }
 0x6b8   :  { %2496 = vperm.xlu2 %2810, %v3754_v58  }
 0x6be   :  { %2568 = vperm.xlu0 %2811, %v3754_v58   ;;  %2812 = vset.pattern.permute.xlu1 %v3097_v4 }
 0x6bf   :  { %2514 = vperm.xlu1 %2812, %v3754_v58  }
 0x6c0   :  { %2813 = vset.pattern.permute.xlu2 %v3100_v7 }
 0x6c1   :  { %2582 = vperm.xlu2 %2813, %v3745_v62  }
 0x6c6   :  { %2817 = vset.pattern.permute.xlu0 %v3100_v7 }
 0x6c7   :  { %2814 = vset.pattern.permute.xlu1 %v3096_v59 }
 0x6c8   :  { %2532 = vperm.xlu1 %2814, %v3754_v58  }
 0x6c9   :  { %2815 = vset.pattern.permute.xlu2 %v3099_v6 }
 0x6ca   :  { %2550 = vperm.xlu2 %2815, %v3754_v58  }
 0x6d0   :  { %2816 = vset.pattern.permute.xlu1 %v3100_v7 }
 0x6d1   :  { %2586 = vperm.xlu1 %2816, %v3754_v58  }
 0x6d6   :  { %v2055_v30 = vpop.permute.xlu2 %2054 }
 0x6d7   :  { %2754 = vmatmul.msk.f32.vlgmr.msra.gmra.mxu3 %vm284_vm5, %v2055_v30 }
 0x6de   :  { %v2161_v38 = vpop.permute.xlu2 %2160 }
 0x6df   :  { %2758 = vmatmul.msk.f32.vlgmr.msra.gmra.mxu1 %vm284_vm5, %v2161_v38 }
 0x6e6   :  { %v2163_v55 = vpop.permute.xlu2 %2162 }
 0x6e7   :  { %2759 = vmatmul.msk.f32.gmra.mxu1 %vm284_vm5, %v2163_v55 }
 0x6ee   :  { %v2108_v49 = vpop.permute.xlu1 %2107  ;;  %v2371_v45 = vpop.permute.xlu2 %2370 }
 0x6ef   :  { %2756 = vmatmul.msk.f32.vlgmr.msra.gmra.mxu0 %vm284_vm5, %v2108_v49  ;;  %2766 = vmatmul.msk.f32.vlgmr.msrb.gmra.mxu1 %vm284_vm5, %v2371_v45 }
 0x6f6   :  { %v2057_v23 = vpop.permute.xlu0 %2056 }
 0x6f7   :  { %2755 = vmatmul.msk.f32.gmra.mxu3 %vm284_vm5, %v2057_v23 }
 0x6fe   :  { %v2265_v46 = vpop.permute.xlu1 %2264 }
 0x6ff   :  { %v2110_v42 = vpop.permute.xlu0 %2109  ;;  %2762 = vmatmul.msk.f32.vlgmr.msrb.gmra.mxu3 %vm284_vm5, %v2265_v46 }
 0x700   :  { %2757 = vmatmul.msk.f32.gmra.mxu0 %vm284_vm5, %v2110_v42  ;;  %v3770_v8 = vpop.f32.mrf.mxu2 }
 0x701   :  { %v2042_v17 = vmul.f32 %v3770_v8, %v3770_v8  ;;  %v2032_v21 = vsel %vm284_vm5, %v3770_v8, 0.0 }
 0x703   :  { %v2044_v14 = vsel %vm284_vm5, %v2042_v17, 0.0 }
 0x706   :  { %v2318_v56 = vpop.permute.xlu1 %2317 }
 0x707   :  { %v2267_v57 = vpop.permute.xlu0 %2266 }
 0x708   :  { %2763 = vmatmul.msk.f32.gmra.mxu3 %vm284_vm5, %v2267_v57  ;;  %2764 = vmatmul.msk.f32.vlgmr.msrb.gmra.mxu0 %vm284_vm5, %v2318_v56  ;;  %v3772_v9 = vpop.f32.mrf.mxu2 }
 0x709   :  { %v2043_v52 = vmul.f32 %v3772_v9, %v3772_v9  ;;  %v2033_v32 = vsel %vm286_vm4, %v3772_v9, 0.0 }
 0x70a   :  { %v2034_v18 = vadd.f32 %v2033_v32, %v2032_v21 }
 0x70b   :  { %v2045_v33 = vsel %vm286_vm4, %v2043_v52, 0.0 }
 0x70c   :  { %v2046_v48 = vadd.f32 %v2045_v33, %v2044_v14  ;;  %v2035_v34 = vrot.slane %v2034_v18, 4 }
 0x70e   :  { %v2373_v1 = vpop.permute.xlu1 %2372  ;;  %v2047_v15 = vrot.slane %v2046_v48, 4  ;;  %v2036_v54 = vadd.f32 %v2035_v34, %v2034_v18 }
 0x70f   :  { %v2320_v28 = vpop.permute.xlu0 %2319  ;;  %2767 = vmatmul.msk.f32.gmra.mxu1 %vm284_vm5, %v2373_v1 }
 0x710   :  { %2765 = vmatmul.msk.f32.gmra.mxu0 %vm284_vm5, %v2320_v28  ;;  %v3774_v47 = vpop.f32.mrf.mxu2  ;;  %v2048_v13 = vadd.f32 %v2047_v15, %v2046_v48  ;;  %v2037_v30 = vrot.slane %v2036_v54, 2 }
 0x711   :  { %v2252_v61 = vmul.f32 %v3774_v47, %v3774_v47  ;;  %v2242_v36 = vsel %vm284_vm5, %v3774_v47, 0.0 }
 0x712   :  { %v2049_v38 = vrot.slane %v2048_v13, 2  ;;  %v2038_v52 = vadd.f32 %v2037_v30, %v2036_v54 }
 0x713   :  { %v2254_v2 = vsel %vm284_vm5, %v2252_v61, 0.0 }
 0x714   :  { %v2050_v17 = vadd.f32 %v2049_v38, %v2048_v13  ;;  %v2039_v34 = vrot.slane %v2038_v52, 1 }
 0x718   :  { %v3782_v10 = vpop.f32.mrf.mxu2 }
 0x719   :  { %v2253_v12 = vmul.f32 %v3782_v10, %v3782_v10  ;;  %v2243_v19 = vsel %vm286_vm4, %v3782_v10, 0.0 }
 0x71a   :  { %v2244_v3 = vadd.f32 %v2243_v19, %v2242_v36 }
 0x71b   :  { %v2255_v26 = vsel %vm286_vm4, %v2253_v12, 0.0 }
 0x71c   :  { %v2256_v5 = vadd.f32 %v2255_v26, %v2254_v2  ;;  %v2245_v40 = vrot.slane %v2244_v3, 4 }
 0x71e   :  { %v2257_v25 = vrot.slane %v2256_v5, 4  ;;  %v2246_v49 = vadd.f32 %v2245_v40, %v2244_v3 }
 0x720   :  { %v2258_v42 = vadd.f32 %v2257_v25, %v2256_v5  ;;  %v2247_v32 = vrot.slane %v2246_v49, 2 }
 0x722   :  { %v2259_v48 = vrot.slane %v2258_v42, 2  ;;  %v3844_v2 = vadd.f32 %v2247_v32, %v2246_v49  ;;  %v2040_v49 = vadd.f32 %v2039_v34, %v2038_v52 }
 0x75a   :  { %v3809_v51 = vpop.f32.mrf.mxu3 }
 0x75b   :  { %v2095_v11 = vmul.f32 %v3809_v51, %v3809_v51  ;;  %v2085_v45 = vsel %vm284_vm5, %v3809_v51, 0.0 }
 0x75c   :  { %v3776_v41 = vpop.f32.mrf.mxu1 }
 0x75d   :  { %v2191_v16 = vsel %vm284_vm5, %v3776_v41, 0.0  ;;  %v2201_v22 = vmul.f32 %v3776_v41, %v3776_v41  ;;  %v2097_v56 = vsel %vm284_vm5, %v2095_v11, 0.0 }
 0x75f   :  { %v2203_v53 = vsel %vm284_vm5, %v2201_v22, 0.0 }
 0x764   :  { %v3787_v43 = vpop.f32.mrf.mxu1 }
 0x765   :  { %v2192_v35 = vsel %vm286_vm4, %v3787_v43, 0.0  ;;  %v2202_v29 = vmul.f32 %v3787_v43, %v3787_v43 }
 0x766   :  { %v2193_v27 = vadd.f32 %v2192_v35, %v2191_v16 }
 0x767   :  { %v2204_v0 = vsel %vm286_vm4, %v2202_v29, 0.0 }
 0x768   :  { %v2194_v24 = vrot.slane %v2193_v27, 4  ;;  %v2205_v37 = vadd.f32 %v2204_v0, %v2203_v53  ;;  %v2051_v0 = vrot.slane %v2050_v17, 1  ;;  %v3846_v53 = vadd.f32 %v2259_v48, %v2258_v42 }
 0x76a   :  { %v2195_v50 = vadd.f32 %v2194_v24, %v2193_v27  ;;  %v2206_v20 = vrot.slane %v2205_v37, 4  ;;  %v2261_v42 = vrot.slane %v3846_v53, 1 }
 0x76c   :  { %v3814_v39 = vpop.f32.mrf.mxu0  ;;  %v2196_v31 = vrot.slane %v2195_v50, 2  ;;  %v2207_v60 = vadd.f32 %v2206_v20, %v2205_v37  ;;  %v3840_v16 = vpop.f32.mrf.mxu1 }
 0x76d   :  { %v2148_v57 = vmul.f32 %v3814_v39, %v3814_v39  ;;  %v2138_v1 = vsel %vm284_vm5, %v3814_v39, 0.0  ;;  %v2411_v24 = vmul.f32 %v3840_v16, %v3840_v16 }
 0x76e   :  { %v2197_v61 = vadd.f32 %v2196_v31, %v2195_v50  ;;  %v2208_v19 = vrot.slane %v2207_v60, 2 }
 0x76f   :  { %v2150_v21 = vsel %vm284_vm5, %v2148_v57, 0.0 }
 0x770   :  { %v2198_v40 = vrot.slane %v2197_v61, 1  ;;  %v2209_v25 = vadd.f32 %v2208_v19, %v2207_v60  ;;  %v2401_v60 = vsel %vm284_vm5, %v3840_v16, 0.0 }
 0x772   :  { %v2199_v31 = vadd.f32 %v2198_v40, %v2197_v61 }
 0x77a   :  { %v3818_v55 = vpop.f32.mrf.mxu3 }
 0x77b   :  { %v2086_v23 = vsel %vm286_vm4, %v3818_v55, 0.0  ;;  %v2096_v46 = vmul.f32 %v3818_v55, %v3818_v55 }
 0x77c   :  { %v2087_v63 = vadd.f32 %v2086_v23, %v2085_v45  ;;  %v2052_v45 = vadd.f32 %v2051_v0, %v2050_v17  ;;  %v2249_v23 = vrot.slane %v3844_v2, 1 }
 0x77d   :  { %v2098_v28 = vsel %vm286_vm4, %v2096_v46, 0.0  ;;  %v3832_v59 = vpop.f32.mrf.mxu0 }
 0x77e   :  { %v2088_v4 = vrot.slane %v2087_v63, 4  ;;  %v2099_v44 = vadd.f32 %v2098_v28, %v2097_v56  ;;  %v2139_v6 = vsel %vm286_vm4, %v3832_v59, 0.0  ;;  %v2149_v7 = vmul.f32 %v3832_v59, %v3832_v59 }
 0x77f   :  { %v2140_v33 = vadd.f32 %v2139_v6, %v2138_v1  ;;  %v2210_v1 = vrot.slane %v2209_v25, 1  ;;  %v2413_v28 = vsel %vm284_vm5, %v2411_v24, 0.0 }
 0x780   :  { %v2089_v14 = vadd.f32 %v2088_v4, %v2087_v63  ;;  %v2100_v12 = vrot.slane %v2099_v44, 4  ;;  %v2151_v18 = vsel %vm286_vm4, %v2149_v7, 0.0 }
 0x781   :  { %v2141_v35 = vrot.slane %v2140_v33, 4  ;;  %v2152_v29 = vadd.f32 %v2151_v18, %v2150_v21 }
 0x782   :  { %v2090_v22 = vrot.slane %v2089_v14, 2  ;;  %v2101_v26 = vadd.f32 %v2100_v12, %v2099_v44  ;;  %v3842_v27 = vpop.f32.mrf.mxu3 }
 0x783   :  { %v2142_v15 = vadd.f32 %v2141_v35, %v2140_v33  ;;  %v2153_v36 = vrot.slane %v2152_v29, 4  ;;  %v2305_v38 = vmul.f32 %v3842_v27, %v3842_v27  ;;  %v2295_v6 = vsel %vm284_vm5, %v3842_v27, 0.0 }
 0x784   :  { %v2091_v3 = vadd.f32 %v2090_v22, %v2089_v14  ;;  %v2102_v5 = vrot.slane %v2101_v26, 2 }
 0x785   :  { %v2143_v37 = vrot.slane %v2142_v15, 2  ;;  %v2154_v54 = vadd.f32 %v2153_v36, %v2152_v29  ;;  %v3850_v13 = vpop.f32.mrf.mxu0  ;;  %v2307_v7 = vsel %vm284_vm5, %v2305_v38, 0.0 }
 0x786   :  { %v2092_v11 = vrot.slane %v2091_v3, 1  ;;  %v2103_v50 = vadd.f32 %v2102_v5, %v2101_v26  ;;  %v2348_v17 = vsel %vm284_vm5, %v3850_v13, 0.0  ;;  %v2358_v32 = vmul.f32 %v3850_v13, %v3850_v13 }
 0x787   :  { %v2144_v20 = vadd.f32 %v2143_v37, %v2142_v15  ;;  %v2155_v30 = vrot.slane %v2154_v54, 2 }
 0x788   :  { %v2104_v46 = vrot.slane %v2103_v50, 1  ;;  %v2093_v56 = vadd.f32 %v2092_v11, %v2091_v3  ;;  %v2360_v40 = vsel %vm284_vm5, %v2358_v32, 0.0  ;;  %v2250_v32 = vadd.f32 %v2249_v23, %v3844_v2 }
 0x789   :  { %v2145_v57 = vrot.slane %v2144_v20, 1  ;;  %v2156_v63 = vadd.f32 %v2155_v30, %v2154_v54 }
 0x78a   :  { %v2105_v4 = vadd.f32 %v2104_v46, %v2103_v50  ;;  %v2094_v12 = vadd.f32 %v2093_v56, %v2040_v49 }
 0x78b   :  { %v2157_v44 = vrot.slane %v2156_v63, 1  ;;  %v3862_v52 = vpop.f32.mrf.mxu3  ;;  %v2146_v18 = vadd.f32 %v2145_v57, %v2144_v20 }
 0x78c   :  { %v2296_v33 = vsel %vm286_vm4, %v3862_v52, 0.0  ;;  %v2306_v21 = vmul.f32 %v3862_v52, %v3862_v52  ;;  %v3872_v14 = vpop.f32.mrf.mxu1  ;;  %v2106_v34 = vadd.f32 %v2105_v4, %v2052_v45 }
 0x78d   :  { %v2297_v48 = vadd.f32 %v2296_v33, %v2295_v6  ;;  %v3874_v35 = vpop.f32.mrf.mxu0  ;;  %v2402_v29 = vsel %vm286_vm4, %v3872_v14, 0.0  ;;  %v2158_v15 = vadd.f32 %v2157_v44, %v2156_v63  ;;  %v2412_v37 = vmul.f32 %v3872_v14, %v3872_v14 }
 0x78e   :  { %v2308_v61 = vsel %vm286_vm4, %v2306_v21, 0.0  ;;  %v2349_v19 = vsel %vm286_vm4, %v3874_v35, 0.0  ;;  %v2359_v22 = vmul.f32 %v3874_v35, %v3874_v35  ;;  %v2403_v26 = vadd.f32 %v2402_v29, %v2401_v60 }
 0x78f   :  { %v2298_v36 = vrot.slane %v2297_v48, 4  ;;  %v2309_v0 = vadd.f32 %v2308_v61, %v2307_v7  ;;  %v2350_v3 = vadd.f32 %v2349_v19, %v2348_v17  ;;  %v2147_v54 = vadd.f32 %v2146_v18, %v2094_v12 }
 0x790   :  { %v2361_v5 = vsel %vm286_vm4, %v2359_v22, 0.0  ;;  %v2404_v24 = vrot.slane %v2403_v26, 4  ;;  %v2414_v49 = vsel %vm286_vm4, %v2412_v37, 0.0  ;;  %v2159_v45 = vadd.f32 %v2158_v15, %v2106_v34 }
 0x791   :  { %v2299_v11 = vadd.f32 %v2298_v36, %v2297_v48  ;;  %v2310_v50 = vrot.slane %v2309_v0, 4  ;;  %v2351_v20 = vrot.slane %v2350_v3, 4  ;;  %v2362_v30 = vadd.f32 %v2361_v5, %v2360_v40 }
 0x792   :  { %v2405_v38 = vadd.f32 %v2404_v24, %v2403_v26  ;;  %v2415_v57 = vadd.f32 %v2414_v49, %v2413_v28  ;;  %v2211_v63 = vadd.f32 %v2210_v1, %v2209_v25  ;;  %v2200_v6 = vadd.f32 %v2199_v31, %v2147_v54 }
 0x793   :  { %v2300_v46 = vrot.slane %v2299_v11, 2  ;;  %v2311_v56 = vadd.f32 %v2310_v50, %v2309_v0  ;;  %v2352_v60 = vadd.f32 %v2351_v20, %v2350_v3  ;;  %v2363_v4 = vrot.slane %v2362_v30, 4 }
 0x794   :  { %v2406_v44 = vrot.slane %v2405_v38, 2  ;;  %v2416_v33 = vrot.slane %v2415_v57, 4  ;;  %v2212_v48 = vadd.f32 %v2211_v63, %v2159_v45  ;;  %v2262_v25 = vadd.f32 %v2261_v42, %v3846_v53 }
 0x795   :  { %v2301_v7 = vadd.f32 %v2300_v46, %v2299_v11  ;;  %v2312_v17 = vrot.slane %v2311_v56, 2  ;;  %v2353_v21 = vrot.slane %v2352_v60, 2  ;;  %v2364_v12 = vadd.f32 %v2363_v4, %v2362_v30 }
 0x796   :  { %v2407_v18 = vadd.f32 %v2406_v44, %v2405_v38  ;;  %v2417_v19 = vadd.f32 %v2416_v33, %v2415_v57  ;;  %v2251_v22 = vadd.f32 %v2250_v32, %v2200_v6  ;;  %v2263_v23 = vadd.f32 %v2262_v25, %v2212_v48  ;;  %v3892_v38 = vpop.permute.xlu2 %2455  ;;  %v3894_v57 = vpop.permute.xlu1 %2492 }
 0x797   :  { %v2302_v29 = vrot.slane %v2301_v7, 1  ;;  %v2313_v61 = vadd.f32 %v2312_v17, %v2311_v56  ;;  %v2354_v1 = vadd.f32 %v2353_v21, %v2352_v60  ;;  %v2365_v28 = vrot.slane %v2364_v12, 2 }
 0x798   :  { %v2418_v34 = vrot.slane %v2417_v19, 2  ;;  %v2408_v2 = vrot.slane %v2407_v18, 1 }
 0x799   :  { %v2303_v31 = vadd.f32 %v2302_v29, %v2301_v7  ;;  %v2314_v26 = vrot.slane %v2313_v61, 1  ;;  %v2355_v15 = vrot.slane %v2354_v1, 1  ;;  %v2366_v36 = vadd.f32 %v2365_v28, %v2364_v12  ;;  %v2475_v12 = vpop.permute.xlu0 %2474  ;;  %v1936_v28 = vld [vmem:[%s4010_s17 + $0x8] sm:$0xff] }
 0x79a   :  { %v2419_v5 = vadd.f32 %v2418_v34, %v2417_v19  ;;  %v2409_v53 = vadd.f32 %v2408_v2, %v2407_v18  ;;  %v1933_v18 = vld [vmem:[%s4008_s15] sm:$0x1]  ;;  %v1937_v19 = vld [vmem:[%s4010_s17 + $0x10] sm:$0xff] }
 0x79b   :  { %v2304_v0 = vadd.f32 %v2303_v31, %v2251_v22  ;;  %v2315_v3 = vadd.f32 %v2314_v26, %v2313_v61  ;;  %v2356_v24 = vadd.f32 %v2355_v15, %v2354_v1  ;;  %v2367_v37 = vrot.slane %v2366_v36, 1  ;;  %v1938_v61 = vld [vmem:[%s4010_s17 + $0x18] sm:$0xff]  ;;  %v1934_v22 = vld [vmem:[%s4009_s16] sm:$0x1] }
 0x79c   :  { %v2420_v40 = vrot.slane %v2419_v5, 1  ;;  %2624 = vmatpush.msrb.mxu2 %v1938_v61  ;;  %v1935_v34 = vld [vmem:[%s4010_s17] sm:$0xff] }
 0x79d   :  { %v2316_v54 = vadd.f32 %v2315_v3, %v2263_v23  ;;  %v2357_v11 = vadd.f32 %v2356_v24, %v2304_v0  ;;  %v2368_v50 = vadd.f32 %v2367_v37, %v2366_v36 }
 0x79e   :  { %v2421_v30 = vadd.f32 %v2420_v40, %v2419_v5  ;;  %v3896_v4 = vpop.permute.xlu2 %2510  ;;  %v3898_v44 = vpop.permute.xlu1 %2528  ;;  %2625 = vmatpush.msrb.mxu2 %v1937_v19 }
 0x79f   :  { %v2369_v42 = vadd.f32 %v2368_v50, %v2316_v54  ;;  %v2410_v20 = vadd.f32 %v2409_v53, %v2357_v11 }
 0x7a0   :  { %2626 = vmatpush.msrb.mxu2 %v1936_v28 }
 0x7a1   :  { %v2422_v49 = vadd.f32 %v2421_v30, %v2369_v42  ;;  %v2423_v45 = vmul.f32 0.008928572, %v2410_v20  ;;  %v2479_v2 = vpop.permute.xlu0 %2478 }
 0x7a2   :  { %2627 = vmatpush.msrb.mxu2 %v1935_v34 }
 0x7a3   :  { %v2424_v46 = vmul.f32 0.008928572, %v2422_v49  ;;  %v2425_v56 = vmul.f32 %v2423_v45, %v2423_v45 }
 0x7a5   :  { %v2426_v63 = vsub.f32 %v2424_v46, %v2425_v56 }
 0x7a6   :  { %v3900_v32 = vpop.permute.xlu2 %2460  ;;  %v3905_v29 = vpop.permute.xlu1 %2546 }
 0x7a7   :  { %v2427_v60 = vadd.f32 1e-05, %v2426_v63 }
 0x7a9   :  { %2825 = vrsqrt.f32 %v2427_v60  ;;  %vm2434_vm1 = vweird.f32 %v2427_v60  ;;  %v2565_v61 = vpop.permute.xlu0 %2564 }
 0x7ae   :  { %v2497_v15 = vpop.permute.xlu2 %2496  ;;  %v2515_v40 = vpop.permute.xlu1 %2514 }
 0x7af   :  { %v2826_v6 = vpop.eup %2825 }
 0x7b0   :  { %v2429_v7 = vmul.f32 %v2826_v6, %v2427_v60  ;;  %vm2435_vm0 = vweird.f32 %v2826_v6 }
 0x7b1   :  { %vm2436_vm4 = vmor %vm2434_vm1, %vm2435_vm0 }
 0x7b2   :  { %v2430_v17 = vmul.f32 %v2826_v6, %v2429_v7 }
 0x7b4   :  { %v2431_v33 = vmul.f32 0.5, %v2430_v17 }
 0x7b6   :  { %v2432_v21 = vsub.f32 1.5, %v2431_v33  ;;  %v2583_v17 = vpop.permute.xlu2 %2582 }
 0x7b8   :  { %v2433_v48 = vmul.f32 %v2826_v6, %v2432_v21 }
 0x7ba   :  { %v2437_v25 = vsel %vm2436_vm4, %v2826_v6, %v2433_v48 }
 0x7bb   :  { %v2438_v1 = vmul.f32 %v2437_v25, %v1933_v18 }
 0x7bd   :  { %v2439_v31 = vmul.f32 %v2438_v1, %v2423_v45  ;;  %v3919_v26 = vperm.slane %v2438_v1, 0 }
 0x7bf   :  { %v2440_v36 = vsub.f32 %v1934_v22, %v2439_v31  ;;  %v2485_v0 = vmul.f32 %v3919_v26, %v3814_v39  ;;  %v2444_v3 = vmul.f32 %v3919_v26, %v3770_v8  ;;  %v2521_v5 = vmul.f32 %v3919_v26, %v3774_v47  ;;  %v2533_v31 = vpop.permute.xlu1 %2532 }
 0x7c0   :  { %v2503_v24 = vmul.f32 %v3919_v26, %v3776_v41  ;;  %v2445_v37 = vmul.f32 %v3919_v26, %v3772_v9  ;;  %v2467_v54 = vmul.f32 %v3919_v26, %v3809_v51  ;;  %v2539_v8 = vmul.f32 %v3919_v26, %v3842_v27 }
 0x7c1   :  { %v3924_v23 = vperm.slane %v2440_v36, 0  ;;  %v2504_v47 = vmul.f32 %v3919_v26, %v3787_v43  ;;  %v2576_v51 = vmul.f32 %v3919_v26, %v3872_v14  ;;  %v2486_v43 = vmul.f32 %v3919_v26, %v3832_v59 }
 0x7c2   :  { %v2468_v45 = vmul.f32 %v3919_v26, %v3818_v55  ;;  %v2522_v63 = vmul.f32 %v3919_v26, %v3782_v10  ;;  %v2575_v14 = vmul.f32 %v3919_v26, %v3840_v16  ;;  %v2557_v33 = vmul.f32 %v3919_v26, %v3850_v13 }
 0x7c3   :  { %v2487_v11 = vadd.f32 %v2485_v0, %v3924_v23  ;;  %v2449_v39 = vadd.f32 %v3924_v23, %v2444_v3  ;;  %v2523_v50 = vadd.f32 %v2521_v5, %v3924_v23  ;;  %v2505_v41 = vadd.f32 %v2503_v24, %v3924_v23 }
 0x7c4   :  { %v2450_v9 = vadd.f32 %v3924_v23, %v2445_v37  ;;  %v2469_v53 = vadd.f32 %v2467_v54, %v3924_v23  ;;  %v2541_v20 = vadd.f32 %v2539_v8, %v3924_v23  ;;  %v2506_v30 = vadd.f32 %v2504_v47, %v3924_v23 }
 0x7c5   :  { %v2451_v42 = vmax.f32 %v2449_v39, 0.0  ;;  %v2489_v27 = vmax.f32 %v2487_v11, 0.0  ;;  %v2525_v60 = vmax.f32 %v2523_v50, 0.0  ;;  %v2507_v6 = vmax.f32 %v2505_v41, 0.0  ;;  %v2551_v50 = vpop.permute.xlu2 %2550 }
 0x7c6   :  { %v2471_v49 = vmax.f32 %v2469_v53, 0.0  ;;  %v2452_v56 = vmax.f32 %v2450_v9, 0.0  ;;  %v2543_v59 = vmax.f32 %v2541_v20, 0.0  ;;  %v2508_v21 = vmax.f32 %v2506_v30, 0.0 }
 0x7c7   :  { %v2463_v46 = vmul.f32 %v3892_v38, %v2451_v42  ;;  %v2488_v55 = vadd.f32 %v2486_v43, %v3924_v23  ;;  %v2470_v38 = vadd.f32 %v2468_v45, %v3924_v23  ;;  %v2499_v18 = vmul.f32 %v3894_v57, %v2489_v27  ;;  %v2569_v42 = vpop.permute.xlu0 %2568  ;;  %v2587_v27 = vpop.permute.xlu1 %2586 }
 0x7c8   :  { %v2481_v7 = vmul.f32 %v2475_v12, %v2471_v49  ;;  %v2524_v10 = vadd.f32 %v2522_v63, %v3924_v23  ;;  %v2559_v16 = vadd.f32 %v2557_v33, %v3924_v23  ;;  %v2464_v12 = vmul.f32 %v3900_v32, %v2452_v56 }
 0x7c9   :  { %v2490_v19 = vmax.f32 %v2488_v55, 0.0  ;;  %v2472_v25 = vmax.f32 %v2470_v38, 0.0  ;;  %v2540_v13 = vmul.f32 %v3919_v26, %v3862_v52  ;;  %v2535_v1 = vmul.f32 %v3898_v44, %v2525_v60 }
 0x7ca   :  { %v2483_v48 = vadd.f32 %v2481_v7, %v2463_v46  ;;  %v2517_v28 = vmul.f32 %v3896_v4, %v2507_v6  ;;  %v2577_v57 = vadd.f32 %v2575_v14, %v3924_v23  ;;  %v2553_v34 = vmul.f32 %v3905_v29, %v2543_v59  ;;  %v2820_v46 = vld [vmem:[%s4011_s18] ss:$0 sm:$0xff] }
 0x7cb   :  { %v2518_v36 = vmul.f32 %v2515_v40, %v2508_v21  ;;  %v2482_v0 = vmul.f32 %v2479_v2, %v2472_v25  ;;  %v2542_v3 = vadd.f32 %v2540_v13, %v3924_v23  ;;  %v2500_v5 = vmul.f32 %v2497_v15, %v2490_v19 }
 0x7cc   :  { %v2501_v22 = vadd.f32 %v2499_v18, %v2483_v48  ;;  %v2526_v24 = vmax.f32 %v2524_v10, 0.0  ;;  %v2561_v37 = vmax.f32 %v2559_v16, 0.0  ;;  %v2558_v52 = vmul.f32 %v3919_v26, %v3874_v35 }
 0x7cd   :  { %v2484_v54 = vadd.f32 %v2482_v0, %v2464_v12  ;;  %v2579_v4 = vmax.f32 %v2577_v57, 0.0  ;;  %v2594_v11 = vsel %vm2593_vm6, %v3745_v62, 0.0  ;;  %v2598_v29 = vsel %vm2597_vm7, %v3754_v58, 0.0 }
 0x7ce   :  { %v2519_v32 = vadd.f32 %v2517_v28, %v2501_v22  ;;  %v2578_v2 = vadd.f32 %v2576_v51, %v3924_v23  ;;  %v2544_v39 = vmax.f32 %v2542_v3, 0.0  ;;  %v2560_v15 = vadd.f32 %v2558_v52, %v3924_v23  ;;  %2595 = vadd.xlane.f32.xlu2 %v2594_v11  ;;  %2599 = vadd.xlane.f32.xlu0 %v2598_v29 }
 0x7cf   :  { %v2502_v40 = vadd.f32 %v2500_v5, %v2484_v54  ;;  %v2571_v47 = vmul.f32 %v2565_v61, %v2561_v37  ;;  %v2536_v26 = vmul.f32 %v2533_v31, %v2526_v24  ;;  %v2589_v9 = vmul.f32 %v2583_v17, %v2579_v4 }
 0x7d0   :  { %v2537_v44 = vadd.f32 %v2535_v1, %v2519_v32  ;;  %v2562_v41 = vmax.f32 %v2560_v15, 0.0  ;;  %v2580_v20 = vmax.f32 %v2578_v2, 0.0  ;;  %v2554_v58 = vmul.f32 %v2551_v50, %v2544_v39 }
 0x7d1   :  { %v2520_v35 = vadd.f32 %v2518_v36, %v2502_v40 }
 0x7d2   :  { %v2555_v8 = vadd.f32 %v2553_v34, %v2537_v44  ;;  %v2572_v49 = vmul.f32 %v2569_v42, %v2562_v41  ;;  %v2590_v23 = vmul.f32 %v2587_v27, %v2580_v20 }
 0x7d3   :  { %v2538_v62 = vadd.f32 %v2536_v26, %v2520_v35 }
 0x7d4   :  { %v2573_v53 = vadd.f32 %v2571_v47, %v2555_v8 }
 0x7d5   :  { %v2556_v51 = vadd.f32 %v2554_v58, %v2538_v62 }
 0x7d6   :  { %v2591_v30 = vadd.f32 %v2589_v9, %v2573_v53 }
 0x7d7   :  { %v2574_v43 = vadd.f32 %v2572_v49, %v2556_v51 }
 0x7d8   :  { %2768 = vmatmul.msk.f32.vlgmr.msrb.gmra.mxu2 %vm284_vm5, %v2591_v30 }
 0x7d9   :  { %v2592_v45 = vadd.f32 %v2590_v23, %v2574_v43 }
 0x7e0   :  { %2769 = vmatmul.msk.f32.gmra.mxu2 %vm284_vm5, %v2592_v45  ;;  %vm2637_vm5 = vcmask 128000  }
 0x841   :  { %v2596_v56 = vpop.xlane.xlu2 %2595  ;;  %v2600_v6 = vpop.xlane.xlu0 %2599 }
 0x842   :  { %v2604_v63 = vmul.f32 %v2820_v46, %v2596_v56  ;;  %v2605_v7 = vmul.f32 %v2820_v46, %v2600_v6 }
 0x85b   :  { %v2629_v14 = vpop.f32.mrf.mxu2 }
 0x85c   :  { %v2630_v60 = vadd.f32 %v2629_v14, %v2604_v63 }
 0x85e   :  { %2636 = vst.msk [vmem:[#allocation19] sm:$0xff] %vm2635_vm8, %v2630_v60 }
 0x863   :  { %v2632_v17 = vpop.f32.mrf.mxu2 }
 0x864   :  { %v2633_v33 = vadd.f32 %v2632_v17, %v2605_v7 }
 0x866   :  { %2638 = vst.msk [vmem:[#allocation19 + $0x8] sm:$0x3f] %vm2637_vm5, %v2633_v33 }
 0x867   :  { %2651 = dma.vmem_to_hbm [thread:$0]  %s2644_s28, 256, %s2646_s10, [#allocation5], %s4026_s1, %s4026_s1, %s4025_s6  }
 0x868   :  { %3069 = dma.done.wait [#allocation5], 256  }
 0x869   :  { %3070 = vsyncadd [#allocation5], 4294967040 }
 0x86a   :  { %2656 = vsyncpa [#allocation4], 1 }
 0x86b   :  { %2657 = vsyncpa [#allocation8], 1 }
 0x86c   :  { %2658 = vsyncpa [#allocation12], 1 }
 0x86d   :  { %2659 = vsyncpa [#allocation15], 1 }
 0x86e   :  { %2660 = vsyncpa [#allocation18], 1 }
 0x86f   :  { %2661 = vsyncpa [#allocation5], 1 }
 0x870   :  { %2662 = vsyncpa [#allocation6], 1 }

</bundles_post_ra>
